<compile_context>
chip_gen: v6e
topology: v6e:2x2x1
jax: 0.10.0
libtpu: 0.0.40
codegen_flags: <defaults>
</compile_context>

<pallas_src>
import math

import jax
import jax.numpy as jnp
from jax.experimental import pallas as pl
from jax.experimental.pallas import tpu as pltpu


def _round_up(x, m):
    return ((x + m - 1) // m) * m


def _pad_last(a, target):
    pad = target - a.shape[-1]
    if pad == 0:
        return a
    return jnp.pad(a, [(0, 0)] * (a.ndim - 1) + [(0, pad)])


# ----------------------------------------------------------------------------
# Fused kernel: grid = (batch tiles, lane-dense D tiles).
# ----------------------------------------------------------------------------
def hdradar_kernel(x_ref, w_ref, pb_ref, spb_ref, eb_ref, seb_ref, m_ref,
                   res_ref, enc_ref):
    d = pl.program_id(1)

    @pl.when(d == 0)
    def _():
        res_ref[...] = jnp.zeros_like(res_ref)

    # Random projection on the MXU: bf16 (TN, F) @ (F, TD), f32 accumulation.
    proj = jnp.dot(x_ref[...], w_ref[...], preferred_element_type=jnp.float32)

    # Sinusoid embedding via product-to-sum:
    #   cos(p + pb) * sin(p) = 0.5 * (sin(2p + pb) - sin(pb)),  sin(pb) precomputed.
    enc1 = 0.5 * (jnp.sin(2.0 * proj + pb_ref[...]) - spb_ref[...])

    # Second mix + hard_quantize: only the sign of
    #   cos(enc1 + eb) * sin(enc1) = 0.5 * (sin(2*enc1 + eb) - sin(eb))
    # matters, so compare sin(2*enc1 + eb) against the precomputed sin(eb).
    pos = jnp.sin(2.0 * enc1 + eb_ref[...]) > seb_ref[...]

    # Bipolar {-1, +1} hypervector, written back as bf16 (exact values).
    enc_ref[...] = jnp.where(pos, 1.0, -1.0).astype(enc_ref.dtype)

    # res += sum_d enc * M  ==  sum_d where(pos, M, -M); resident (TN,1) acc.
    m = m_ref[...]
    res_ref[...] += jnp.sum(jnp.where(pos, m, -m), axis=1, keepdims=True)


def hdradar_forward(x, params, *, d_tile=1024, n_tile=256):
    """HDradarECG.forward(x, train=False) -> (res, enc)."""
    N = x.shape[0]
    xf = x.reshape(N, -1).astype(jnp.bfloat16)        # x.view(x.size(0), -1)
    F = xf.shape[1]
    w_t = params["proj_w_t"].astype(jnp.bfloat16)     # (F, D)
    D = w_t.shape[1]

    pb = params["proj_b"].astype(jnp.float32)
    spb = params["sin_proj_b"].astype(jnp.float32)
    eb = params["enc_b"].astype(jnp.float32)
    seb = params["sin_enc_b"].astype(jnp.float32)
    M = params["M"].astype(jnp.float32)

    # Lane-dense tiling of the hypervector dimension: pad D up to a multiple
    # of the (128-aligned) tile instead of collapsing to one unaligned block.
    td = min(d_tile, _round_up(D, 128))
    D_pad = _round_up(D, td)
    nd = D_pad // td

    # Batch tiling (independent axis -> sharded across v7x's 2 TensorCores).
    if N >= n_tile:
        N_pad = _round_up(N, n_tile)
        tn = n_tile
    else:
        N_pad = N
        tn = N
    nn = N_pad // tn

    if N_pad != N:
        xf = jnp.pad(xf, ((0, N_pad - N), (0, 0)))
    w_t = _pad_last(w_t, D_pad)                       # zero-padded cols: M=0 => no res effect
    pb = _pad_last(pb, D_pad)
    spb = _pad_last(spb, D_pad)
    eb = _pad_last(eb, D_pad)
    seb = _pad_last(seb, D_pad)
    Mp = _pad_last(M, D_pad)

    res, enc = pl.pallas_call(
        hdradar_kernel,
        out_shape=(jax.ShapeDtypeStruct((N_pad, 1), jnp.float32),
                   jax.ShapeDtypeStruct((N_pad, D_pad), jnp.bfloat16)),
        grid=(nn, nd),
        in_specs=[
            pl.BlockSpec((tn, F), lambda n, d: (n, 0)),        # flattened input (bf16)
            pl.BlockSpec((F, td), lambda n, d: (0, d)),        # projection W.T (bf16)
            pl.BlockSpec((1, td), lambda n, d: (0, d)),        # Sinusoid bias
            pl.BlockSpec((1, td), lambda n, d: (0, d)),        # sin(Sinusoid bias)
            pl.BlockSpec((1, td), lambda n, d: (0, d)),        # encode bias
            pl.BlockSpec((1, td), lambda n, d: (0, d)),        # sin(encode bias)
            pl.BlockSpec((1, td), lambda n, d: (0, d)),        # class memory M
        ],
        out_specs=(
            pl.BlockSpec((tn, 1), lambda n, d: (n, 0)),        # res (resident accumulator)
            pl.BlockSpec((tn, td), lambda n, d: (n, d)),       # enc (lane-dense bf16 store)
        ),
        compiler_params=pltpu.CompilerParams(
            # Batch axis independent (megacore); D axis accumulates res.
            dimension_semantics=("parallel", "arbitrary"),
            vmem_limit_bytes=48 * 1024 * 1024),
    )(xf, w_t, pb, spb, eb, seb, Mp)

    return res[:N, 0], enc[:N, :D]


# ----------------------------------------------------------------------------
# Parameter initialization matching the PyTorch module.
# ----------------------------------------------------------------------------
def init_params(key, feat, dim):
    k_w, k_pb, k_eb, k_m = jax.random.split(key, 4)
    # torchhd.embeddings.Sinusoid: weight ~ N(0, 1), bias ~ U(0, 2*pi).
    w = jax.random.normal(k_w, (dim, feat), jnp.float32)
    proj_b = jax.random.uniform(k_pb, (1, dim), jnp.float32, 0.0, 2.0 * math.pi)
    # HDradarECG.bias ~ U(0, 2*pi).
    enc_b = jax.random.uniform(k_eb, (1, dim), jnp.float32, 0.0, 2.0 * math.pi)
    # HDradarECG.M starts at zeros and is learned online via model_update; use
    # deterministic random values here so the in-kernel reduction is exercised.
    M = jax.random.normal(k_m, (1, dim), jnp.float32)
    return dict(
        proj_w_t=w.T.astype(jnp.bfloat16),            # bf16 MXU path, halves W DMA
        proj_b=proj_b, sin_proj_b=jnp.sin(proj_b),    # precomputed for product-to-sum
        enc_b=enc_b, sin_enc_b=jnp.sin(enc_b),
        M=M)


def hdradar_reference(x, params):
    """Pure-JAX reference using the original cos*sin formulation.

    The projection inputs are quantized to bf16 exactly as the kernel's MXU
    path sees them, so the comparison validates the product-to-sum rewrite and
    kernel plumbing rather than the (intentional) bf16 input quantization.
    """
    N = x.shape[0]
    xf = x.reshape(N, -1).astype(jnp.bfloat16).astype(jnp.float32)
    w = params["proj_w_t"].astype(jnp.float32)
    proj = xf @ w
    enc1 = jnp.cos(proj + params["proj_b"]) * jnp.sin(proj)
    enc2 = jnp.cos(enc1 + params["enc_b"]) * jnp.sin(enc1)
    enc = jnp.where(enc2 > 0.0, 1.0, -1.0)
    res = jnp.sum(enc * params["M"], axis=1)
    return res, enc


if __name__ == "__main__":
    key = jax.random.PRNGKey(0)
    kx, kp, kx2, kp2 = jax.random.split(key, 4)

    # Small radar-ECG frames: (N, C, L) -> feat = C*L = 64.
    N, C, L = 2, 4, 16
    DIM = 1024                  # hypervector dimensionality (lane-aligned)
    x = jax.random.normal(kx, (N, C, L), jnp.float32)
    params = init_params(kp, C * L, DIM)

    res, enc = hdradar_forward(x, params)
    res = jax.block_until_ready(res)
    enc = jax.block_until_ready(enc)

    assert res.shape == (N,), res.shape
    assert enc.shape == (N, DIM), enc.shape
    # enc must be a bipolar {-1, +1} hypervector.
    assert bool(jnp.all(jnp.abs(enc.astype(jnp.float32)) == 1.0))

    # Cross-check against the pure-JAX reference.  hard_quantize is a sign
    # threshold, so tolerate a tiny fraction of borderline flips caused by
    # MXU-vs-XLA accumulation order and product-to-sum rounding near zero.
    ref_res, ref_enc = hdradar_reference(x, params)
    enc_f32 = enc.astype(jnp.float32)
    mismatch = float(jnp.mean((ref_enc != enc_f32).astype(jnp.float32)))
    assert mismatch < 0.01, f"enc sign mismatch fraction {mismatch}"
    res_from_enc = jnp.sum(enc_f32 * params["M"], axis=1)
    assert bool(jnp.allclose(res, res_from_enc, atol=1e-2)), (res, res_from_enc)

    # Second config: non-128-multiple hypervector dim exercises the padding
    # path (D padded to the next lane-dense multiple, outputs sliced back).
    N2, DIM2 = 3, 1000
    x2 = jax.random.normal(kx2, (N2, C, L), jnp.float32)
    params2 = init_params(kp2, C * L, DIM2)
    res2, enc2 = hdradar_forward(x2, params2)
    res2 = jax.block_until_ready(res2)
    assert res2.shape == (N2,) and enc2.shape == (N2, DIM2)
    ref_res2, ref_enc2 = hdradar_reference(x2, params2)
    mismatch2 = float(jnp.mean((ref_enc2 != enc2.astype(jnp.float32)).astype(jnp.float32)))
    assert mismatch2 < 0.01, f"enc sign mismatch fraction {mismatch2}"
    assert bool(jnp.allclose(res2, jnp.sum(enc2.astype(jnp.float32) * params2["M"], axis=1),
                             atol=1e-2))

    print("KERNEL_OK")
</pallas_src>

<mosaic_0001>
module attributes {stable_mosaic.version = 11 : i64} {
  func.func @hdradar_kernel(%arg0: i32, %arg1: i32, %arg2: memref<2x64xbf16, #tpu.memory_space<vmem>>, %arg3: memref<64x1024xbf16, #tpu.memory_space<vmem>>, %arg4: memref<1x1024xf32, #tpu.memory_space<vmem>>, %arg5: memref<1x1024xf32, #tpu.memory_space<vmem>>, %arg6: memref<1x1024xf32, #tpu.memory_space<vmem>>, %arg7: memref<1x1024xf32, #tpu.memory_space<vmem>>, %arg8: memref<1x1024xf32, #tpu.memory_space<vmem>>, %arg9: memref<2x1xf32, #tpu.memory_space<vmem>>, %arg10: memref<2x1024xbf16, #tpu.memory_space<vmem>>) attributes {dimension_semantics = [#tpu.dimension_semantics<parallel>, #tpu.dimension_semantics<arbitrary>], iteration_bounds = array<i64: 1, 1>, scalar_prefetch = 0 : i64, scratch_operands = 0 : i64, tpu.core_type = #tpu.core_type<tc>, window_params = [{transform_indices = @transform_0, window_bounds = array<i64: 2, 64>}, {transform_indices = @transform_1, window_bounds = array<i64: 64, 1024>}, {transform_indices = @transform_2, window_bounds = array<i64: 1, 1024>}, {transform_indices = @transform_3, window_bounds = array<i64: 1, 1024>}, {transform_indices = @transform_4, window_bounds = array<i64: 1, 1024>}, {transform_indices = @transform_5, window_bounds = array<i64: 1, 1024>}, {transform_indices = @transform_6, window_bounds = array<i64: 1, 1024>}, {transform_indices = @transform_7, window_bounds = array<i64: 2, 1>}, {transform_indices = @transform_8, window_bounds = array<i64: 2, 1024>}]} {
    %c0_i32 = arith.constant 0 : i32
    %0 = arith.cmpi eq, %arg1, %c0_i32 : i32
    %1 = arith.extui %0 : i1 to i32
    %c0_i32_0 = arith.constant 0 : i32
    %2 = arith.cmpi ne, %1, %c0_i32_0 : i32
    scf.if %2 {
      %cst_27 = arith.constant 0.000000e+00 : f32
      %44 = vector.broadcast %cst_27 : f32 to vector<2x1xf32>
      %c0_28 = arith.constant 0 : index
      %c0_29 = arith.constant 0 : index
      %45 = vector.load %arg9[%c0_28, %c0_29] : memref<2x1xf32, #tpu.memory_space<vmem>>, vector<2x1xf32>
      tpu.vector_store %arg9[%c0_28, %c0_29], %44 {strides = array<i32>} : memref<2x1xf32, #tpu.memory_space<vmem>>, vector<2x1xf32>,
    } else {
    }
    %c0 = arith.constant 0 : index
    %c0_1 = arith.constant 0 : index
    %3 = vector.load %arg2[%c0, %c0_1] : memref<2x64xbf16, #tpu.memory_space<vmem>>, vector<2x64xbf16>
    %c0_2 = arith.constant 0 : index
    %c0_3 = arith.constant 0 : index
    %4 = vector.load %arg3[%c0_2, %c0_3] : memref<64x1024xbf16, #tpu.memory_space<vmem>>, vector<64x1024xbf16>
    %cst = arith.constant dense<0.000000e+00> : vector<2x1024xf32>
    %5 = tpu.matmul %3, %4, %cst {dimension_numbers = #tpu.dot_dimension_numbers<[1], [0], [0], [1], [0, 0, 1, 1], [], []>} : vector<2x64xbf16>, vector<64x1024xbf16>, vector<2x1024xf32> -> vector<2x1024xf32>
    %cst_4 = arith.constant 2.000000e+00 : f32
    %6 = vector.broadcast %cst_4 : f32 to vector<2x1024xf32>
    %7 = arith.mulf %6, %5 : vector<2x1024xf32>
    %c0_5 = arith.constant 0 : index
    %c0_6 = arith.constant 0 : index
    %8 = vector.load %arg4[%c0_5, %c0_6] : memref<1x1024xf32, #tpu.memory_space<vmem>>, vector<1x1024xf32>
    %9 = vector.broadcast %8 : vector<1x1024xf32> to vector<2x1024xf32>
    %10 = arith.addf %7, %9 : vector<2x1024xf32>
    %11 = math.sin %10 : vector<2x1024xf32>
    %c0_7 = arith.constant 0 : index
    %c0_8 = arith.constant 0 : index
    %12 = vector.load %arg5[%c0_7, %c0_8] : memref<1x1024xf32, #tpu.memory_space<vmem>>, vector<1x1024xf32>
    %13 = vector.broadcast %12 : vector<1x1024xf32> to vector<2x1024xf32>
    %14 = arith.subf %11, %13 : vector<2x1024xf32>
    %cst_9 = arith.constant 5.000000e-01 : f32
    %15 = vector.broadcast %cst_9 : f32 to vector<2x1024xf32>
    %16 = arith.mulf %15, %14 : vector<2x1024xf32>
    %cst_10 = arith.constant 2.000000e+00 : f32
    %17 = vector.broadcast %cst_10 : f32 to vector<2x1024xf32>
    %18 = arith.mulf %17, %16 : vector<2x1024xf32>
    %c0_11 = arith.constant 0 : index
    %c0_12 = arith.constant 0 : index
    %19 = vector.load %arg6[%c0_11, %c0_12] : memref<1x1024xf32, #tpu.memory_space<vmem>>, vector<1x1024xf32>
    %20 = vector.broadcast %19 : vector<1x1024xf32> to vector<2x1024xf32>
    %21 = arith.addf %18, %20 : vector<2x1024xf32>
    %22 = math.sin %21 : vector<2x1024xf32>
    %c0_13 = arith.constant 0 : index
    %c0_14 = arith.constant 0 : index
    %23 = vector.load %arg7[%c0_13, %c0_14] : memref<1x1024xf32, #tpu.memory_space<vmem>>, vector<1x1024xf32>
    %24 = vector.broadcast %23 : vector<1x1024xf32> to vector<2x1024xf32>
    %25 = arith.cmpf ogt, %22, %24 : vector<2x1024xf32>
    %cst_15 = arith.constant 1.000000e+00 : f32
    %cst_16 = arith.constant -1.000000e+00 : f32
    %26 = vector.broadcast %cst_15 : f32 to vector<2x1024xf32>
    %27 = vector.broadcast %cst_16 : f32 to vector<2x1024xf32>
    %28 = arith.select %25, %26, %27 : vector<2x1024xi1>, vector<2x1024xf32>
    %29 = arith.truncf %28 : vector<2x1024xf32> to vector<2x1024xbf16>
    %c0_17 = arith.constant 0 : index
    %c0_18 = arith.constant 0 : index
    %30 = vector.load %arg10[%c0_17, %c0_18] : memref<2x1024xbf16, #tpu.memory_space<vmem>>, vector<2x1024xbf16>
    tpu.vector_store %arg10[%c0_17, %c0_18], %29 {strides = array<i32>} : memref<2x1024xbf16, #tpu.memory_space<vmem>>, vector<2x1024xbf16>,
    %c0_19 = arith.constant 0 : index
    %c0_20 = arith.constant 0 : index
    %31 = vector.load %arg8[%c0_19, %c0_20] : memref<1x1024xf32, #tpu.memory_space<vmem>>, vector<1x1024xf32>
    %c0_21 = arith.constant 0 : index
    %c0_22 = arith.constant 0 : index
    %32 = vector.load %arg9[%c0_21, %c0_22] : memref<2x1xf32, #tpu.memory_space<vmem>>, vector<2x1xf32>
    %cst_23 = arith.constant 0.000000e+00 : f32
    %33 = vector.broadcast %cst_23 : f32 to vector<1x1024xf32>
    %34 = arith.subf %33, %31 : vector<1x1024xf32>
    %35 = vector.shape_cast %31 : vector<1x1024xf32> to vector<1x1024xf32>
    %36 = vector.broadcast %35 : vector<1x1024xf32> to vector<2x1024xf32>
    %37 = vector.shape_cast %34 : vector<1x1024xf32> to vector<1x1024xf32>
    %38 = vector.broadcast %37 : vector<1x1024xf32> to vector<2x1024xf32>
    %39 = arith.select %25, %36, %38 : vector<2x1024xi1>, vector<2x1024xf32>
    %cst_24 = arith.constant dense<0.000000e+00> : vector<2xf32>
    %40 = vector.multi_reduction <add>, %39, %cst_24 [1] : vector<2x1024xf32> to vector<2xf32>
    %41 = vector.shape_cast %40 : vector<2xf32> to vector<2x1xf32>
    %42 = arith.addf %32, %41 : vector<2x1xf32>
    %c0_25 = arith.constant 0 : index
    %c0_26 = arith.constant 0 : index
    %43 = vector.load %arg9[%c0_25, %c0_26] : memref<2x1xf32, #tpu.memory_space<vmem>>, vector<2x1xf32>
    tpu.vector_store %arg9[%c0_25, %c0_26], %42 {strides = array<i32>} : memref<2x1xf32, #tpu.memory_space<vmem>>, vector<2x1xf32>,
    return
  }
  func.func @transform_0(%arg0: i32, %arg1: i32) -> (i32, i32) {
    %c0_i32 = arith.constant 0 : i32
    %c0_i32_0 = arith.constant 0 : i32
    return %arg0, %c0_i32 : i32, i32
  }
  func.func @transform_1(%arg0: i32, %arg1: i32) -> (i32, i32) {
    %c0_i32 = arith.constant 0 : i32
    %c0_i32_0 = arith.constant 0 : i32
    return %c0_i32, %arg1 : i32, i32
  }
  func.func @transform_2(%arg0: i32, %arg1: i32) -> (i32, i32) {
    %c0_i32 = arith.constant 0 : i32
    %c0_i32_0 = arith.constant 0 : i32
    return %c0_i32, %arg1 : i32, i32
  }
  func.func @transform_3(%arg0: i32, %arg1: i32) -> (i32, i32) {
    %c0_i32 = arith.constant 0 : i32
    %c0_i32_0 = arith.constant 0 : i32
    return %c0_i32, %arg1 : i32, i32
  }
  func.func @transform_4(%arg0: i32, %arg1: i32) -> (i32, i32) {
    %c0_i32 = arith.constant 0 : i32
    %c0_i32_0 = arith.constant 0 : i32
    return %c0_i32, %arg1 : i32, i32
  }
  func.func @transform_5(%arg0: i32, %arg1: i32) -> (i32, i32) {
    %c0_i32 = arith.constant 0 : i32
    %c0_i32_0 = arith.constant 0 : i32
    return %c0_i32, %arg1 : i32, i32
  }
  func.func @transform_6(%arg0: i32, %arg1: i32) -> (i32, i32) {
    %c0_i32 = arith.constant 0 : i32
    %c0_i32_0 = arith.constant 0 : i32
    return %c0_i32, %arg1 : i32, i32
  }
  func.func @transform_7(%arg0: i32, %arg1: i32) -> (i32, i32) {
    %c0_i32 = arith.constant 0 : i32
    %c0_i32_0 = arith.constant 0 : i32
    return %arg0, %c0_i32 : i32, i32
  }
  func.func @transform_8(%arg0: i32, %arg1: i32) -> (i32, i32) {
    %c0_i32 = arith.constant 0 : i32
    return %arg0, %arg1 : i32, i32
  }
}

</mosaic_0001>

<bundles_post_ra>
// kernel: tpu_custom_call.1
= control target key start
LH: loop header
LB: loop body
LE: loop exit
PB: predicated region body
PF: predicated region fallthrough
CT: control target
= control target key end

     0   :  { %14 = vsyncpa [#allocation3], 0  ;;  %s4861_s0 = inlined_call_operand.hbm [shape: bf16[2,64], index: 0, kind: input, shape index: {}]   ;;  %s4862_s1 = inlined_call_operand.hbm [shape: bf16[64,1024], index: 1, kind: input, shape index: {}]   ;;  %s4863_s2 = inlined_call_operand.hbm [shape: f32[1,1024], index: 2, kind: input, shape index: {}]   ;;  %s4864_s3 = inlined_call_operand.hbm [shape: f32[1,1024], index: 3, kind: input, shape index: {}]   ;;  %s4865_s4 = inlined_call_operand.hbm [shape: f32[1,1024], index: 4, kind: input, shape index: {}]   ;;  %s4866_s5 = inlined_call_operand.vmem [shape: f32[1,1024], index: 5, kind: input, shape index: {}]   ;;  %s4867_s6 = inlined_call_operand.hbm [shape: f32[1,1024], index: 6, kind: input, shape index: {}]   ;;  %s4868_s7 = inlined_call_operand.vmem [shape: f32[2,1], index: 7, kind: output, shape index: {0}]   ;;  %s4869_s8 = inlined_call_operand.hbm [shape: bf16[2,1024], index: 8, kind: output, shape index: {1}]  }
   0x1   :  { %15 = vsyncpa [#allocation6], 0 }
   0x2   :  { %16 = vsyncpa [#allocation9], 0 }
   0x3   :  { %17 = vsyncpa [#allocation12], 0 }
   0x4   :  { %18 = vsyncpa [#allocation4], 0  ;;  %s2972_s27 = smov [#allocation5]  }
   0x5   :  { %s34_s28 = sshll.u32 %s2972_s27, 4  ;;  %s35_s28 = int_to_ptr.vmem [resolvable:$true] %s34_s28 }
   0x6   :  { %s2830_s29 = scalar_lea.vmem %s35_s28, 4096  ;;  %p2835_p1 = scmp.lt.s32.totalorder %s35_s28, %s35_s28 }
   0x7   :  { %p2831_p0 = scmp.ne.s32.totalorder %s35_s28, %s2830_s29  ;;  %p2836_p2 = scmp.lt.s32.totalorder %s2830_s29, %s2830_s29 }
   0x9   :  { %p2837_p3 = por %p2836_p2, %p2835_p1 }
   0xb   :  { %p2838_p4 = pnand %p2837_p3, %p2831_p0 }
   0xd   :  { %2841 = shalt.err (!%p2838_p4)
}
   0xe   :  { %s2973_s30 = smov 512   ;;  %s2974_s9 = smov 32  }
   0xf   :  { %40 = dma.hbm_to_vmem [thread:$0]  %s4862_s1, 4096, %s35_s28, [#allocation6], %s2973_s30, %s2973_s30, %s2974_s9  }
  0x10   :  { %s2975_s12 = smov [#allocation8]   ;;  %s2976_s14 = smov [#allocation2]  }
  0x11   :  { %s57_s13 = sshll.u32 %s2975_s12, 4  ;;  %s25_s15 = sshll.u32 %s2976_s14, 4  ;;  %s58_s13 = int_to_ptr.vmem [resolvable:$true] %s57_s13  ;;  %s26_s15 = int_to_ptr.vmem [resolvable:$true] %s25_s15 }
  0x12   :  { %s2850_s16 = scalar_lea.vmem %s58_s13, 128  ;;  %p2855_p6 = scmp.lt.s32.totalorder %s58_s13, %s58_s13 }
  0x13   :  { %p2851_p5 = scmp.ne.s32.totalorder %s58_s13, %s2850_s16  ;;  %p2856_p7 = scmp.lt.s32.totalorder %s2850_s16, %s2850_s16 }
  0x15   :  { %p2857_p8 = por %p2856_p7, %p2855_p6 }
  0x17   :  { %p2858_p9 = pnand %p2857_p8, %p2851_p5 }
  0x19   :  { %2861 = shalt.err (!%p2858_p9)
}
  0x1a   :  { %60 = dma.hbm_to_vmem [thread:$0]  %s4864_s3, 128, %s58_s13, [#allocation9]  }
  0x1b   :  { %s2870_s19 = scalar_lea.vmem %s26_s15, 16  ;;  %s2874_s1 = scalar_lea.vmem %s26_s15, 32 }
  0x1c   :  { %p2871_p10 = scmp.ne.s32.totalorder %s26_s15, %s2870_s19  ;;  %p2875_p11 = scmp.lt.s32.totalorder %s26_s15, %s26_s15 }
  0x1d   :  { %p2876_p12 = scmp.lt.s32.totalorder %s2874_s1, %s2870_s19 }
  0x1f   :  { %p2877_p13 = por %p2876_p12, %p2875_p11 }
  0x21   :  { %p2878_p0 = pnand %p2877_p13, %p2871_p10 }
  0x23   :  { %2881 = shalt.err (!%p2878_p0)
}
  0x24   :  { %28 = dma.hbm_to_vmem [thread:$0]  %s4861_s0, 16, %s26_s15, [#allocation3]  }
  0x25   :  { %s2977_s22 = smov [#allocation7]   ;;  %s2978_s24 = smov [#allocation10]  }
  0x26   :  { %s47_s23 = sshll.u32 %s2977_s22, 4  ;;  %s67_s25 = sshll.u32 %s2978_s24, 4  ;;  %s48_s23 = int_to_ptr.vmem [resolvable:$true] %s47_s23  ;;  %s68_s25 = int_to_ptr.vmem [resolvable:$true] %s67_s25 }
  0x27   :  { %s2890_s26 = scalar_lea.vmem %s48_s23, 128  ;;  %p2895_p2 = scmp.lt.s32.totalorder %s48_s23, %s48_s23 }
  0x28   :  { %p2891_p1 = scmp.ne.s32.totalorder %s48_s23, %s2890_s26  ;;  %p2896_p3 = scmp.lt.s32.totalorder %s2890_s26, %s2890_s26 }
  0x2a   :  { %p2897_p4 = por %p2896_p3, %p2895_p2 }
  0x2c   :  { %p2898_p5 = pnand %p2897_p4, %p2891_p1 }
  0x2e   :  { %2901 = shalt.err (!%p2898_p5)
}
  0x2f   :  { %50 = dma.hbm_to_vmem [thread:$0]  %s4863_s2, 128, %s48_s23, [#allocation6]  }
  0x30   :  { %s2910_s28 = scalar_lea.vmem %s68_s25, 128  ;;  %p2915_p7 = scmp.lt.s32.totalorder %s68_s25, %s68_s25 }
  0x31   :  { %p2911_p6 = scmp.ne.s32.totalorder %s68_s25, %s2910_s28  ;;  %p2916_p8 = scmp.lt.s32.totalorder %s2910_s28, %s2910_s28 }
  0x33   :  { %p2917_p9 = por %p2916_p8, %p2915_p7 }
  0x35   :  { %p2918_p10 = pnand %p2917_p9, %p2911_p6 }
  0x37   :  { %2921 = shalt.err (!%p2918_p10)
}
  0x38   :  { %70 = dma.hbm_to_vmem [thread:$0]  %s4865_s4, 128, %s68_s25, [#allocation9]  }
  0x39   :  { %s2979_s30 = smov [#allocation11]  }
  0x3a   :  { %s79_s9 = sshll.u32 %s2979_s30, 4  ;;  %s80_s9 = int_to_ptr.vmem [resolvable:$true] %s79_s9 }
  0x3b   :  { %s2930_s10 = scalar_lea.vmem %s80_s9, 128  ;;  %p2935_p12 = scmp.lt.s32.totalorder %s80_s9, %s80_s9 }
  0x3c   :  { %p2931_p11 = scmp.ne.s32.totalorder %s80_s9, %s2930_s10  ;;  %p2936_p13 = scmp.lt.s32.totalorder %s2930_s10, %s2930_s10 }
  0x3e   :  { %p2937_p0 = por %p2936_p13, %p2935_p12 }
  0x40   :  { %p2938_p1 = pnand %p2937_p0, %p2931_p11 }
  0x42   :  { %2941 = shalt.err (!%p2938_p1)
}
  0x43   :  { %82 = dma.hbm_to_vmem [thread:$0]  %s4867_s6, 128, %s80_s9, [#allocation12]  }
  0x44   :  { %2962 = dma.done.wait [#allocation3], 16  }
  0x45   :  { %2963 = vsyncadd [#allocation3], 4294967280 }
  0x46   :  { %2964 = dma.done.wait [#allocation6], 4224  }
  0x47   :  { %2965 = vsyncadd [#allocation6], 4294963072 }
  0x48   :  { %2966 = dma.done.wait [#allocation9], 256  }
  0x49   :  { %2967 = vsyncadd [#allocation9], 4294967040 }
  0x4a   :  { %2968 = dma.done.wait [#allocation12], 128  }
  0x4b   :  { %2969 = vsyncadd [#allocation12], 4294967168  ;;  %v2980_v0 = vmov 0   ;;  %v133_v1 = vld [vmem:[#allocation5 + $0xc0] sm:$0xff]  ;;  %v134_v3 = vld [vmem:[#allocation5 + $0xc8] sm:$0xff]  ;;  %vm301_vm0 = vcmask 523264  }
  0x4c   :  { %337 = vmatprep.mubr.bf16.mxu0 %v2980_v0  ;;  %378 = vmatprep.mubr.bf16.mxu1 %v2980_v0  ;;  %v137_v2 = vld [vmem:[#allocation5 + $0xe0] sm:$0xff]  ;;  %v138_v5 = vld [vmem:[#allocation5 + $0xe8] sm:$0xff]  ;;  %v135_v31 = vld [vmem:[#allocation5 + $0xd0] sm:$0xff] }
  0x4d   :  { %v2593_v4 = vcombine.high %v133_v1, %v137_v2  ;;  %v2592_v6 = vcombine.low %v133_v1, %v137_v2  ;;  %v125_v7 = vld [vmem:[#allocation5 + $0x80] sm:$0xff]  ;;  %v2595_v9 = vcombine.high %v134_v3, %v138_v5  ;;  %v2594_v10 = vcombine.low %v134_v3, %v138_v5  ;;  %v126_v12 = vld [vmem:[#allocation5 + $0x88] sm:$0xff]  ;;  %v139_v32 = vld [vmem:[#allocation5 + $0xf0] sm:$0xff] }
  0x4e   :  { %v129_v8 = vld [vmem:[#allocation5 + $0xa0] sm:$0xff]  ;;  %v130_v13 = vld [vmem:[#allocation5 + $0xa8] sm:$0xff]  ;;  %v136_v33 = vld [vmem:[#allocation5 + $0xd8] sm:$0xff]  ;;  %v2597_v37 = vcombine.high %v135_v31, %v139_v32  ;;  %v2596_v44 = vcombine.low %v135_v31, %v139_v32 }
  0x4f   :  { %v2585_v11 = vcombine.high %v125_v7, %v129_v8  ;;  %v117_v14 = vld [vmem:[#allocation5 + $0x40] sm:$0xff]  ;;  %313 = vmatprep.subr.bf16.mxu0 %v2593_v4  ;;  %v2587_v15 = vcombine.high %v126_v12, %v130_v13  ;;  %v118_v17 = vld [vmem:[#allocation5 + $0x48] sm:$0xff]  ;;  %354 = vmatprep.subr.bf16.mxu1 %v2595_v9  ;;  %v2584_v19 = vcombine.low %v125_v7, %v129_v8  ;;  %v140_v34 = vld [vmem:[#allocation5 + $0xf8] sm:$0xff] }
  0x50   :  { %v121_v16 = vld [vmem:[#allocation5 + $0x60] sm:$0xff]  ;;  %v122_v18 = vld [vmem:[#allocation5 + $0x68] sm:$0xff]  ;;  %314 = vmatpush1.bf16.msra.mxu0 %v2592_v6  ;;  %355 = vmatpush1.bf16.msra.mxu1 %v2594_v10  ;;  %v2586_v20 = vcombine.low %v126_v12, %v130_v13  ;;  %v2599_v38 = vcombine.high %v136_v33, %v140_v34  ;;  %v127_v39 = vld [vmem:[#allocation5 + $0x90] sm:$0xff]  ;;  %v2598_v45 = vcombine.low %v136_v33, %v140_v34 }
  0x51   :  { %315 = vmatprep.subr.bf16.mxu0 %v2585_v11  ;;  %v2577_v21 = vcombine.high %v117_v14, %v121_v16  ;;  %356 = vmatprep.subr.bf16.mxu1 %v2587_v15  ;;  %v2579_v22 = vcombine.high %v118_v17, %v122_v18  ;;  %v109_v23 = vld [vmem:[#allocation5] sm:$0xff]  ;;  %v110_v25 = vld [vmem:[#allocation5 + $0x8] sm:$0xff]  ;;  %v2576_v27 = vcombine.low %v117_v14, %v121_v16  ;;  %v131_v40 = vld [vmem:[#allocation5 + $0xb0] sm:$0xff] }
  0x52   :  { %v113_v24 = vld [vmem:[#allocation5 + $0x20] sm:$0xff]  ;;  %v114_v26 = vld [vmem:[#allocation5 + $0x28] sm:$0xff]  ;;  %v2578_v28 = vcombine.low %v118_v17, %v122_v18  ;;  %v128_v41 = vld [vmem:[#allocation5 + $0x98] sm:$0xff]  ;;  %v2589_v46 = vcombine.high %v127_v39, %v131_v40  ;;  %v2588_v52 = vcombine.low %v127_v39, %v131_v40 }
  0x53   :  { %v2569_v29 = vcombine.high %v109_v23, %v113_v24  ;;  %v2571_v30 = vcombine.high %v110_v25, %v114_v26  ;;  %v2568_v35 = vcombine.low %v109_v23, %v113_v24  ;;  %v2570_v36 = vcombine.low %v110_v25, %v114_v26  ;;  %v132_v42 = vld [vmem:[#allocation5 + $0xb8] sm:$0xff]  ;;  %v119_v48 = vld [vmem:[#allocation5 + $0x50] sm:$0xff]  ;;  %v3067_v5 = vld [vmem:[#allocation7] sm:$0xff] }
  0x54   :  { %316 = vmatpush1.bf16.msra.mxu0 %v2584_v19  ;;  %357 = vmatpush1.bf16.msra.mxu1 %v2586_v20  ;;  %v108_v43 = vld [vmem:[#allocation2] sm:$0x1]  ;;  %v2591_v47 = vcombine.high %v128_v41, %v132_v42  ;;  %v123_v49 = vld [vmem:[#allocation5 + $0x70] sm:$0xff]  ;;  %v2590_v53 = vcombine.low %v128_v41, %v132_v42 }
  0x55   :  { %317 = vmatprep.subr.bf16.mxu0 %v2577_v21  ;;  %358 = vmatprep.subr.bf16.mxu1 %v2579_v22  ;;  %v120_v50 = vld [vmem:[#allocation5 + $0x58] sm:$0xff]  ;;  %v2581_v54 = vcombine.high %v119_v48, %v123_v49  ;;  %v111_v56 = vld [vmem:[#allocation5 + $0x10] sm:$0xff]  ;;  %v2580_v60 = vcombine.low %v119_v48, %v123_v49 }
  0x56   :  { %v124_v51 = vld [vmem:[#allocation5 + $0x78] sm:$0xff]  ;;  %v115_v57 = vld [vmem:[#allocation5 + $0x30] sm:$0xff] }
  0x57   :  { %v2583_v55 = vcombine.high %v120_v50, %v124_v51  ;;  %v112_v58 = vld [vmem:[#allocation5 + $0x18] sm:$0xff]  ;;  %v2582_v61 = vcombine.low %v120_v50, %v124_v51  ;;  %v2573_v62 = vcombine.high %v111_v56, %v115_v57  ;;  %v2572_v1 = vcombine.low %v111_v56, %v115_v57 }
  0x58   :  { %318 = vmatpush1.bf16.msra.mxu0 %v2576_v27  ;;  %359 = vmatpush1.bf16.msra.mxu1 %v2578_v28  ;;  %v116_v59 = vld [vmem:[#allocation5 + $0x38] sm:$0xff]  ;;  %v4871_v56 = vmov 2475754826  }
  0x59   :  { %319 = vmatprep.subr.bf16.mxu0 %v2569_v29  ;;  %360 = vmatprep.subr.bf16.mxu1 %v2571_v30  ;;  %v2575_v63 = vcombine.high %v112_v58, %v116_v59  ;;  %v2574_v2 = vcombine.low %v112_v58, %v116_v59  ;;  %v4873_v58 = vmov 2131351028  }
  0x5c   :  { %320 = vmatpush1.bf16.msra.mxu0 %v2568_v35  ;;  %361 = vmatpush1.bf16.msra.mxu1 %v2570_v36 }
  0x5d   :  { %395 = vmatprep.subr.bf16.mxu0 %v2597_v37  ;;  %436 = vmatprep.subr.bf16.mxu1 %v2599_v38 }
  0x5f   :  { %2600 = vmatmul.mubr.msk.bf16.vlgmr.msra.gmra.mxu0 %vm301_vm0, %v108_v43  ;;  %2601 = vmatmul.mubr.msk.bf16.vlgmr.msra.gmra.mxu1 %vm301_vm0, %v108_v43 }
  0x60   :  { %396 = vmatpush1.bf16.msra.mxu0 %v2596_v44  ;;  %437 = vmatpush1.bf16.msra.mxu1 %v2598_v45 }
  0x61   :  { %397 = vmatprep.subr.bf16.mxu0 %v2589_v46  ;;  %438 = vmatprep.subr.bf16.mxu1 %v2591_v47 }
  0x62   :  { %419 = vmatprep.mubr.bf16.mxu0 %v2980_v0  ;;  %460 = vmatprep.mubr.bf16.mxu1 %v2980_v0  ;;  %v479_v0 = vlaneseq }
  0x64   :  { %398 = vmatpush1.bf16.msra.mxu0 %v2588_v52  ;;  %439 = vmatpush1.bf16.msra.mxu1 %v2590_v53  ;;  %v3062_v3 = vshrl.u32 %v479_v0, 7  ;;  %v4879_v52 = vmov 683565275  }
  0x65   :  { %399 = vmatprep.subr.bf16.mxu0 %v2581_v54  ;;  %440 = vmatprep.subr.bf16.mxu1 %v2583_v55 }
  0x66   :  { %4912 = vst [vmem:[#allocation19_spill] sm:$0xff] %v3062_v3  ;;  %v3065_v4 = vsub.s32 0, %v3062_v3  ;;  %v3070_v6 = vsub.s32 2, %v3062_v3  ;;  %v3075_v8 = vsub.s32 1, %v3062_v3  ;;  %v3105_v49 = vsub.s32 3, %v3062_v3 }
  0x68   :  { %400 = vmatpush1.bf16.msra.mxu0 %v2580_v60  ;;  %441 = vmatpush1.bf16.msra.mxu1 %v2582_v61  ;;  %4913 = vst [vmem:[#allocation20_spill] sm:$0xff] %v3065_v4  ;;  %4914 = vst [vmem:[#allocation21_spill] sm:$0xff] %v3070_v6  ;;  %v482_v7 = vrot.slane %v3067_v5, %v3065_v4  ;;  %v490_v10 = vrot.slane %v3067_v5, %v3070_v6  ;;  %v4875_v60 = vmov 2102212464  }
  0x69   :  { %401 = vmatprep.subr.bf16.mxu0 %v2573_v62  ;;  %442 = vmatprep.subr.bf16.mxu1 %v2575_v63  ;;  %4915 = vst [vmem:[#allocation22_spill] sm:$0xff] %v3075_v8  ;;  %v486_v17 = vrot.slane %v3067_v5, %v3075_v8  ;;  %4916 = vst [vmem:[#allocation23_spill] sm:$0xff] %v3105_v49  ;;  %v4883_v62 = vmov 920167782  }
  0x6c   :  { %402 = vmatpush1.bf16.msra.mxu0 %v2572_v1  ;;  %443 = vmatpush1.bf16.msra.mxu1 %v2574_v2 }
  0x6f   :  { %2602 = vmatmul.mubr.msk.bf16.vlgmr.msra.gmra.mxu0 %vm301_vm0, %v108_v43  ;;  %2603 = vmatmul.mubr.msk.bf16.vlgmr.msra.gmra.mxu1 %vm301_vm0, %v108_v43 }
 0x11f   :  { %v339_v9 = vpop.f32.mrf.mxu0  ;;  %v380_v12 = vpop.f32.mrf.mxu1 }
 0x120   :  { %v469_v11 = vmul.f32 2.0, %v339_v9  ;;  %v471_v13 = vmul.f32 2.0, %v380_v12 }
 0x121   :  { %v341_v14 = vpop.f32.mrf.mxu0  ;;  %v3083_v18 = vpop.f32.mrf.mxu1 }
 0x122   :  { %v3079_v15 = vadd.f32 %v482_v7, %v469_v11  ;;  %v470_v16 = vmul.f32 2.0, %v341_v14  ;;  %v3085_v19 = vadd.f32 %v490_v10, %v471_v13  ;;  %v4881_v11 = vmov 1326507024  }
 0x123   :  { %v343_v20 = vpop.f32.mrf.mxu0  ;;  %v384_v23 = vpop.f32.mrf.mxu1 }
 0x124   :  { %v527_v21 = vand.u32 2147483647, %v3079_v15  ;;  %v530_v22 = vand.u32 2139095040, %v3079_v15  ;;  %v735_v24 = vand.u32 2147483647, %v3085_v19  ;;  %v738_v25 = vand.u32 2139095040, %v3085_v19 }
 0x125   :  { %v344_v26 = vpop.f32.mrf.mxu0  ;;  %v3091_v28 = vadd.f32 %v486_v17, %v470_v16  ;;  %v385_v29 = vpop.f32.mrf.mxu1 }
 0x126   :  { %v531_v27 = vshrl.u32 %v530_v22, 23  ;;  %v534_v30 = vand.u32 8388607, %v527_v21  ;;  %v739_v31 = vshrl.u32 %v738_v25, 23  ;;  %v742_v32 = vand.u32 8388607, %v735_v24 }
 0x127   :  { %v634_v35 = vand.u32 2139095040, %v3091_v28 }
 0x128   :  { %v2604_v33 = vadd.s32 4294967169, %v531_v27  ;;  %v2612_v34 = vadd.s32 4294967169, %v739_v31  ;;  %v535_v37 = vor.u32 8388608, %v534_v30  ;;  %v743_v38 = vor.u32 8388608, %v742_v32 }
 0x129   :  { %v635_v40 = vshrl.u32 %v634_v35, 23 }
 0x12a   :  { %v537_v36 = vadd.s32 1, %v2604_v33  ;;  %v745_v39 = vadd.s32 1, %v2612_v34  ;;  %v3098_v46 = vshll.u32 %v535_v37, 8  ;;  %v3102_v48 = vshll.u32 %v743_v38, 8 }
 0x12b   :  { %v2608_v42 = vadd.s32 4294967169, %v635_v40 }
 0x12c   :  { %vm538_vm1 = vcmp.gt.s32.totalorder %v537_v36, 0  ;;  %vm746_vm2 = vcmp.gt.s32.totalorder %v745_v39, 0 }
 0x12d   :  { %v539_v41 = vsel %vm538_vm1, %v537_v36, 0  ;;  %v747_v45 = vsel %vm746_vm2, %v745_v39, 0  ;;  %v3110_v55 = vadd.s32 1, %v2608_v42 }
 0x12e   :  { %v540_v43 = vshrl.u32 %v539_v41, 5  ;;  %v541_v44 = vand.u32 31, %v539_v41  ;;  %v3100_v47 = vshrl.u32 %v747_v45, 5  ;;  %v749_v54 = vand.u32 31, %v747_v45 }
 0x12f   :  { %v3107_v50 = vpop.f32.mrf.mxu0  ;;  %v3124_v22 = vpop.f32.mrf.mxu1  ;;  %vm642_vm12 = vcmp.gt.s32.totalorder %v3110_v55, 0 }
 0x130   :  { %v542_v51 = vsub.s32 32, %v541_v44  ;;  %v544_v53 = vshll.u32 %v4879_v52, %v541_v44  ;;  %v547_v57 = vshll.u32 %v4871_v56, %v541_v44  ;;  %v550_v59 = vshll.u32 %v4873_v58, %v541_v44 }
 0x131   :  { %v553_v61 = vshll.u32 %v4875_v60, %v541_v44  ;;  %v556_v63 = vshll.u32 %v4883_v62, %v541_v44  ;;  %v3116_v1 = vpop.f32.mrf.mxu0  ;;  %vm559_vm3 = vcmp.lt.s32.totalorder %v540_v43, 1  ;;  %vm561_vm4 = vcmp.lt.s32.totalorder %v540_v43, 3  ;;  %v3135_v40 = vpop.f32.mrf.mxu1 }
 0x132   :  { %v545_v2 = vshrl.u32 %v4871_v56, %v542_v51  ;;  %v548_v0 = vshrl.u32 %v4873_v58, %v542_v51  ;;  %v551_v7 = vshrl.u32 %v4875_v60, %v542_v51  ;;  %v543_v9 = vshrl.u32 %v4879_v52, %v542_v51 }
 0x133   :  { %v554_v10 = vshrl.u32 %v4883_v62, %v542_v51  ;;  %v557_v12 = vshrl.u32 %v4881_v11, %v542_v51  ;;  %v425_v13 = vpop.f32.mrf.mxu0  ;;  %v750_v20 = vsub.s32 32, %v749_v54  ;;  %vm562_vm5 = vcmp.lt.s32.totalorder %v540_v43, 4 }
 0x134   :  { %v546_v14 = vor.u32 %v545_v2, %v544_v53  ;;  %v549_v16 = vor.u32 %v548_v0, %v547_v57  ;;  %v552_v17 = vor.u32 %v551_v7, %v550_v59  ;;  %v752_v26 = vshll.u32 %v4879_v52, %v749_v54 }
 0x135   :  { %v555_v23 = vor.u32 %v554_v10, %v553_v61  ;;  %v558_v25 = vor.u32 %v557_v12, %v556_v63  ;;  %v426_v27 = vpop.f32.mrf.mxu0  ;;  %v755_v36 = vshll.u32 %v4871_v56, %v749_v54  ;;  %vm560_vm6 = vcmp.lt.s32.totalorder %v540_v43, 2  ;;  %v466_v43 = vpop.f32.mrf.mxu1 }
 0x136   :  { %v563_v29 = vsel %vm559_vm3, %v543_v9, %v546_v14  ;;  %v564_v30 = vsel %vm562_vm5, %v552_v17, 2102212464  ;;  %v567_v31 = vsel %vm559_vm3, %v546_v14, %v549_v16  ;;  %v571_v32 = vsel %vm559_vm3, %v549_v16, %v552_v17 }
 0x137   :  { %v565_v33 = vsel %vm561_vm4, %v549_v16, %v564_v30  ;;  %v568_v34 = vsel %vm562_vm5, %v555_v23, 920167782  ;;  %v572_v35 = vsel %vm562_vm5, %v558_v25, 1326507024  ;;  %v753_v39 = vshrl.u32 %v4871_v56, %v750_v20  ;;  %v467_v13 = vpop.f32.mrf.mxu1 }
 0x138   :  { %v569_v37 = vsel %vm561_vm4, %v552_v17, %v568_v34  ;;  %v573_v38 = vsel %vm561_vm4, %v555_v23, %v572_v35  ;;  %v566_v41 = vsel %vm560_vm6, %v563_v29, %v565_v33  ;;  %v756_v45 = vshrl.u32 %v4873_v58, %v750_v20 }
 0x139   :  { %v570_v42 = vsel %vm560_vm6, %v567_v31, %v569_v37  ;;  %v574_v44 = vsel %vm560_vm6, %v571_v32, %v573_v38  ;;  %v754_v61 = vor.u32 %v753_v39, %v752_v26  ;;  %v758_v2 = vshll.u32 %v4873_v58, %v749_v54 }
 0x13a   :  { %v3139_v51 = vmul.u32.u64.low %v3098_v46, %v574_v44  ;;  %v3140_v53 = vmul.u32.u64.high %v3098_v46, %v574_v44, %v3139_v51  ;;  %v3143_v57 = vmul.u32.u64.low %v3098_v46, %v570_v42  ;;  %v3144_v59 = vmul.u32.u64.high %v3098_v46, %v570_v42, %v3143_v57 }
 0x13b   :  { %v757_v63 = vor.u32 %v756_v45, %v755_v36  ;;  %v759_v0 = vshrl.u32 %v4875_v60, %v750_v20  ;;  %v761_v7 = vshll.u32 %v4875_v60, %v749_v54  ;;  %v762_v9 = vshrl.u32 %v4883_v62, %v750_v20 }
 0x13c   :  { %v764_v10 = vshll.u32 %v4883_v62, %v749_v54  ;;  %v765_v12 = vshrl.u32 %v4881_v11, %v750_v20  ;;  %v582_v14 = vmul.u32 %v3098_v46, %v566_v41  ;;  %v751_v16 = vshrl.u32 %v4879_v52, %v750_v20 }
 0x13d   :  { %v760_v17 = vor.u32 %v759_v0, %v758_v2  ;;  %vm767_vm7 = vcmp.lt.s32.totalorder %v3100_v47, 1  ;;  %vm584_vm8 = vc.u32 %v3140_v53, %v3143_v57  ;;  %v585_v23 = vadd.s32 1, %v3144_v59 }
 0x13e   :  { %v763_v25 = vor.u32 %v762_v9, %v761_v7  ;;  %vm768_vm9 = vcmp.lt.s32.totalorder %v3100_v47, 2  ;;  %v766_v26 = vor.u32 %v765_v12, %v764_v10  ;;  %vm769_vm10 = vcmp.lt.s32.totalorder %v3100_v47, 3 }
 0x13f   :  { %vm770_vm11 = vcmp.lt.s32.totalorder %v3100_v47, 4  ;;  %v775_v54 = vsel %vm767_vm7, %v754_v61, %v757_v63  ;;  %v586_v46 = vsel %vm584_vm8, %v585_v23, %v3144_v59  ;;  %v779_v29 = vsel %vm767_vm7, %v757_v63, %v760_v17 }
 0x140   :  { %v772_v20 = vsel %vm770_vm11, %v760_v17, 2102212464  ;;  %v776_v27 = vsel %vm770_vm11, %v763_v25, 920167782  ;;  %v587_v30 = vadd.s32 %v586_v46, %v582_v14  ;;  %v771_v31 = vsel %vm767_vm7, %v751_v16, %v754_v61 }
 0x141   :  { %v777_v32 = vsel %vm769_vm10, %v760_v17, %v776_v27  ;;  %v780_v33 = vsel %vm770_vm11, %v766_v26, 1326507024  ;;  %v773_v34 = vsel %vm769_vm10, %v757_v63, %v772_v20  ;;  %v643_v45 = vsel %vm642_vm12, %v3110_v55, 0 }
 0x142   :  { %v778_v35 = vsel %vm768_vm9, %v775_v54, %v777_v32  ;;  %v781_v36 = vsel %vm769_vm10, %v763_v25, %v780_v33  ;;  %v588_v37 = vadd.s32 536870912, %v587_v30  ;;  %v494_v51 = vrot.slane %v3067_v5, %v3105_v49 }
 0x143   :  { %v782_v38 = vsel %vm768_vm9, %v779_v29, %v781_v36  ;;  %v3169_v39 = vmul.u32.u64.low %v3102_v48, %v778_v35  ;;  %v3170_v41 = vmul.u32.u64.high %v3102_v48, %v778_v35, %v3169_v39  ;;  %v774_v43 = vsel %vm768_vm9, %v771_v31, %v773_v34 }
 0x144   :  { %v3174_v42 = vmul.u32.u64.low %v3102_v48, %v782_v38  ;;  %v3175_v44 = vmul.u32.u64.high %v3102_v48, %v782_v38, %v3174_v42  ;;  %v3180_v59 = vshrl.u32 %v588_v37, 30  ;;  %v645_v61 = vand.u32 31, %v643_v45 }
 0x145   :  { %v472_v63 = vmul.f32 2.0, %v3083_v18  ;;  %v793_v0 = vadd.s32 1, %v3170_v41  ;;  %v790_v7 = vmul.u32 %v3102_v48, %v774_v43  ;;  %v631_v55 = vand.u32 2147483647, %v3091_v28 }
 0x146   :  { %v590_v2 = vshll.u32 %v3180_v59, 30  ;;  %vm792_vm13 = vc.u32 %v3175_v44, %v3169_v39  ;;  %v646_v9 = vsub.s32 32, %v645_v61  ;;  %v644_v20 = vshrl.u32 %v643_v45, 5 }
 0x147   :  { %v794_v12 = vsel %vm792_vm13, %v793_v0, %v3170_v41  ;;  %v3192_v47 = vadd.f32 %v494_v51, %v472_v63  ;;  %v638_v16 = vand.u32 8388607, %v631_v55  ;;  %v648_v27 = vshll.u32 %v4879_v52, %v645_v61 }
 0x148   :  { %v591_v10 = vsub.s32 %v587_v30, %v590_v2  ;;  %v795_v13 = vadd.s32 %v794_v12, %v790_v7  ;;  %v649_v17 = vshrl.u32 %v4871_v56, %v646_v9  ;;  %v652_v48 = vshrl.u32 %v4873_v58, %v646_v9 }
 0x149   :  { %v655_v25 = vshrl.u32 %v4875_v60, %v646_v9  ;;  %v658_v26 = vshrl.u32 %v4883_v62, %v646_v9  ;;  %v842_v54 = vand.u32 2139095040, %v3192_v47  ;;  %v651_v29 = vshll.u32 %v4871_v56, %v645_v61 }
 0x14a   :  { %v593_v14 = vsub.s32 0, %v591_v10  ;;  %v796_v18 = vadd.s32 536870912, %v795_v13  ;;  %v654_v31 = vshll.u32 %v4873_v58, %v645_v61  ;;  %v657_v32 = vshll.u32 %v4875_v60, %v645_v61 }
 0x14b   :  { %v661_v33 = vshrl.u32 %v4881_v11, %v646_v9  ;;  %v650_v35 = vor.u32 %v649_v17, %v648_v27  ;;  %v653_v36 = vor.u32 %v652_v48, %v651_v29  ;;  %v660_v42 = vshll.u32 %v4883_v62, %v645_v61 }
 0x14c   :  { %v2605_v23 = vmin.u32 %v593_v14, %v591_v10  ;;  %v3201_v46 = vshrl.u32 %v796_v18, 30  ;;  %v656_v38 = vor.u32 %v655_v25, %v654_v31  ;;  %v659_v41 = vor.u32 %v658_v26, %v657_v32 }
 0x14d   :  { %v583_v45 = vadd.s32 %v3143_v57, %v3140_v53  ;;  %v639_v51 = vor.u32 8388608, %v638_v16  ;;  %v647_v43 = vshrl.u32 %v4879_v52, %v646_v9  ;;  %v843_v63 = vshrl.u32 %v842_v54, 23 }
 0x14e   :  { %v595_v30 = vclz %v2605_v23  ;;  %v798_v34 = vshll.u32 %v3201_v46, 30  ;;  %v662_v2 = vor.u32 %v661_v33, %v660_v42  ;;  %vm663_vm15 = vcmp.lt.s32.totalorder %v644_v20, 1 }
 0x14f   :  { %vm665_vm0 = vcmp.lt.s32.totalorder %v644_v20, 3  ;;  %vm666_vm1 = vcmp.lt.s32.totalorder %v644_v20, 4  ;;  %v671_v12 = vsel %vm663_vm15, %v650_v35, %v653_v36  ;;  %vm664_vm2 = vcmp.lt.s32.totalorder %v644_v20, 2 }
 0x150   :  { %v2606_v37 = vadd.s32 4294967294, %v595_v30  ;;  %v3213_v7 = vsub.s32 %v795_v13, %v798_v34  ;;  %v668_v61 = vsel %vm666_vm1, %v656_v38, 2102212464  ;;  %v672_v17 = vsel %vm666_vm1, %v659_v41, 920167782 }
 0x151   :  { %v673_v53 = vsel %vm665_vm0, %v656_v38, %v672_v17  ;;  %v675_v57 = vsel %vm663_vm15, %v653_v36, %v656_v38  ;;  %v676_v25 = vsel %vm666_vm1, %v662_v2, 1326507024  ;;  %v667_v13 = vsel %vm663_vm15, %v647_v43, %v650_v35 }
 0x152   :  { %vm2607_vm14 = vcmp.lt.s32.totalorder %v2606_v37, 0  ;;  %v674_v23 = vsel %vm664_vm2, %v671_v12, %v673_v53  ;;  %v669_v26 = vsel %vm665_vm0, %v653_v36, %v668_v61  ;;  %v679_v54 = vshll.u32 %v639_v51, 8 }
 0x153   :  { %v598_v0 = vsel %vm2607_vm14, 0, %v2606_v37  ;;  %v2616_v27 = vadd.s32 4294967169, %v843_v63  ;;  %v677_v31 = vsel %vm665_vm0, %v659_v41, %v676_v25  ;;  %v613_v35 = vsub.s32 4, %v3180_v59 }
 0x154   :  { %v599_v14 = vsub.s32 32, %v598_v0  ;;  %v603_v18 = vsub.s32 4294967266, %v598_v0  ;;  %v600_v48 = vshll.u32 %v591_v10, %v598_v0  ;;  %v801_v10 = vsub.s32 0, %v3213_v7 }
 0x155   :  { %v678_v32 = vsel %vm664_vm2, %v675_v57, %v677_v31  ;;  %v3224_v33 = vmul.u32.u64.low %v679_v54, %v674_v23  ;;  %v3225_v34 = vmul.u32.u64.high %v679_v54, %v674_v23, %v3224_v33  ;;  %v670_v36 = vsel %vm664_vm2, %v667_v13, %v669_v26 }
 0x156   :  { %v601_v9 = vshrl.u32 %v583_v45, %v599_v14  ;;  %v604_v16 = vadd.s32 127, %v603_v18  ;;  %v3228_v38 = vmul.u32.u64.low %v679_v54, %v678_v32  ;;  %v3229_v42 = vmul.u32.u64.high %v679_v54, %v678_v32, %v3228_v38 }
 0x157   :  { %v849_v45 = vadd.s32 1, %v2616_v27  ;;  %v2613_v63 = vmin.u32 %v801_v10, %v3213_v7  ;;  %vm529_vm3 = vcmp.lt.s32.totalorder %v3079_v15, 0  ;;  %v689_v41 = vadd.s32 1, %v3225_v34 }
 0x158   :  { %v602_v29 = vor.u32 %v601_v9, %v600_v48  ;;  %v605_v30 = vshll.u32 %v604_v16, 23  ;;  %v686_v0 = vmul.u32 %v679_v54, %v670_v36  ;;  %vm688_vm4 = vc.u32 %v3229_v42, %v3224_v33 }
 0x159   :  { %vm850_vm5 = vcmp.gt.s32.totalorder %v849_v45, 0  ;;  %v614_v12 = vsel %vm529_vm3, %v613_v35, %v3180_v59  ;;  %v690_v20 = vsel %vm688_vm4, %v689_v41, %v3225_v34  ;;  %v803_v61 = vclz %v2613_v63 }
 0x15a   :  { %v606_v37 = vor.u32 4788187, %v605_v30  ;;  %v609_v43 = vcvt.s32.f32 %v602_v29  ;;  %v851_v14 = vsel %vm850_vm5, %v849_v45, 0  ;;  %v691_v17 = vadd.s32 %v690_v20, %v686_v0 }
 0x15b   :  { %v853_v48 = vand.u32 31, %v851_v14  ;;  %vm3242_vm6 = vcmp.le.f32.partialorder %v527_v21, 0.7853982  ;;  %v839_v25 = vand.u32 2147483647, %v3192_v47  ;;  %v2614_v13 = vadd.s32 4294967294, %v803_v61 }
 0x15c   :  { %v607_v51 = vand.u32 2147483647, %v606_v37  ;;  %v692_v9 = vadd.s32 536870912, %v691_v17  ;;  %v616_v23 = vsel %vm3242_vm6, 0, %v614_v12  ;;  %v3262_v32 = vsub.s32 4, %v3062_v3 }
 0x15d   :  { %v854_v16 = vsub.s32 32, %v853_v48  ;;  %v856_v21 = vshll.u32 %v4879_v52, %v853_v48  ;;  %v859_v27 = vshll.u32 %v4871_v56, %v853_v48  ;;  %v862_v10 = vshll.u32 %v4873_v58, %v853_v48 }
 0x15e   :  { %v610_v2 = vmul.f32 %v609_v43, %v607_v51  ;;  %v3252_v26 = vshrl.u32 %v692_v9, 30  ;;  %4919 = vst [vmem:[#allocation24_spill] sm:$0xff] %v3262_v32  ;;  %v620_v34 = vadd.s32 3, %v616_v23  ;;  %v846_v37 = vand.u32 8388607, %v839_v25 }
 0x15f   :  { %v857_v54 = vshrl.u32 %v4871_v56, %v854_v16  ;;  %v860_v29 = vshrl.u32 %v4873_v58, %v854_v16  ;;  %v863_v31 = vshrl.u32 %v4875_v60, %v854_v16  ;;  %v865_v38 = vshll.u32 %v4875_v60, %v853_v48 }
 0x160   :  { %v611_v18 = vxor.u32 2147483648, %v610_v2  ;;  %v694_v30 = vshll.u32 %v3252_v26, 30  ;;  %v866_v35 = vshrl.u32 %v4883_v62, %v854_v16  ;;  %vm2615_vm7 = vcmp.lt.s32.totalorder %v2614_v13, 0 }
 0x161   :  { %v852_v45 = vshrl.u32 %v851_v14, 5  ;;  %v868_v51 = vshll.u32 %v4883_v62, %v853_v48  ;;  %v858_v43 = vor.u32 %v857_v54, %v856_v21  ;;  %v861_v63 = vor.u32 %v860_v29, %v859_v27 }
 0x162   :  { %v612_v57 = vsel %vm529_vm3, %v611_v18, %v610_v2  ;;  %v3268_v36 = vsub.s32 %v691_v17, %v694_v30  ;;  %v867_v41 = vor.u32 %v866_v35, %v865_v38  ;;  %v869_v2 = vshrl.u32 %v4881_v11, %v854_v16 }
 0x163   :  { %v615_v59 = vsel %vm3242_vm6, %v3079_v15, %v612_v57  ;;  %v864_v12 = vor.u32 %v863_v31, %v862_v10  ;;  %v3273_v20 = vsel %vm2615_vm7, 0, %v2614_v13  ;;  %v847_v18 = vor.u32 8388608, %v846_v37 }
 0x164   :  { %2755 = vcosq.f32 %v615_v59  ;;  %v697_v0 = vsub.s32 0, %v3268_v36  ;;  %v855_v61 = vshrl.u32 %v4879_v52, %v854_v16  ;;  %v498_v17 = vrot.slane %v3067_v5, %v3262_v32 }
 0x165   :  { %2757 = vsinq.f32 %v615_v59  ;;  %v870_v53 = vor.u32 %v869_v2, %v868_v51  ;;  %vm871_vm8 = vcmp.lt.s32.totalorder %v852_v45, 1  ;;  %vm874_vm9 = vcmp.lt.s32.totalorder %v852_v45, 4 }
 0x166   :  { %v2609_v14 = vmin.u32 %v697_v0, %v3268_v36  ;;  %v621_v48 = vand.u32 3, %v620_v34  ;;  %v879_v57 = vsel %vm871_vm8, %v858_v43, %v861_v63  ;;  %v880_v9 = vsel %vm874_vm9, %v867_v41, 920167782 }
 0x167   :  { %v473_v59 = vmul.f32 2.0, %v3107_v50  ;;  %v811_v23 = vsub.s32 4294967266, %v3273_v20  ;;  %vm873_vm10 = vcmp.lt.s32.totalorder %v852_v45, 3  ;;  %v876_v16 = vsel %vm874_vm9, %v864_v12, 2102212464 }
 0x168   :  { %v699_v13 = vclz %v2609_v14  ;;  %vm872_vm11 = vcmp.lt.s32.totalorder %v852_v45, 2  ;;  %v881_v21 = vsel %vm873_vm10, %v864_v12, %v880_v9  ;;  %v883_v54 = vsel %vm871_vm8, %v861_v63, %v864_v12 }
 0x169   :  { %v887_v27 = vshll.u32 %v847_v18, 8  ;;  %v875_v30 = vsel %vm871_vm8, %v855_v61, %v858_v43  ;;  %v882_v10 = vsel %vm872_vm11, %v879_v57, %v881_v21  ;;  %v884_v31 = vsel %vm874_vm9, %v870_v53, 1326507024 }
 0x16a   :  { %v2610_v29 = vadd.s32 4294967294, %v699_v13  ;;  %v877_v37 = vsel %vm873_vm10, %v861_v63, %v876_v16  ;;  %v885_v38 = vsel %vm873_vm10, %v867_v41, %v884_v31  ;;  %vm626_vm12 = vcmp.eq.s32.totalorder %v621_v48, 2 }
 0x16b   :  { %v3285_v50 = vmul.u32.u64.low %v887_v27, %v882_v10  ;;  %v3286_v35 = vmul.u32.u64.high %v887_v27, %v882_v10, %v3285_v50  ;;  %v886_v0 = vsel %vm872_vm11, %v883_v54, %v885_v38  ;;  %v3290_v12 = vadd.f32 %v498_v17, %v473_v59 }
 0x16c   :  { %vm2611_vm13 = vcmp.lt.s32.totalorder %v2610_v29, 0  ;;  %v3292_v43 = vmul.u32.u64.low %v887_v27, %v886_v0  ;;  %v3293_v61 = vmul.u32.u64.high %v887_v27, %v886_v0, %v3292_v43  ;;  %vm623_vm14 = vcmp.eq.s32.totalorder %v621_v48, 0 }
 0x16d   :  { %v812_v63 = vadd.s32 127, %v811_v23  ;;  %v878_v41 = vsel %vm872_vm11, %v875_v30, %v877_v37  ;;  %vm619_vm15 = vweird.f32 %v3079_v15  ;;  %vm622_vm0 = vcmp.lt.s32.totalorder %v621_v48, 2 }
 0x16e   :  { %v897_v57 = vadd.s32 1, %v3286_v35  ;;  %v807_v17 = vsub.s32 32, %v3273_v20  ;;  %v702_v59 = vsel %vm2611_vm13, 0, %v2610_v29  ;;  %v946_v13 = vand.u32 2139095040, %v3290_v12 }
 0x16f   :  { %v894_v21 = vmul.u32 %v887_v27, %v878_v41  ;;  %vm896_vm1 = vc.u32 %v3293_v61, %v3285_v50  ;;  %v791_v45 = vadd.s32 %v3169_v39, %v3175_v44  ;;  %v813_v15 = vshll.u32 %v812_v63, 23 }
 0x170   :  { %v898_v48 = vsel %vm896_vm1, %v897_v57, %v3286_v35  ;;  %v707_v23 = vsub.s32 4294967266, %v702_v59  ;;  %v947_v30 = vshrl.u32 %v946_v13, 23  ;;  %v703_v0 = vsub.s32 32, %v702_v59 }
 0x171   :  { %v2756_v34 = vpop.eup %2755  ;;  %v899_v54 = vadd.s32 %v898_v48, %v894_v21  ;;  %v809_v10 = vshrl.u32 %v791_v45, %v807_v17  ;;  %v814_v37 = vor.u32 4788187, %v813_v15  ;;  %v4870_v15 = vand.u32 2147483647, %v3290_v12 }
 0x172   :  { %v2758_v51 = vpop.eup %2757  ;;  %v627_v2 = vxor.u32 2147483648, %v2756_v34  ;;  %v2620_v29 = vadd.s32 4294967169, %v947_v30  ;;  %v708_v27 = vadd.s32 127, %v707_v23  ;;  %vm737_vm3 = vcmp.lt.s32.totalorder %v3085_v19, 0 }
 0x173   :  { %v624_v18 = vxor.u32 2147483648, %v2758_v51  ;;  %v900_v31 = vadd.s32 536870912, %v899_v54  ;;  %v815_v44 = vand.u32 2147483647, %v814_v37  ;;  %v3323_v48 = vsub.s32 6, %v3062_v3 }
 0x174   :  { %v628_v14 = vsel %vm626_vm12, %v627_v2, %v2758_v51  ;;  %v953_v51 = vadd.s32 1, %v2620_v29  ;;  %v709_v43 = vshll.u32 %v708_v27, 23  ;;  %v950_v37 = vand.u32 8388607, %v4870_v15 }
 0x175   :  { %v625_v53 = vsel %vm623_vm14, %v2756_v34, %v624_v18  ;;  %v808_v34 = vshll.u32 %v3213_v7, %v3273_v20  ;;  %v3309_v38 = vshrl.u32 %v900_v31, 30  ;;  %v687_v18 = vadd.s32 %v3224_v33, %v3229_v42  ;;  %4920 = vst [vmem:[#allocation25_spill] sm:$0xff] %v3323_v48 }
 0x176   :  { %v629_v9 = vsel %vm622_vm0, %v625_v53, %v628_v14  ;;  %vm954_vm2 = vcmp.gt.s32.totalorder %v953_v51, 0  ;;  %v704_v53 = vshll.u32 %v3268_v36, %v702_v59  ;;  %v710_v57 = vor.u32 4788187, %v709_v43 }
 0x177   :  { %v3300_v16 = vsel %vm619_vm15, nan, %v629_v9  ;;  %v810_v2 = vor.u32 %v809_v10, %v808_v34  ;;  %v902_v39 = vshll.u32 %v3309_v38, 30  ;;  %v955_v35 = vsel %vm954_vm2, %v953_v51, 0 }
 0x178   :  { %v957_v63 = vand.u32 31, %v955_v35  ;;  %v705_v41 = vshrl.u32 %v687_v18, %v703_v0  ;;  %v711_v45 = vand.u32 2147483647, %v710_v57  ;;  %v956_v27 = vshrl.u32 %v955_v35, 5 }
 0x179   :  { %v817_v14 = vcvt.s32.f32 %v810_v2  ;;  %v3314_v7 = vsub.s32 %v899_v54, %v902_v39  ;;  %vm3339_vm4 = vcmp.le.f32.partialorder %v735_v24, 0.7853982  ;;  %vm633_vm5 = vcmp.lt.s32.totalorder %v3091_v28, 0 }
 0x17a   :  { %v958_v9 = vsub.s32 32, %v957_v63  ;;  %v706_v17 = vor.u32 %v705_v41, %v704_v53  ;;  %v960_v59 = vshll.u32 %v4879_v52, %v957_v63  ;;  %v963_v10 = vshll.u32 %v4871_v56, %v957_v63 }
 0x17b   :  { %v818_v20 = vmul.f32 %v817_v14, %v815_v44  ;;  %v905_v13 = vsub.s32 0, %v3314_v7  ;;  %v969_v29 = vshll.u32 %v4875_v60, %v957_v63  ;;  %v966_v0 = vshll.u32 %v4873_v58, %v957_v63 }
 0x17c   :  { %v961_v33 = vshrl.u32 %v4871_v56, %v958_v9  ;;  %v964_v42 = vshrl.u32 %v4873_v58, %v958_v9  ;;  %v713_v23 = vcvt.s32.f32 %v706_v17  ;;  %v970_v54 = vshrl.u32 %v4883_v62, %v958_v9 }
 0x17d   :  { %v819_v21 = vxor.u32 2147483648, %v818_v20  ;;  %v2617_v36 = vmin.u32 %v905_v13, %v3314_v7  ;;  %v967_v31 = vshrl.u32 %v4875_v60, %v958_v9  ;;  %v973_v44 = vshrl.u32 %v4881_v11, %v958_v9 }
 0x17e   :  { %v714_v34 = vmul.f32 %v713_v23, %v711_v45  ;;  %v962_v51 = vor.u32 %v961_v33, %v960_v59  ;;  %v965_v2 = vor.u32 %v964_v42, %v963_v10  ;;  %v971_v39 = vor.u32 %v970_v54, %v969_v29 }
 0x17f   :  { %v820_v30 = vsel %vm737_vm3, %v819_v21, %v818_v20  ;;  %v907_v43 = vclz %v2617_v36  ;;  %v506_v14 = vrot.slane %v3067_v5, %v3323_v48  ;;  %v968_v41 = vor.u32 %v967_v31, %v966_v0 }
 0x180   :  { %v823_v35 = vsel %vm3339_vm4, %v3085_v19, %v820_v30  ;;  %v972_v20 = vshll.u32 %v4883_v62, %v957_v63  ;;  %v951_v53 = vor.u32 8388608, %v950_v37  ;;  %vm975_vm6 = vcmp.lt.s32.totalorder %v956_v27, 1 }
 0x181   :  { %vm978_vm7 = vcmp.lt.s32.totalorder %v956_v27, 4  ;;  %v475_v24 = vmul.f32 2.0, %v3124_v22  ;;  %v715_v57 = vxor.u32 2147483648, %v714_v34  ;;  %v983_v13 = vsel %vm975_vm6, %v962_v51, %v965_v2 }
 0x182   :  { %v974_v17 = vor.u32 %v973_v44, %v972_v20  ;;  %v984_v21 = vsel %vm978_vm7, %v971_v39, 920167782  ;;  %v821_v45 = vsub.s32 4, %v3201_v46  ;;  %vm3356_vm8 = vcmp.le.f32.partialorder %v631_v55, 0.7853982 }
 0x183   :  { %v2618_v63 = vadd.s32 4294967294, %v907_v43  ;;  %vm977_vm9 = vcmp.lt.s32.totalorder %v956_v27, 3  ;;  %v717_v42 = vsub.s32 4, %v3252_v26  ;;  %vm976_vm10 = vcmp.lt.s32.totalorder %v956_v27, 2 }
 0x184   :  { %v980_v22 = vsel %vm978_vm7, %v968_v41, 2102212464  ;;  %v985_v23 = vsel %vm977_vm9, %v968_v41, %v984_v21  ;;  %2759 = vcosq.f32 %v823_v35  ;;  %v959_v36 = vshrl.u32 %v4879_v52, %v958_v9  ;;  %v3374_v9 = vld [vmem:[#allocation8] sm:$0xff] }
 0x185   :  { %v986_v59 = vsel %vm976_vm10, %v983_v13, %v985_v23  ;;  %v991_v54 = vshll.u32 %v951_v53, 8  ;;  %v716_v55 = vsel %vm633_vm5, %v715_v57, %v714_v34  ;;  %v987_v30 = vsel %vm975_vm6, %v965_v2, %v968_v41 }
 0x186   :  { %v988_v10 = vsel %vm978_vm7, %v974_v17, 1326507024  ;;  %v3369_v31 = vadd.f32 %v506_v14, %v475_v24  ;;  %vm2619_vm11 = vcmp.lt.s32.totalorder %v2618_v63, 0  ;;  %v979_v29 = vsel %vm975_vm6, %v959_v36, %v962_v51 }
 0x187   :  { %v981_v37 = vsel %vm977_vm9, %v965_v2, %v980_v22  ;;  %v989_v0 = vsel %vm977_vm9, %v971_v39, %v988_v10  ;;  %2761 = vsinq.f32 %v823_v35  ;;  %v822_v14 = vsel %vm737_vm3, %v821_v45, %v3201_v46 }
 0x188   :  { %v990_v44 = vsel %vm976_vm10, %v987_v30, %v989_v0  ;;  %v3377_v43 = vmul.u32.u64.low %v991_v54, %v986_v59  ;;  %v3378_v34 = vmul.u32.u64.high %v991_v54, %v986_v59, %v3377_v43  ;;  %v719_v51 = vsel %vm3356_vm8, %v3091_v28, %v716_v55  ;;  %v3411_v30 = vld [vmem:[#allocation10] sm:$0xff] }
 0x189   :  { %v3387_v2 = vmul.u32.u64.low %v991_v54, %v990_v44  ;;  %v3388_v41 = vmul.u32.u64.high %v991_v54, %v990_v44, %v3387_v2  ;;  %v718_v39 = vsel %vm633_vm5, %v717_v42, %v3252_v26  ;;  %v910_v35 = vsel %vm2619_vm11, 0, %v2618_v63 }
 0x18a   :  { %v982_v20 = vsel %vm976_vm10, %v979_v29, %v981_v37  ;;  %v1154_v53 = vand.u32 2139095040, %v3369_v31  ;;  %v1364_v24 = vrot.slane %v3374_v9, %v3065_v4  ;;  %v824_v46 = vsel %vm3339_vm4, 0, %v822_v14 }
 0x18b   :  { %2763 = vcosq.f32 %v719_v51  ;;  %v1001_v57 = vadd.s32 1, %v3378_v34  ;;  %v720_v13 = vsel %vm3356_vm8, 0, %v718_v39  ;;  %v915_v21 = vsub.s32 4294967266, %v910_v35 }
 0x18c   :  { %v1155_v17 = vshrl.u32 %v1154_v53, 23  ;;  %v998_v26 = vmul.u32 %v991_v54, %v982_v20  ;;  %vm1000_vm12 = vc.u32 %v3388_v41, %v3377_v43  ;;  %v828_v63 = vadd.s32 3, %v824_v46 }
 0x18d   :  { %v1002_v27 = vsel %vm1000_vm12, %v1001_v57, %v3378_v34  ;;  %v3406_v18 = vsub.s32 5, %v3062_v3  ;;  %v1401_v22 = vsub.f32 %v3300_v16, %v1364_v24  ;;  %2765 = vsinq.f32 %v719_v51 }
 0x18e   :  { %v2628_v45 = vadd.s32 4294967169, %v1155_v17  ;;  %v1003_v42 = vadd.s32 %v1002_v27, %v998_v26  ;;  %v724_v23 = vadd.s32 3, %v720_v13  ;;  %v916_v33 = vadd.s32 127, %v915_v21 }
 0x18f   :  { %4925 = vst [vmem:[#allocation26_spill] sm:$0xff] %v3406_v18  ;;  %v911_v54 = vsub.s32 32, %v910_v35  ;;  %v3413_v10 = vand.u32 3, %v828_v63  ;;  %v502_v0 = vrot.slane %v3067_v5, %v3406_v18  ;;  %v1409_v16 = vmul.f32 0.5, %v1401_v22 }
 0x190   :  { %v1161_v36 = vadd.s32 1, %v2628_v45  ;;  %v1004_v59 = vadd.s32 536870912, %v1003_v42  ;;  %v3419_v44 = vand.u32 3, %v724_v23  ;;  %v895_v34 = vadd.s32 %v3285_v50, %v3293_v61 }
 0x191   :  { %v3409_v55 = vpop.eup %2759  ;;  %v917_v39 = vshll.u32 %v916_v33, 23  ;;  %v474_v53 = vmul.f32 2.0, %v3116_v1  ;;  %v1430_v24 = vrot.slane %v3411_v30, %v3065_v4  ;;  %vm831_vm14 = vcmp.eq.s32.totalorder %v3413_v10, 0 }
 0x192   :  { %vm1162_vm13 = vcmp.gt.s32.totalorder %v1161_v36, 0  ;;  %v3415_v29 = vshrl.u32 %v1004_v59, 30  ;;  %v835_v2 = vxor.u32 2147483648, %v3409_v55  ;;  %v913_v46 = vshrl.u32 %v895_v34, %v911_v54 }
 0x193   :  { %v1163_v37 = vsel %vm1162_vm13, %v1161_v36, 0  ;;  %v1417_v17 = vmul.f32 2.0, %v1409_v16  ;;  %vm834_vm15 = vcmp.eq.s32.totalorder %v3413_v10, 2  ;;  %v912_v1 = vshll.u32 %v3314_v7, %v910_v35 }
 0x194   :  { %v1165_v14 = vand.u32 31, %v1163_v37  ;;  %v2762_v51 = vpop.eup %2761  ;;  %v1006_v20 = vshll.u32 %v3415_v29, 30  ;;  %vm730_vm0 = vcmp.eq.s32.totalorder %v3419_v44, 2  ;;  %v918_v27 = vor.u32 4788187, %v917_v39 }
 0x195   :  { %v832_v13 = vxor.u32 2147483648, %v2762_v51  ;;  %v3437_v26 = vsel %vm834_vm15, %v835_v2, %v2762_v51  ;;  %v3441_v63 = vadd.f32 %v502_v0, %v474_v53  ;;  %v914_v22 = vor.u32 %v913_v46, %v912_v1 }
 0x196   :  { %v3433_v61 = vsub.s32 %v1003_v42, %v1006_v20  ;;  %v1166_v57 = vsub.s32 32, %v1165_v14  ;;  %v4878_v42 = vand.u32 2147483647, %v3369_v31  ;;  %v1168_v23 = vshll.u32 %v4879_v52, %v1165_v14 }
 0x197   :  { %v1177_v36 = vshll.u32 %v4875_v60, %v1165_v14  ;;  %v1171_v35 = vshll.u32 %v4871_v56, %v1165_v14  ;;  %vm727_vm1 = vcmp.eq.s32.totalorder %v3419_v44, 0  ;;  %v1174_v0 = vshll.u32 %v4873_v58, %v1165_v14 }
 0x198   :  { %v2764_v21 = vpop.eup %2763  ;;  %v1009_v45 = vsub.s32 0, %v3433_v61  ;;  %v1169_v7 = vshrl.u32 %v4871_v56, %v1166_v57  ;;  %v1172_v59 = vshrl.u32 %v4873_v58, %v1166_v57  ;;  %v1175_v16 = vshrl.u32 %v4875_v60, %v1166_v57 }
 0x199   :  { %v731_v54 = vxor.u32 2147483648, %v2764_v21  ;;  %v1178_v34 = vshrl.u32 %v4883_v62, %v1166_v57  ;;  %v919_v2 = vand.u32 2147483647, %v918_v27  ;;  %v1164_v20 = vshrl.u32 %v1163_v37, 5 }
 0x19a   :  { %v2621_v33 = vmin.u32 %v1009_v45, %v3433_v61  ;;  %v2766_v51 = vpop.eup %2765  ;;  %v1050_v53 = vand.u32 2139095040, %v3441_v63  ;;  %v921_v46 = vcvt.s32.f32 %v914_v22  ;;  %v1158_v1 = vand.u32 8388607, %v4878_v42 }
 0x19b   :  { %v1179_v45 = vor.u32 %v1178_v34, %v1177_v36  ;;  %v1180_v15 = vshll.u32 %v4883_v62, %v1165_v14  ;;  %v1170_v50 = vor.u32 %v1169_v7, %v1168_v23  ;;  %v1173_v58 = vor.u32 %v1172_v59, %v1171_v35 }
 0x19c   :  { %v1011_v39 = vclz %v2621_v33  ;;  %v1181_v60 = vshrl.u32 %v4881_v11, %v1166_v57  ;;  %v3459_v5 = vadd.f32 %v1430_v24, %v1417_v17  ;;  %vm830_vm2 = vcmp.lt.s32.totalorder %v3413_v10, 2  ;;  %v2819_v10 = vld [vmem:[#allocation7] sm:$0xff] }
 0x19d   :  { %v833_v37 = vsel %vm831_vm14, %v3409_v55, %v832_v13  ;;  %v728_v27 = vxor.u32 2147483648, %v2766_v51  ;;  %v1176_v22 = vor.u32 %v1175_v16, %v1174_v0  ;;  %vm841_vm3 = vcmp.lt.s32.totalorder %v3192_v47, 0 }
 0x19e   :  { %v2622_v56 = vadd.s32 4294967294, %v1011_v39  ;;  %v922_v36 = vmul.f32 %v921_v46, %v919_v2  ;;  %v1182_v33 = vor.u32 %v1181_v60, %v1180_v15  ;;  %vm1186_vm4 = vcmp.lt.s32.totalorder %v1164_v20, 4 }
 0x19f   :  { %v1051_v14 = vshrl.u32 %v1050_v53, 23  ;;  %v732_v23 = vsel %vm730_vm0, %v731_v54, %v2766_v51  ;;  %v1159_v7 = vor.u32 8388608, %v1158_v1  ;;  %vm1183_vm5 = vcmp.lt.s32.totalorder %v1164_v20, 1 }
 0x1a0   :  { %v1192_v24 = vsel %vm1186_vm4, %v1179_v45, 920167782  ;;  %vm2623_vm6 = vcmp.lt.s32.totalorder %v2622_v56, 0  ;;  %v1167_v17 = vshrl.u32 %v4879_v52, %v1166_v57  ;;  %vm1185_vm7 = vcmp.lt.s32.totalorder %v1164_v20, 3 }
 0x1a1   :  { %v1191_v55 = vsel %vm1183_vm5, %v1170_v50, %v1173_v58  ;;  %vm827_vm8 = vweird.f32 %v3085_v19  ;;  %v1188_v13 = vsel %vm1186_vm4, %v1176_v22, 2102212464  ;;  %v1193_v35 = vsel %vm1185_vm7, %v1176_v22, %v1192_v24 }
 0x1a2   :  { %v1195_v60 = vsel %vm1183_vm5, %v1173_v58, %v1176_v22  ;;  %v1196_v15 = vsel %vm1186_vm4, %v1182_v33, 1326507024  ;;  %vm723_vm9 = vweird.f32 %v3091_v28  ;;  %v729_v59 = vsel %vm727_vm1, %v2764_v21, %v728_v27 }
 0x1a3   :  { %vm3478_vm10 = vcmp.le.f32.partialorder %v839_v25, 0.7853982  ;;  %v923_v54 = vxor.u32 2147483648, %v922_v36  ;;  %vm1184_vm11 = vcmp.lt.s32.totalorder %v1164_v20, 2  ;;  %v2624_v0 = vadd.s32 4294967169, %v1051_v14 }
 0x1a4   :  { %v1194_v16 = vsel %vm1184_vm11, %v1191_v55, %v1193_v35  ;;  %v1197_v34 = vsel %vm1185_vm7, %v1179_v45, %v1196_v15  ;;  %v1199_v51 = vshll.u32 %v1159_v7, 8  ;;  %v3485_v2 = vsub.s32 7, %v3062_v3 }
 0x1a5   :  { %v3488_v39 = vsel %vm2623_vm6, 0, %v2622_v56  ;;  %v1187_v21 = vsel %vm1183_vm5, %v1167_v17, %v1170_v50  ;;  %v1189_v25 = vsel %vm1185_vm7, %v1173_v58, %v1188_v13  ;;  %v1198_v53 = vsel %vm1184_vm11, %v1195_v60, %v1197_v34 }
 0x1a6   :  { %4928 = vst [vmem:[#allocation27_spill] sm:$0xff] %v3485_v2  ;;  %v3493_v46 = vmul.u32.u64.low %v1199_v51, %v1198_v53  ;;  %v3494_v1 = vmul.u32.u64.high %v1199_v51, %v1198_v53, %v3493_v46  ;;  %v3496_v27 = vmul.u32.u64.low %v1199_v51, %v1194_v16  ;;  %v3497_v22 = vmul.u32.u64.high %v1199_v51, %v1194_v16, %v3496_v27 }
 0x1a7   :  { %v837_v45 = vsel %vm830_vm2, %v833_v37, %v3437_v26  ;;  %vm726_vm12 = vcmp.lt.s32.totalorder %v3419_v44, 2  ;;  %v925_v56 = vsub.s32 4, %v3309_v38  ;;  %v1057_v50 = vadd.s32 1, %v2624_v0 }
 0x1a8   :  { %v733_v33 = vsel %vm726_vm12, %v729_v59, %v732_v23  ;;  %v924_v58 = vsel %vm841_vm3, %v923_v54, %v922_v36  ;;  %v1190_v14 = vsel %vm1184_vm11, %v1187_v21, %v1189_v25  ;;  %v4877_v7 = vand.u32 2147483647, %v3441_v63 }
 0x1a9   :  { %v1019_v24 = vsub.s32 4294967266, %v3488_v39  ;;  %vm1058_vm13 = vcmp.gt.s32.totalorder %v1057_v50, 0  ;;  %v476_v17 = vmul.f32 2.0, %v3135_v40  ;;  %v510_v26 = vrot.slane %v2819_v10, %v3485_v2 }
 0x1aa   :  { %v1478_v44 = vand.u32 2139095040, %v3459_v5  ;;  %vm1208_vm14 = vc.u32 %v3494_v1, %v3496_v27  ;;  %v1209_v37 = vadd.s32 1, %v3497_v22  ;;  %v1059_v36 = vsel %vm1058_vm13, %v1057_v50, 0 }
 0x1ab   :  { %v838_v20 = vsel %vm827_vm8, nan, %v837_v45  ;;  %v3521_v23 = vsel %vm841_vm3, %v925_v56, %v3309_v38  ;;  %v1206_v40 = vmul.u32 %v1199_v51, %v1190_v14  ;;  %v1061_v55 = vand.u32 31, %v1059_v36 }
 0x1ac   :  { %v734_v13 = vsel %vm723_vm9, nan, %v733_v33  ;;  %v927_v35 = vsel %vm3478_vm10, %v3192_v47, %v924_v58  ;;  %v1210_v60 = vsel %vm1208_vm14, %v1209_v37, %v3497_v22  ;;  %v1054_v19 = vand.u32 8388607, %v4877_v7 }
 0x1ad   :  { %v1020_v15 = vadd.s32 127, %v1019_v24  ;;  %v1211_v59 = vadd.s32 %v1210_v60, %v1206_v40  ;;  %v1062_v54 = vsub.s32 32, %v1061_v55  ;;  %v3531_v0 = vadd.f32 %v510_v26, %v476_v17 }
 0x1ae   :  { %v3533_v38 = vshrl.u32 %v1478_v44, 23  ;;  %v4929_v28 = vrot.slane %v3374_v9, %v3070_v6  ;;  %v928_v34 = vsel %vm3478_vm10, 0, %v3521_v23  ;;  %v4930_v51 = vrot.slane %v3374_v9, %v3075_v8 }
 0x1af   :  { %2767 = vcosq.f32 %v927_v35  ;;  %v999_v25 = vadd.s32 %v3377_v43, %v3388_v41  ;;  %v1212_v53 = vadd.s32 536870912, %v1211_v59  ;;  %v1015_v46 = vsub.s32 32, %v3488_v39 }
 0x1b0   :  { %v1403_v16 = vsub.f32 %v838_v20, %v4929_v28  ;;  %v1402_v21 = vsub.f32 %v734_v13, %v4930_v51  ;;  %2769 = vsinq.f32 %v927_v35  ;;  %v4931_v22 = vmov 2475754826  }
 0x1b1   :  { %v1065_v45 = vshrl.u32 %v4931_v22, %v1062_v54  ;;  %v4932_v56 = vmov 2131351028   ;;  %v1021_v33 = vshll.u32 %v1020_v15, 23  ;;  %v3549_v58 = vshrl.u32 %v1212_v53, 30 }
 0x1b2   :  { %v1068_v50 = vshrl.u32 %v4932_v56, %v1062_v54  ;;  %v1055_v57 = vor.u32 8388608, %v1054_v19  ;;  %v1258_v14 = vand.u32 2139095040, %v3531_v0  ;;  %v1060_v24 = vshrl.u32 %v1059_v36, 5 }
 0x1b3   :  { %v1064_v17 = vshll.u32 %v4879_v52, %v1061_v55  ;;  %v1067_v10 = vshll.u32 %v4931_v22, %v1061_v55  ;;  %v4933_v43 = vmov 2102212464   ;;  %v1214_v26 = vshll.u32 %v3549_v58, 30 }
 0x1b4   :  { %v1071_v41 = vshrl.u32 %v4933_v43, %v1062_v54  ;;  %v1070_v44 = vshll.u32 %v4932_v56, %v1061_v55  ;;  %v1073_v37 = vshll.u32 %v4933_v43, %v1061_v55  ;;  %v1074_v20 = vshrl.u32 %v4883_v62, %v1062_v54 }
 0x1b5   :  { %v1066_v23 = vor.u32 %v1065_v45, %v1064_v17  ;;  %v1069_v40 = vor.u32 %v1068_v50, %v1067_v10  ;;  %v1076_v13 = vshll.u32 %v4883_v62, %v1061_v55  ;;  %v1077_v36 = vshrl.u32 %v4881_v11, %v1062_v54 }
 0x1b6   :  { %v1016_v35 = vshll.u32 %v3433_v61, %v3488_v39  ;;  %v3563_v60 = vsub.s32 %v1211_v59, %v1214_v26  ;;  %v1072_v19 = vor.u32 %v1071_v41, %v1070_v44  ;;  %v1075_v15 = vor.u32 %v1074_v20, %v1073_v37 }
 0x1b7   :  { %v1017_v28 = vshrl.u32 %v999_v25, %v1015_v46  ;;  %v1022_v51 = vor.u32 4788187, %v1021_v33  ;;  %v1078_v53 = vor.u32 %v1077_v36, %v1076_v13  ;;  %v1259_v7 = vshrl.u32 %v1258_v14, 23 }
 0x1b8   :  { %v1217_v42 = vsub.s32 0, %v3563_v60  ;;  %vm1079_vm15 = vcmp.lt.s32.totalorder %v1060_v24, 1  ;;  %vm1082_vm0 = vcmp.lt.s32.totalorder %v1060_v24, 4  ;;  %v1095_v45 = vshll.u32 %v1055_v57, 8 }
 0x1b9   :  { %v1063_v55 = vshrl.u32 %v4879_v52, %v1062_v54  ;;  %vm1081_vm1 = vcmp.lt.s32.totalorder %v1060_v24, 3  ;;  %v1087_v50 = vsel %vm1079_vm15, %v1066_v23, %v1069_v40  ;;  %v1088_v17 = vsel %vm1082_vm0, %v1075_v15, 920167782 }
 0x1ba   :  { %v2629_v61 = vmin.u32 %v1217_v42, %v3563_v60  ;;  %vm1080_vm2 = vcmp.lt.s32.totalorder %v1060_v24, 2  ;;  %v1084_v39 = vsel %vm1082_vm0, %v1072_v19, 2102212464  ;;  %v1089_v59 = vsel %vm1081_vm1, %v1072_v19, %v1088_v17 }
 0x1bb   :  { %v1090_v25 = vsel %vm1080_vm2, %v1087_v50, %v1089_v59  ;;  %v1091_v46 = vsel %vm1079_vm15, %v1069_v40, %v1072_v19  ;;  %v1092_v33 = vsel %vm1082_vm0, %v1078_v53, 1326507024  ;;  %v2632_v14 = vadd.s32 4294967169, %v1259_v7 }
 0x1bc   :  { %v1411_v10 = vmul.f32 0.5, %v1403_v16  ;;  %v1018_v57 = vor.u32 %v1017_v28, %v1016_v35  ;;  %v1219_v41 = vclz %v2629_v61  ;;  %v1083_v54 = vsel %vm1079_vm15, %v1063_v55, %v1066_v23  ;;  %v3573_v26 = vpop.eup %2767 }
 0x1bd   :  { %v1085_v44 = vsel %vm1081_vm1, %v1069_v40, %v1084_v39  ;;  %v1093_v42 = vsel %vm1081_vm1, %v1075_v15, %v1092_v33  ;;  %v3577_v37 = vmul.u32.u64.low %v1095_v45, %v1090_v25  ;;  %v3578_v20 = vmul.u32.u64.high %v1095_v45, %v1090_v25, %v3577_v37  ;;  %v3581_v13 = vpop.eup %2769 }
 0x1be   :  { %v1023_v36 = vand.u32 2147483647, %v1022_v51  ;;  %v2630_v19 = vadd.s32 4294967294, %v1219_v41  ;;  %v1094_v7 = vsel %vm1080_vm2, %v1091_v46, %v1093_v42  ;;  %v1265_v16 = vadd.s32 1, %v2632_v14 }
 0x1bf   :  { %v1410_v35 = vmul.f32 0.5, %v1402_v21  ;;  %v932_v28 = vadd.s32 3, %v928_v34  ;;  %v3584_v23 = vmul.u32.u64.low %v1095_v45, %v1094_v7  ;;  %v3585_v53 = vmul.u32.u64.high %v1095_v45, %v1094_v7, %v3584_v23 }
 0x1c0   :  { %v1025_v55 = vcvt.s32.f32 %v1018_v57  ;;  %vm2631_vm3 = vcmp.lt.s32.totalorder %v2630_v19, 0  ;;  %v1086_v40 = vsel %vm1080_vm2, %v1083_v54, %v1085_v44  ;;  %vm1266_vm4 = vcmp.gt.s32.totalorder %v1265_v16, 0 }
 0x1c1   :  { %v1105_v15 = vadd.s32 1, %v3578_v20  ;;  %v2636_v50 = vadd.s32 4294967169, %v3533_v38  ;;  %v1438_v51 = vrot.slane %v3411_v30, %v3070_v6  ;;  %v1267_v61 = vsel %vm1266_vm4, %v1265_v16, 0 }
 0x1c2   :  { %v1026_v17 = vmul.f32 %v1025_v55, %v1023_v36  ;;  %v1419_v39 = vmul.f32 2.0, %v1411_v10  ;;  %v3592_v21 = vsel %vm2631_vm3, 0, %v2630_v19  ;;  %v1102_v34 = vmul.u32 %v1095_v45, %v1086_v40 }
 0x1c3   :  { %vm1104_vm5 = vc.u32 %v3585_v53, %v3577_v37  ;;  %v1418_v59 = vmul.f32 2.0, %v1410_v35  ;;  %v1434_v24 = vrot.slane %v3411_v30, %v3075_v8  ;;  %v933_v25 = vand.u32 3, %v932_v28 }
 0x1c4   :  { %v1106_v46 = vsel %vm1104_vm5, %v1105_v15, %v3578_v20  ;;  %v1269_v33 = vand.u32 31, %v1267_v61  ;;  %v4934_v10 = vand.u32 2147483647, %v3290_v12  ;;  %v1027_v45 = vxor.u32 2147483648, %v1026_v17 }
 0x1c5   :  { %v1107_v38 = vadd.s32 %v1106_v46, %v1102_v34  ;;  %v1227_v41 = vsub.s32 4294967266, %v3592_v21  ;;  %v3608_v54 = vadd.s32 1, %v2636_v50  ;;  %v3610_v44 = vadd.f32 %v1438_v51, %v1419_v39 }
 0x1c6   :  { %vm3603_vm6 = vcmp.le.f32.partialorder %v4934_v10, 0.7853982  ;;  %vm945_vm7 = vcmp.lt.s32.totalorder %v3290_v12, 0  ;;  %v3613_v20 = vadd.f32 %v1434_v24, %v1418_v59  ;;  %vm935_vm8 = vcmp.eq.s32.totalorder %v933_v25, 0 }
 0x1c7   :  { %v1108_v42 = vadd.s32 536870912, %v1107_v38  ;;  %vm938_vm9 = vcmp.eq.s32.totalorder %v933_v25, 2  ;;  %v1270_v36 = vsub.s32 32, %v1269_v33  ;;  %vm934_vm10 = vcmp.lt.s32.totalorder %v933_v25, 2 }
 0x1c8   :  { %v936_v19 = vxor.u32 2147483648, %v3581_v13  ;;  %v939_v7 = vxor.u32 2147483648, %v3573_v26  ;;  %v1029_v16 = vsub.s32 4, %v3415_v29  ;;  %v1028_v28 = vsel %vm945_vm7, %v1027_v45, %v1026_v17 }
 0x1c9   :  { %v3618_v35 = vshrl.u32 %v1108_v42, 30  ;;  %v1223_v23 = vsub.s32 32, %v3592_v21  ;;  %v1228_v55 = vadd.s32 127, %v1227_v41  ;;  %v4888_v40 = vand.u32 2147483647, %v3531_v0 }
 0x1ca   :  { %v1272_v50 = vshll.u32 %v4879_v52, %v1269_v33  ;;  %v1275_v51 = vshll.u32 %v4931_v22, %v1269_v33  ;;  %v1278_v39 = vshll.u32 %v4932_v56, %v1269_v33  ;;  %v1273_v34 = vshrl.u32 %v4931_v22, %v1270_v36 }
 0x1cb   :  { %v1110_v15 = vshll.u32 %v3618_v35, 30  ;;  %v1276_v59 = vshrl.u32 %v4932_v56, %v1270_v36  ;;  %v1281_v24 = vshll.u32 %v4933_v43, %v1269_v33  ;;  %v1282_v17 = vshrl.u32 %v4883_v62, %v1270_v36 }
 0x1cc   :  { %v1279_v10 = vshrl.u32 %v4933_v43, %v1270_v36  ;;  %v1284_v45 = vshll.u32 %v4883_v62, %v1269_v33  ;;  %v1285_v41 = vshrl.u32 %v4881_v11, %v1270_v36  ;;  %v940_v42 = vsel %vm938_vm9, %v939_v7, %v3581_v13 }
 0x1cd   :  { %v3632_v46 = vsub.s32 %v1107_v38, %v1110_v15  ;;  %v1031_v14 = vsel %vm3603_vm6, %v3290_v12, %v1028_v28  ;;  %v1207_v52 = vadd.s32 %v3496_v27, %v3494_v1  ;;  %v1262_v38 = vand.u32 8388607, %v4888_v40 }
 0x1ce   :  { %vm931_vm11 = vweird.f32 %v3192_v47  ;;  %v937_v33 = vsel %vm935_vm8, %v3573_v26, %v936_v19  ;;  %v1229_v15 = vshll.u32 %v1228_v55, 23  ;;  %v1268_v62 = vshrl.u32 %v1267_v61, 5 }
 0x1cf   :  { %v1113_v11 = vsub.s32 0, %v3632_v46  ;;  %v1225_v13 = vshrl.u32 %v1207_v52, %v1223_v23  ;;  %v1274_v7 = vor.u32 %v1273_v34, %v1272_v50  ;;  %v1277_v3 = vor.u32 %v1276_v59, %v1275_v51 }
 0x1d0   :  { %v1283_v6 = vor.u32 %v1282_v17, %v1281_v24  ;;  %2771 = vcosq.f32 %v1031_v14  ;;  %v1280_v1 = vor.u32 %v1279_v10, %v1278_v39  ;;  %v1286_v27 = vor.u32 %v1285_v41, %v1284_v45 }
 0x1d1   :  { %v2625_v28 = vmin.u32 %v1113_v11, %v3632_v46  ;;  %v941_v40 = vsel %vm934_vm10, %v937_v33, %v940_v42  ;;  %2773 = vsinq.f32 %v1031_v14  ;;  %v1224_v4 = vshll.u32 %v3563_v60, %v3592_v21 }
 0x1d2   :  { %v1263_v26 = vor.u32 8388608, %v1262_v38  ;;  %v1230_v19 = vor.u32 4788187, %v1229_v15  ;;  %vm1287_vm12 = vcmp.lt.s32.totalorder %v1268_v62, 1  ;;  %vm1290_vm13 = vcmp.lt.s32.totalorder %v1268_v62, 4 }
 0x1d3   :  { %v1115_v55 = vclz %v2625_v28  ;;  %v1226_v52 = vor.u32 %v1225_v13, %v1224_v4  ;;  %vm1289_vm14 = vcmp.lt.s32.totalorder %v1268_v62, 3  ;;  %v1295_v61 = vsel %vm1287_vm12, %v1274_v7, %v1277_v3 }
 0x1d4   :  { %v1296_v23 = vsel %vm1290_vm13, %v1283_v6, 920167782  ;;  %v1299_v25 = vsel %vm1287_vm12, %v1277_v3, %v1280_v1  ;;  %v1300_v51 = vsel %vm1290_vm13, %v1286_v27, 1326507024  ;;  %v1030_v60 = vsel %vm945_vm7, %v1029_v16, %v3415_v29 }
 0x1d5   :  { %v2626_v50 = vadd.s32 4294967294, %v1115_v55  ;;  %v1297_v11 = vsel %vm1289_vm14, %v1280_v1, %v1296_v23  ;;  %v4937_v21 = vmov 683565275   ;;  %vm1288_vm15 = vcmp.lt.s32.totalorder %v1268_v62, 2 }
 0x1d6   :  { %v1271_v14 = vshrl.u32 %v4937_v21, %v1270_v36  ;;  %v1301_v39 = vsel %vm1289_vm14, %v1283_v6, %v1300_v51  ;;  %v1231_v4 = vand.u32 2147483647, %v1230_v19  ;;  %v1292_v34 = vsel %vm1290_vm13, %v1280_v1, 2102212464 }
 0x1d7   :  { %vm2627_vm0 = vcmp.lt.s32.totalorder %v2626_v50, 0  ;;  %v1302_v59 = vsel %vm1288_vm15, %v1299_v25, %v1301_v39  ;;  %vm1486_vm1 = vcmp.gt.s32.totalorder %v3608_v54, 0  ;;  %v942_v24 = vsel %vm931_vm11, nan, %v941_v40 }
 0x1d8   :  { %v1298_v17 = vsel %vm1288_vm15, %v1295_v61, %v1297_v11  ;;  %v1303_v10 = vshll.u32 %v1263_v26, 8  ;;  %v1582_v29 = vand.u32 2139095040, %v3613_v20  ;;  %v1032_v36 = vsel %vm3603_vm6, 0, %v1030_v60 }
 0x1d9   :  { %v1233_v16 = vcvt.s32.f32 %v1226_v52  ;;  %v3670_v6 = vsel %vm2627_vm0, 0, %v2626_v50  ;;  %v1291_v45 = vsel %vm1287_vm12, %v1271_v14, %v1274_v7  ;;  %v1293_v41 = vsel %vm1289_vm14, %v1277_v3, %v1292_v34 }
 0x1da   :  { %v3674_v42 = vmul.u32.u64.low %v1303_v10, %v1302_v59  ;;  %v3675_v38 = vmul.u32.u64.high %v1303_v10, %v1302_v59, %v3674_v42  ;;  %v4938_v47 = vrot.slane %v3374_v9, %v3105_v49  ;;  %v1036_v57 = vadd.s32 3, %v1032_v36 }
 0x1db   :  { %v1234_v33 = vmul.f32 %v1233_v16, %v1231_v4  ;;  %v3680_v15 = vmul.u32.u64.low %v1303_v10, %v1298_v17  ;;  %v3681_v13 = vmul.u32.u64.high %v1303_v10, %v1298_v17, %v3680_v15  ;;  %v1123_v28 = vsub.s32 4294967266, %v3670_v6 }
 0x1dc   :  { %v1404_v40 = vsub.f32 %v942_v24, %v4938_v47  ;;  %v1487_v7 = vsel %vm1486_vm1, %v3608_v54, 0  ;;  %v1294_v3 = vsel %vm1288_vm15, %v1291_v45, %v1293_v41  ;;  %v1686_v27 = vand.u32 2139095040, %v3610_v44 }
 0x1dd   :  { %v2772_v1 = vpop.eup %2771  ;;  %vm1312_vm2 = vc.u32 %v3675_v38, %v3680_v15  ;;  %v1583_v19 = vshrl.u32 %v1582_v29, 23  ;;  %v1235_v52 = vxor.u32 2147483648, %v1234_v33  ;;  %v1313_v61 = vadd.s32 1, %v3681_v13 }
 0x1de   :  { %v2774_v26 = vpop.eup %2773  ;;  %v1412_v55 = vmul.f32 0.5, %v1404_v40  ;;  %v1489_v23 = vand.u32 31, %v1487_v7  ;;  %v1037_v50 = vand.u32 3, %v1036_v57  ;;  %v1124_v11 = vadd.s32 127, %v1123_v28 }
 0x1df   :  { %v1310_v25 = vmul.u32 %v1303_v10, %v1294_v3  ;;  %v1442_v62 = vrot.slane %v3411_v30, %v3105_v49  ;;  %v1043_v54 = vxor.u32 2147483648, %v2772_v1  ;;  %v1380_v51 = vrot.slane %v3374_v9, %v3262_v32 }
 0x1e0   :  { %v1314_v60 = vsel %vm1312_vm2, %v1313_v61, %v3681_v13  ;;  %v1040_v14 = vxor.u32 2147483648, %v2774_v26  ;;  %vm1153_vm3 = vcmp.lt.s32.totalorder %v3369_v31, 0  ;;  %v1119_v39 = vsub.s32 32, %v3670_v6 }
 0x1e1   :  { %v1315_v4 = vadd.s32 %v1314_v60, %v1310_v25  ;;  %v1687_v34 = vshrl.u32 %v1686_v27, 23  ;;  %v2640_v59 = vadd.s32 4294967169, %v1583_v19  ;;  %v1420_v24 = vmul.f32 2.0, %v1412_v55 }
 0x1e2   :  { %v1236_v17 = vsel %vm1153_vm3, %v1235_v52, %v1234_v33  ;;  %v3702_v10 = vsub.s32 32, %v1489_v23  ;;  %vm1042_vm4 = vcmp.eq.s32.totalorder %v1037_v50, 2  ;;  %v1103_v29 = vadd.s32 %v3577_v37, %v3585_v53 }
 0x1e3   :  { %v1125_v36 = vshll.u32 %v1124_v11, 23  ;;  %v3706_v16 = vshrl.u32 %v1487_v7, 5  ;;  %vm1035_vm5 = vweird.f32 %v3290_v12  ;;  %vm1039_vm6 = vcmp.eq.s32.totalorder %v1037_v50, 0 }
 0x1e4   :  { %v1044_v45 = vsel %vm1042_vm4, %v1043_v54, %v2774_v26  ;;  %v4939_v41 = vand.u32 2147483647, %v3369_v31  ;;  %v1041_v47 = vsel %vm1039_vm6, %v2772_v1, %v1040_v14  ;;  %v1121_v33 = vshrl.u32 %v1103_v29, %v1119_v39 }
 0x1e5   :  { %v1316_v37 = vadd.s32 536870912, %v1315_v4  ;;  %v2644_v53 = vadd.s32 4294967169, %v1687_v34  ;;  %v1589_v13 = vadd.s32 1, %v2640_v59  ;;  %v3718_v57 = vadd.f32 %v1442_v62, %v1420_v24 }
 0x1e6   :  { %vm3711_vm7 = vcmp.le.f32.partialorder %v4939_v41, 0.7853982  ;;  %vm1038_vm8 = vcmp.lt.s32.totalorder %v1037_v50, 2  ;;  %v1237_v28 = vsub.s32 4, %v3549_v58  ;;  %v1120_v7 = vshll.u32 %v3632_v46, %v3670_v6 }
 0x1e7   :  { %v1239_v40 = vsel %vm3711_vm7, %v3369_v31, %v1236_v17  ;;  %v1126_v3 = vor.u32 4788187, %v1125_v36  ;;  %v4942_v27 = vmov 920167782   ;;  %v1045_v26 = vsel %vm1038_vm8, %v1041_v47, %v1044_v45 }
 0x1e8   :  { %v1502_v1 = vshrl.u32 %v4942_v27, %v3702_v10  ;;  %2775 = vcosq.f32 %v1239_v40  ;;  %v4892_v19 = vand.u32 2147483647, %v3459_v5  ;;  %v4943_v55 = vmov 1326507024  }
 0x1e9   :  { %v1505_v52 = vshrl.u32 %v4943_v55, %v3702_v10  ;;  %2777 = vsinq.f32 %v1239_v40  ;;  %v1122_v61 = vor.u32 %v1121_v33, %v1120_v7  ;;  %v3728_v11 = vshrl.u32 %v1316_v37, 30 }
 0x1ea   :  { %v1501_v50 = vshll.u32 %v4933_v43, %v1489_v23  ;;  %v1493_v46 = vshrl.u32 %v4931_v22, %v3702_v10  ;;  %v1496_v6 = vshrl.u32 %v4932_v56, %v3702_v10  ;;  %v1499_v25 = vshrl.u32 %v4933_v43, %v3702_v10 }
 0x1eb   :  { %v1504_v62 = vshll.u32 %v4942_v27, %v1489_v23  ;;  %v1790_v54 = vand.u32 2139095040, %v3718_v57  ;;  %v1238_v60 = vsel %vm1153_vm3, %v1237_v28, %v3549_v58  ;;  %v1127_v14 = vand.u32 2147483647, %v1126_v3 }
 0x1ec   :  { %v1503_v39 = vor.u32 %v1502_v1, %v1501_v50  ;;  %v1492_v34 = vshll.u32 %v4937_v21, %v1489_v23  ;;  %v1495_v59 = vshll.u32 %v4931_v22, %v1489_v23  ;;  %v1498_v24 = vshll.u32 %v4932_v56, %v1489_v23 }
 0x1ed   :  { %v1506_v17 = vor.u32 %v1505_v52, %v1504_v62  ;;  %v1046_v29 = vsel %vm1035_vm5, nan, %v1045_v26  ;;  %v1129_v36 = vcvt.s32.f32 %v1122_v61  ;;  %v1318_v45 = vshll.u32 %v3728_v11, 30 }
 0x1ee   :  { %v1482_v41 = vand.u32 8388607, %v4892_v19  ;;  %v3750_v47 = vor.u32 %v1493_v46, %v1492_v34  ;;  %v3752_v58 = vor.u32 %v1496_v6, %v1495_v59  ;;  %v1500_v40 = vor.u32 %v1499_v25, %v1498_v24 }
 0x1ef   :  { %vm1510_vm9 = vcmp.lt.s32.totalorder %v3706_v16, 4  ;;  %v1130_v33 = vmul.f32 %v1129_v36, %v1127_v14  ;;  %v1693_v37 = vadd.s32 1, %v2644_v53  ;;  %v1405_v12 = vsub.f32 %v1046_v29, %v1380_v51 }
 0x1f0   :  { %v1516_v23 = vsel %vm1510_vm9, %v1503_v39, 920167782  ;;  %v1240_v28 = vsel %vm3711_vm7, 0, %v1238_v60  ;;  %v1520_v7 = vsel %vm1510_vm9, %v1506_v17, 1326507024  ;;  %vm1590_vm10 = vcmp.gt.s32.totalorder %v1589_v13, 0 }
 0x1f1   :  { %v3761_v3 = vsub.s32 %v1315_v4, %v1318_v45  ;;  %vm1507_vm11 = vcmp.lt.s32.totalorder %v3706_v16, 1  ;;  %vm1509_vm12 = vcmp.lt.s32.totalorder %v3706_v16, 3  ;;  %v1791_v1 = vshrl.u32 %v1790_v54, 23 }
 0x1f2   :  { %v1483_v26 = vor.u32 8388608, %v1482_v41  ;;  %v1515_v51 = vsel %vm1507_vm11, %v3750_v47, %v3752_v58  ;;  %v1517_v42 = vsel %vm1509_vm12, %v1500_v40, %v1516_v23  ;;  %v1244_v53 = vadd.s32 3, %v1240_v28 }
 0x1f3   :  { %v1131_v52 = vxor.u32 2147483648, %v1130_v33  ;;  %v1519_v4 = vsel %vm1507_vm11, %v3752_v58, %v1500_v40  ;;  %v1521_v61 = vsel %vm1509_vm12, %v1503_v39, %v1520_v7  ;;  %v1413_v50 = vmul.f32 0.5, %v1405_v12 }
 0x1f4   :  { %v1446_v46 = vrot.slane %v3411_v30, %v3262_v32  ;;  %vm1508_vm13 = vcmp.lt.s32.totalorder %v3706_v16, 2  ;;  %vm1694_vm14 = vcmp.gt.s32.totalorder %v1693_v37, 0  ;;  %vm1049_vm15 = vcmp.lt.s32.totalorder %v3441_v63, 0 }
 0x1f5   :  { %v2776_v6 = vpop.eup %2775  ;;  %v1321_v25 = vsub.s32 0, %v3761_v3  ;;  %v1518_v62 = vsel %vm1508_vm13, %v1515_v51, %v1517_v42  ;;  %v1591_v60 = vsel %vm1590_vm10, %v1589_v13, 0  ;;  %v4944_v14 = vand.u32 2147483647, %v3441_v63 }
 0x1f6   :  { %v2778_v54 = vpop.eup %2777  ;;  %v1522_v34 = vsel %vm1508_vm13, %v1519_v4, %v1521_v61  ;;  %v1523_v59 = vshll.u32 %v1483_v26, 8  ;;  %v2648_v24 = vadd.s32 4294967169, %v1791_v1  ;;  %v1245_v17 = vand.u32 3, %v1244_v53 }
 0x1f7   :  { %vm3786_vm0 = vcmp.le.f32.partialorder %v4944_v14, 0.7853982  ;;  %v1132_v29 = vsel %vm1049_vm15, %v1131_v52, %v1130_v33  ;;  %v1133_v36 = vsub.s32 4, %v3618_v35  ;;  %v1421_v45 = vmul.f32 2.0, %v1413_v50 }
 0x1f8   :  { %v1251_v41 = vxor.u32 2147483648, %v2776_v6  ;;  %v3795_v13 = vmul.u32.u64.low %v1523_v59, %v1518_v62  ;;  %v3796_v23 = vmul.u32.u64.high %v1523_v59, %v1518_v62, %v3795_v13  ;;  %v1248_v12 = vxor.u32 2147483648, %v2778_v54 }
 0x1f9   :  { %v2633_v28 = vmin.u32 %v1321_v25, %v3761_v3  ;;  %v3800_v7 = vmul.u32.u64.low %v1523_v59, %v1522_v34  ;;  %v3801_v51 = vmul.u32.u64.high %v1523_v59, %v1522_v34, %v3800_v7  ;;  %v1695_v1 = vsel %vm1694_vm14, %v1693_v37, 0 }
 0x1fa   :  { %v1135_v33 = vsel %vm3786_vm0, %v3441_v63, %v1132_v29  ;;  %v1593_v26 = vand.u32 31, %v1591_v60  ;;  %v1797_v42 = vadd.s32 1, %v2648_v24  ;;  %vm1247_vm1 = vcmp.eq.s32.totalorder %v1245_v17, 0 }
 0x1fb   :  { %v1134_v53 = vsel %vm1049_vm15, %v1133_v36, %v3618_v35  ;;  %v3810_v52 = vadd.f32 %v1446_v46, %v1421_v45  ;;  %vm1250_vm2 = vcmp.eq.s32.totalorder %v1245_v17, 2  ;;  %v1491_v4 = vshrl.u32 %v4937_v21, %v3702_v10 }
 0x1fc   :  { %v1512_v37 = vsel %vm1510_vm9, %v1500_v40, 2102212464  ;;  %v1249_v61 = vsel %vm1247_vm1, %v2776_v6, %v1248_v12  ;;  %v1252_v50 = vsel %vm1250_vm2, %v1251_v41, %v2778_v54  ;;  %2779 = vcosq.f32 %v1135_v33 }
 0x1fd   :  { %v1323_v25 = vclz %v2633_v28  ;;  %v1136_v62 = vsel %vm3786_vm0, 0, %v1134_v53  ;;  %2781 = vsinq.f32 %v1135_v33  ;;  %v3818_v14 = vand.u32 31, %v1695_v1 }
 0x1fe   :  { %vm1246_vm3 = vcmp.lt.s32.totalorder %v1245_v17, 2  ;;  %v1511_v35 = vsel %vm1507_vm11, %v1491_v4, %v3750_v47  ;;  %v1513_v10 = vsel %vm1509_vm12, %v3752_v58, %v1512_v37  ;;  %vm1798_vm4 = vcmp.gt.s32.totalorder %v1797_v42, 0 }
 0x1ff   :  { %v1894_v40 = vand.u32 2139095040, %v3810_v52  ;;  %v1253_v46 = vsel %vm1246_vm3, %v1249_v61, %v1252_v50  ;;  %v1533_v6 = vadd.s32 1, %v3796_v23  ;;  %v3828_v54 = vsub.s32 32, %v1593_v26 }
 0x200   :  { %v1140_v39 = vadd.s32 3, %v1136_v62  ;;  %v2634_v34 = vadd.s32 4294967294, %v1323_v25  ;;  %vm1532_vm5 = vc.u32 %v3801_v51, %v3795_v13  ;;  %vm1243_vm6 = vweird.f32 %v3369_v31 }
 0x201   :  { %v1388_v47 = vrot.slane %v3374_v9, %v3323_v48  ;;  %v1514_v58 = vsel %vm1508_vm13, %v1511_v35, %v1513_v10  ;;  %v3837_v24 = vshrl.u32 %v1695_v1, 5  ;;  %v3840_v17 = vsub.s32 32, %v3818_v14 }
 0x202   :  { %v3842_v29 = vsel %vm1798_vm4, %v1797_v42, 0  ;;  %v1254_v36 = vsel %vm1243_vm6, nan, %v1253_v46  ;;  %v1895_v45 = vshrl.u32 %v1894_v40, 23  ;;  %v1534_v12 = vsel %vm1532_vm5, %v1533_v6, %v3796_v23 }
 0x203   :  { %v3849_v28 = vand.u32 3, %v1140_v39  ;;  %vm2635_vm7 = vcmp.lt.s32.totalorder %v2634_v34, 0  ;;  %v1530_v16 = vmul.u32 %v1523_v59, %v1514_v58  ;;  %v1606_v7 = vshrl.u32 %v4942_v27, %v3828_v54 }
 0x204   :  { %v3853_v1 = vshrl.u32 %v1591_v60, 5  ;;  %v3856_v33 = vand.u32 31, %v3842_v29  ;;  %v1407_v42 = vsub.f32 %v1254_v36, %v1388_v47  ;;  %v1609_v53 = vshrl.u32 %v4943_v55, %v3828_v54 }
 0x205   :  { %v3860_v4 = vadd.s32 %v1534_v12, %v1530_v16  ;;  %v4891_v23 = vand.u32 2147483647, %v3613_v20  ;;  %v1597_v37 = vshrl.u32 %v4931_v22, %v3828_v54  ;;  %v1605_v59 = vshll.u32 %v4933_v43, %v1593_v26 }
 0x206   :  { %v3866_v61 = vsel %vm2635_vm7, 0, %v2634_v34  ;;  %v1600_v60 = vshrl.u32 %v4932_v56, %v3828_v54  ;;  %v1603_v50 = vshrl.u32 %v4933_v43, %v3828_v54  ;;  %v1608_v25 = vshll.u32 %v4942_v27, %v1593_v26 }
 0x207   :  { %v2652_v62 = vadd.s32 4294967169, %v1895_v45  ;;  %vm1143_vm8 = vcmp.eq.s32.totalorder %v3849_v28, 0  ;;  %v1596_v35 = vshll.u32 %v4937_v21, %v1593_v26  ;;  %v1607_v10 = vor.u32 %v1606_v7, %v1605_v59 }
 0x208   :  { %v1415_v46 = vmul.f32 0.5, %v1407_v42  ;;  %v1599_v6 = vshll.u32 %v4931_v22, %v1593_v26  ;;  %v1602_v39 = vshll.u32 %v4932_v56, %v1593_v26  ;;  %v1610_v34 = vor.u32 %v1609_v53, %v1608_v25 }
 0x209   :  { %v2780_v40 = vpop.eup %2779  ;;  %v1331_v58 = vsub.s32 4294967266, %v3866_v61  ;;  %v1536_v36 = vadd.s32 536870912, %v3860_v4  ;;  %v1586_v45 = vand.u32 8388607, %v4891_v23  ;;  %v3881_v12 = vor.u32 %v1597_v37, %v1596_v35 }
 0x20a   :  { %v2782_v47 = vpop.eup %2781  ;;  %v1327_v16 = vsub.s32 32, %v3866_v61  ;;  %v3884_v7 = vor.u32 %v1600_v60, %v1599_v6  ;;  %v1604_v42 = vor.u32 %v1603_v50, %v1602_v39  ;;  %vm1614_vm9 = vcmp.lt.s32.totalorder %v3853_v1, 4 }
 0x20b   :  { %v3887_v59 = vadd.s32 1, %v2652_v62  ;;  %vm1142_vm10 = vcmp.lt.s32.totalorder %v3849_v28, 2  ;;  %vm1146_vm11 = vcmp.eq.s32.totalorder %v3849_v28, 2  ;;  %v1147_v26 = vxor.u32 2147483648, %v2780_v40 }
 0x20c   :  { %v1620_v53 = vsel %vm1614_vm9, %v1607_v10, 920167782  ;;  %v3893_v25 = vmul.f32 2.0, %v1415_v46  ;;  %v1144_v37 = vxor.u32 2147483648, %v2782_v47  ;;  %v1311_v60 = vadd.s32 %v3680_v15, %v3675_v38 }
 0x20d   :  { %v1624_v50 = vsel %vm1614_vm9, %v1610_v34, 1326507024  ;;  %v1332_v35 = vadd.s32 127, %v1331_v58  ;;  %v3899_v62 = vshrl.u32 %v1536_v36, 30  ;;  %vm1611_vm12 = vcmp.lt.s32.totalorder %v3853_v1, 1 }
 0x20e   :  { %vm1613_vm13 = vcmp.lt.s32.totalorder %v3853_v1, 3  ;;  %v1329_v6 = vshrl.u32 %v1311_v60, %v1327_v16  ;;  %v1587_v39 = vor.u32 8388608, %v1586_v45  ;;  %v1619_v46 = vsel %vm1611_vm12, %v3881_v12, %v3884_v7 }
 0x20f   :  { %v1621_v38 = vsel %vm1613_vm13, %v1604_v42, %v1620_v53  ;;  %v1148_v15 = vsel %vm1146_vm11, %v1147_v26, %v2782_v47  ;;  %v1623_v34 = vsel %vm1611_vm12, %v3884_v7, %v1604_v42  ;;  %v1625_v58 = vsel %vm1613_vm13, %v1607_v10, %v1624_v50 }
 0x210   :  { %v4895_v36 = vand.u32 2147483647, %v3610_v44  ;;  %vm1139_vm14 = vweird.f32 %v3441_v63  ;;  %v1145_v45 = vsel %vm1143_vm8, %v2780_v40, %v1144_v37  ;;  %vm1612_vm15 = vcmp.lt.s32.totalorder %v3853_v1, 2 }
 0x211   :  { %v1701_v16 = vshrl.u32 %v4931_v22, %v3840_v17  ;;  %v1704_v47 = vshrl.u32 %v4932_v56, %v3840_v17  ;;  %v1333_v26 = vshll.u32 %v1332_v35, 23  ;;  %v1538_v53 = vshll.u32 %v3899_v62, 30 }
 0x212   :  { %v1622_v10 = vsel %vm1612_vm15, %v1619_v46, %v1621_v38  ;;  %v1710_v60 = vshrl.u32 %v4942_v27, %v3840_v17  ;;  %v1626_v40 = vsel %vm1612_vm15, %v1623_v34, %v1625_v58  ;;  %v1700_v37 = vshll.u32 %v4937_v21, %v3818_v14 }
 0x213   :  { %v1703_v50 = vshll.u32 %v4931_v22, %v3818_v14  ;;  %v1707_v35 = vshrl.u32 %v4933_v43, %v3840_v17  ;;  %v3936_v23 = vshll.u32 %v1587_v39, 8  ;;  %v1690_v46 = vand.u32 8388607, %v4895_v36 }
 0x214   :  { %v1709_v38 = vshll.u32 %v4933_v43, %v3818_v14  ;;  %v1713_v34 = vshrl.u32 %v4943_v55, %v3840_v17  ;;  %v1149_v58 = vsel %vm1142_vm10, %v1145_v45, %v1148_v15  ;;  %v1702_v19 = vor.u32 %v1701_v16, %v1700_v37 }
 0x215   :  { %v1705_v41 = vor.u32 %v1704_v47, %v1703_v50  ;;  %v1706_v31 = vshll.u32 %v4932_v56, %v3818_v14  ;;  %vm1902_vm0 = vcmp.gt.s32.totalorder %v3887_v59, 0  ;;  %v1712_v49 = vshll.u32 %v4942_v27, %v3818_v14 }
 0x216   :  { %v3950_v39 = vmul.u32.u64.low %v3936_v23, %v1622_v10  ;;  %v3951_v32 = vmul.u32.u64.high %v3936_v23, %v1622_v10, %v3950_v39  ;;  %v1711_v36 = vor.u32 %v1710_v60, %v1709_v38  ;;  %v3957_v8 = vsub.s32 %v3860_v4, %v1538_v53 }
 0x217   :  { %v3960_v28 = vmul.u32.u64.low %v3936_v23, %v1626_v40  ;;  %v3961_v15 = vmul.u32.u64.high %v3936_v23, %v1626_v40, %v3960_v28  ;;  %v1708_v45 = vor.u32 %v1707_v35, %v1706_v31  ;;  %v1595_v16 = vshrl.u32 %v4937_v21, %v3828_v54 }
 0x218   :  { %v1691_v47 = vor.u32 8388608, %v1690_v46  ;;  %v1714_v37 = vor.u32 %v1713_v34, %v1712_v49  ;;  %vm1715_vm1 = vcmp.lt.s32.totalorder %v3837_v24, 1  ;;  %v1328_v10 = vshll.u32 %v3761_v3, %v3866_v61 }
 0x219   :  { %v1334_v60 = vor.u32 4788187, %v1333_v26  ;;  %vm1718_vm2 = vcmp.lt.s32.totalorder %v3837_v24, 4  ;;  %v1723_v14 = vsel %vm1715_vm1, %v1702_v19, %v1705_v41  ;;  %v1150_v4 = vsel %vm1139_vm14, nan, %v1149_v58 }
 0x21a   :  { %v1616_v31 = vsel %vm1614_vm9, %v1604_v42, 2102212464  ;;  %vm1717_vm3 = vcmp.lt.s32.totalorder %v3837_v24, 3  ;;  %v1724_v49 = vsel %vm1718_vm2, %v1711_v36, 920167782  ;;  %v1330_v54 = vor.u32 %v1329_v6, %v1328_v10 }
 0x21b   :  { %v1541_v3 = vsub.s32 0, %v3957_v8  ;;  %vm1716_vm4 = vcmp.lt.s32.totalorder %v3837_v24, 2  ;;  %v1725_v61 = vsel %vm1717_vm3, %v1708_v45, %v1724_v49  ;;  %v1727_v26 = vsel %vm1715_vm1, %v1705_v41, %v1708_v45 }
 0x21c   :  { %v1726_v63 = vsel %vm1716_vm4, %v1723_v14, %v1725_v61  ;;  %v1728_v42 = vsel %vm1718_vm2, %v1714_v37, 1326507024  ;;  %v1731_v53 = vshll.u32 %v1691_v47, 8  ;;  %v4947_v6 = vrot.slane %v3374_v9, %v3406_v18 }
 0x21d   :  { %v1335_v50 = vand.u32 2147483647, %v1334_v60  ;;  %v1615_v35 = vsel %vm1611_vm12, %v1595_v16, %v3881_v12  ;;  %v1617_v46 = vsel %vm1613_vm13, %v3884_v7, %v1616_v31  ;;  %v1637_v38 = vadd.s32 1, %v3951_v32 }
 0x21e   :  { %v1406_v40 = vsub.f32 %v1150_v4, %v4947_v6  ;;  %v1729_v34 = vsel %vm1717_vm3, %v1711_v36, %v1728_v42  ;;  %v4000_v58 = vmul.u32.u64.low %v1731_v53, %v1726_v63  ;;  %v4001_v28 = vmul.u32.u64.high %v1731_v53, %v1726_v63, %v4000_v58  ;;  %v4037_v63 = vld [vmem:[#allocation10] sm:$0xff] }
 0x21f   :  { %v1337_v9 = vcvt.s32.f32 %v1330_v54  ;;  %v2637_v47 = vmin.u32 %v1541_v3, %v3957_v8  ;;  %vm1636_vm5 = vc.u32 %v3961_v15, %v3950_v39  ;;  %v1730_v12 = vsel %vm1716_vm4, %v1727_v26, %v1729_v34 }
 0x220   :  { %v1618_v7 = vsel %vm1612_vm15, %v1615_v35, %v1617_v46  ;;  %v1720_v16 = vsel %vm1718_vm2, %v1708_v45, 2102212464  ;;  %v4013_v36 = vmul.u32.u64.low %v1731_v53, %v1730_v12  ;;  %v4014_v37 = vmul.u32.u64.high %v1731_v53, %v1730_v12, %v4013_v36 }
 0x221   :  { %v4019_v10 = vsel %vm1902_vm0, %v3887_v59, 0  ;;  %v1341_v60 = vsub.s32 4, %v3728_v11  ;;  %v1699_v14 = vshrl.u32 %v4937_v21, %v3840_v17  ;;  %v4948_v1 = vrot.slane %v3411_v30, %v3323_v48 }
 0x222   :  { %v1414_v45 = vmul.f32 0.5, %v1406_v40  ;;  %v1338_v31 = vmul.f32 %v1337_v9, %v1335_v50  ;;  %v1638_v49 = vsel %vm1636_vm5, %v1637_v38, %v3951_v32  ;;  %v1543_v54 = vclz %v2637_v47 }
 0x223   :  { %v4028_v4 = vadd.f32 %v4948_v1, %v3893_v25  ;;  %v1634_v3 = vmul.u32 %v3936_v23, %v1618_v7  ;;  %v1719_v59 = vsel %vm1715_vm1, %v1699_v14, %v1702_v19  ;;  %v1721_v61 = vsel %vm1717_vm3, %v1705_v41, %v1720_v16 }
 0x224   :  { %v1802_v17 = vsub.s32 32, %v3856_v33  ;;  %v1450_v30 = vrot.slane %v4037_v63, %v3406_v18  ;;  %vm1257_vm6 = vcmp.lt.s32.totalorder %v3531_v0, 0  ;;  %v1741_v32 = vadd.s32 1, %v4001_v28 }
 0x225   :  { %4949 = vst [vmem:[#allocation28_spill] sm:$0xff] %v4028_v4  ;;  %v4950_v25 = vand.u32 2147483647, %v3531_v0  ;;  %v4049_v19 = vadd.s32 %v1638_v49, %v1634_v3  ;;  %vm1740_vm8 = vc.u32 %v4014_v37, %v4000_v58  ;;  %v4901_v41 = vand.u32 2147483647, %v3718_v57 }
 0x226   :  { %v4055_v26 = vshrl.u32 %v3842_v29, 5  ;;  %v4058_v42 = vand.u32 31, %v4019_v10  ;;  %v1342_v6 = vsel %vm1257_vm6, %v1341_v60, %v3728_v11  ;;  %v1722_v40 = vsel %vm1716_vm4, %v1719_v59, %v1721_v61 }
 0x227   :  { %vm4045_vm7 = vcmp.le.f32.partialorder %v4950_v25, 0.7853982  ;;  %v2102_v50 = vand.u32 2139095040, %v4028_v4  ;;  %v1422_v35 = vmul.f32 2.0, %v1414_v45  ;;  %v1339_v46 = vxor.u32 2147483648, %v1338_v31 }
 0x228   :  { %v2638_v38 = vadd.s32 4294967294, %v1543_v54  ;;  %v1742_v34 = vsel %vm1740_vm8, %v1741_v32, %v4001_v28  ;;  %v1805_v29 = vshrl.u32 %v4931_v22, %v1802_v17  ;;  %v1808_v9 = vshrl.u32 %v4932_v56, %v1802_v17 }
 0x229   :  { %v1811_v47 = vshrl.u32 %v4933_v43, %v1802_v17  ;;  %v1640_v12 = vadd.s32 536870912, %v4049_v19  ;;  %v1738_v7 = vmul.u32 %v1731_v53, %v1722_v40  ;;  %v1794_v11 = vand.u32 8388607, %v4901_v41 }
 0x22a   :  { %v1804_v24 = vshll.u32 %v4937_v21, %v3856_v33  ;;  %v1807_v16 = vshll.u32 %v4931_v22, %v3856_v33  ;;  %v1810_v28 = vshll.u32 %v4932_v56, %v3856_v33  ;;  %v1813_v36 = vshll.u32 %v4933_v43, %v3856_v33 }
 0x22b   :  { %v1814_v60 = vshrl.u32 %v4942_v27, %v1802_v17  ;;  %v4082_v14 = vadd.f32 %v1450_v30, %v1422_v35  ;;  %v1743_v53 = vadd.s32 %v1742_v34, %v1738_v7  ;;  %v1816_v1 = vshll.u32 %v4942_v27, %v3856_v33 }
 0x22c   :  { %v1817_v45 = vshrl.u32 %v4943_v55, %v1802_v17  ;;  %v1806_v49 = vor.u32 %v1805_v29, %v1804_v24  ;;  %v1809_v54 = vor.u32 %v1808_v9, %v1807_v16  ;;  %v1812_v3 = vor.u32 %v1811_v47, %v1810_v28 }
 0x22d   :  { %v1815_v59 = vor.u32 %v1814_v60, %v1813_v36  ;;  %v1340_v61 = vsel %vm1257_vm6, %v1339_v46, %v1338_v31  ;;  %v1344_v32 = vsel %vm4045_vm7, 0, %v1342_v6  ;;  %v4091_v25 = vshrl.u32 %v1640_v12, 30 }
 0x22e   :  { %v1818_v30 = vor.u32 %v1817_v45, %v1816_v1  ;;  %v2103_v40 = vshrl.u32 %v2102_v50, 23  ;;  %vm2639_vm9 = vcmp.lt.s32.totalorder %v2638_v38, 0  ;;  %v1795_v35 = vor.u32 8388608, %v1794_v11 }
 0x22f   :  { %vm1822_vm10 = vcmp.lt.s32.totalorder %v4055_v26, 4  ;;  %v1744_v33 = vadd.s32 536870912, %v1743_v53  ;;  %vm1819_vm11 = vcmp.lt.s32.totalorder %v4055_v26, 1  ;;  %vm1821_vm12 = vcmp.lt.s32.totalorder %v4055_v26, 3 }
 0x230   :  { %v1828_v34 = vsel %vm1822_vm10, %v1815_v59, 920167782  ;;  %v1998_v29 = vand.u32 2139095040, %v4082_v14  ;;  %v1343_v31 = vsel %vm4045_vm7, %v3531_v0, %v1340_v61  ;;  %v1827_v6 = vsel %vm1819_vm11, %v1806_v49, %v1809_v54 }
 0x231   :  { %v1829_v50 = vsel %vm1821_vm12, %v1812_v3, %v1828_v34  ;;  %v1546_v46 = vsel %vm2639_vm9, 0, %v2638_v38  ;;  %v1642_v9 = vshll.u32 %v4091_v25, 30  ;;  %v1831_v47 = vsel %vm1819_vm11, %v1809_v54, %v1812_v3 }
 0x232   :  { %v1832_v12 = vsel %vm1822_vm10, %v1818_v30, 1326507024  ;;  %v1803_v7 = vshrl.u32 %v4937_v21, %v1802_v17  ;;  %vm1820_vm13 = vcmp.lt.s32.totalorder %v4055_v26, 2  ;;  %v1824_v11 = vsel %vm1822_vm10, %v1812_v3, 2102212464 }
 0x233   :  { %v1833_v23 = vsel %vm1821_vm12, %v1815_v59, %v1832_v12  ;;  %v4111_v24 = vshrl.u32 %v1744_v33, 30  ;;  %v1830_v16 = vsel %vm1820_vm13, %v1827_v6, %v1829_v50  ;;  %v1835_v28 = vshll.u32 %v1795_v35, 8 }
 0x234   :  { %v1834_v38 = vsel %vm1820_vm13, %v1831_v47, %v1833_v23  ;;  %v1999_v36 = vshrl.u32 %v1998_v29, 23  ;;  %2783 = vcosq.f32 %v1343_v31  ;;  %v1547_v60 = vsub.s32 32, %v1546_v46 }
 0x235   :  { %v1551_v1 = vsub.s32 4294967266, %v1546_v46  ;;  %v1823_v17 = vsel %vm1819_vm11, %v1803_v7, %v1806_v49  ;;  %v1825_v45 = vsel %vm1821_vm12, %v1809_v54, %v1824_v11  ;;  %2785 = vsinq.f32 %v1343_v31 }
 0x236   :  { %v4121_v3 = vmul.u32.u64.low %v1835_v28, %v1834_v38  ;;  %v4122_v59 = vmul.u32.u64.high %v1835_v28, %v1834_v38, %v4121_v3  ;;  %v1348_v61 = vadd.s32 3, %v1344_v32  ;;  %v1531_v35 = vadd.s32 %v3795_v13, %v3801_v51 }
 0x237   :  { %v4124_v30 = vmul.u32.u64.low %v1835_v28, %v1830_v16  ;;  %v4125_v33 = vmul.u32.u64.high %v1835_v28, %v1830_v16, %v4124_v30  ;;  %v4131_v34 = vsub.s32 %v4049_v19, %v1642_v9  ;;  %v1746_v49 = vshll.u32 %v4111_v24, 30 }
 0x238   :  { %v2660_v29 = vadd.s32 4294967169, %v2103_v40  ;;  %v2656_v6 = vadd.s32 4294967169, %v1999_v36  ;;  %v1826_v54 = vsel %vm1820_vm13, %v1823_v17, %v1825_v45  ;;  %v4137_v31 = vsub.s32 32, %v4058_v42 }
 0x239   :  { %v1549_v32 = vshrl.u32 %v1531_v35, %v1547_v60  ;;  %v1552_v50 = vadd.s32 127, %v1551_v1  ;;  %vm1844_vm14 = vc.u32 %v4122_v59, %v4124_v30  ;;  %v4142_v13 = vshrl.u32 %v4019_v10, 5 }
 0x23a   :  { %v4144_v51 = vand.u32 3, %v1348_v61  ;;  %v1845_v19 = vadd.s32 1, %v4125_v33  ;;  %v1548_v40 = vshll.u32 %v3957_v8, %v1546_v46  ;;  %v1645_v26 = vsub.s32 0, %v4131_v34 }
 0x23b   :  { %v4149_v9 = vsub.s32 %v1743_v53, %v1746_v49  ;;  %v1842_v47 = vmul.u32 %v1835_v28, %v1826_v54  ;;  %v2109_v12 = vadd.s32 1, %v2660_v29  ;;  %v2005_v7 = vadd.s32 1, %v2656_v6 }
 0x23c   :  { %v1846_v11 = vsel %vm1844_vm14, %v1845_v19, %v4125_v33  ;;  %v4900_v23 = vand.u32 2147483647, %v3810_v52  ;;  %v1550_v16 = vor.u32 %v1549_v32, %v1548_v40  ;;  %v1553_v10 = vshll.u32 %v1552_v50, 23 }
 0x23d   :  { %v4153_v38 = vadd.s32 %v1846_v11, %v1842_v47  ;;  %v1918_v36 = vshrl.u32 %v4942_v27, %v4137_v31  ;;  %v1909_v8 = vshrl.u32 %v4931_v22, %v4137_v31  ;;  %v1912_v53 = vshrl.u32 %v4932_v56, %v4137_v31 }
 0x23e   :  { %v1915_v46 = vshrl.u32 %v4933_v43, %v4137_v31  ;;  %v1917_v28 = vshll.u32 %v4933_v43, %v4058_v42  ;;  %v2641_v60 = vmin.u32 %v1645_v26, %v4131_v34  ;;  %v1749_v1 = vsub.s32 0, %v4149_v9 }
 0x23f   :  { %v1908_v17 = vshll.u32 %v4937_v21, %v4058_v42  ;;  %v1921_v45 = vshrl.u32 %v4943_v55, %v4137_v31  ;;  %v1898_v3 = vand.u32 8388607, %v4900_v23  ;;  %v1911_v61 = vshll.u32 %v4931_v22, %v4058_v42 }
 0x240   :  { %v1914_v33 = vshll.u32 %v4932_v56, %v4058_v42  ;;  %v1919_v35 = vor.u32 %v1918_v36, %v1917_v28  ;;  %vm2006_vm15 = vcmp.gt.s32.totalorder %v2005_v7, 0  ;;  %v1554_v29 = vor.u32 4788187, %v1553_v10 }
 0x241   :  { %v2784_v49 = vpop.eup %2783  ;;  %v1848_v6 = vadd.s32 536870912, %v4153_v38  ;;  %v1920_v54 = vshll.u32 %v4942_v27, %v4058_v42  ;;  %vm2110_vm0 = vcmp.gt.s32.totalorder %v2109_v12, 0  ;;  %v1910_v32 = vor.u32 %v1909_v8, %v1908_v17 }
 0x242   :  { %v1913_v50 = vor.u32 %v1912_v53, %v1911_v61  ;;  %v1916_v19 = vor.u32 %v1915_v46, %v1914_v33  ;;  %v2786_v40 = vpop.eup %2785  ;;  %vm1351_vm1 = vcmp.eq.s32.totalorder %v4144_v51, 0  ;;  %vm1354_vm2 = vcmp.eq.s32.totalorder %v4144_v51, 2 }
 0x243   :  { %v1647_v26 = vclz %v2641_v60  ;;  %v2645_v47 = vmin.u32 %v1749_v1, %v4149_v9  ;;  %v1922_v11 = vor.u32 %v1921_v45, %v1920_v54  ;;  %vm1926_vm3 = vcmp.lt.s32.totalorder %v4142_v13, 4 }
 0x244   :  { %v2007_v10 = vsel %vm2006_vm15, %v2005_v7, 0  ;;  %v1557_v36 = vcvt.s32.f32 %v1550_v16  ;;  %v1899_v28 = vor.u32 8388608, %v1898_v3  ;;  %v1932_v42 = vsel %vm1926_vm3, %v1919_v35, 920167782 }
 0x245   :  { %v1555_v8 = vand.u32 2147483647, %v1554_v29  ;;  %v4186_v53 = vshrl.u32 %v1848_v6, 30  ;;  %vm1923_vm4 = vcmp.lt.s32.totalorder %v4142_v13, 1  ;;  %vm1925_vm5 = vcmp.lt.s32.totalorder %v4142_v13, 3 }
 0x246   :  { %v1352_v46 = vxor.u32 2147483648, %v2786_v40  ;;  %v1355_v60 = vxor.u32 2147483648, %v2784_v49  ;;  %v1931_v1 = vsel %vm1923_vm4, %v1910_v32, %v1913_v50  ;;  %v1933_v7 = vsel %vm1925_vm5, %v1916_v19, %v1932_v42 }
 0x247   :  { %v2642_v16 = vadd.s32 4294967294, %v1647_v26  ;;  %v1751_v17 = vclz %v2645_v47  ;;  %v1935_v45 = vsel %vm1923_vm4, %v1913_v50, %v1916_v19  ;;  %v1936_v3 = vsel %vm1926_vm3, %v1922_v11, 1326507024 }
 0x248   :  { %vm1924_vm6 = vcmp.lt.s32.totalorder %v4142_v13, 2  ;;  %v1928_v61 = vsel %vm1926_vm3, %v1916_v19, 2102212464  ;;  %v1937_v33 = vsel %vm1925_vm5, %v1919_v35, %v1936_v3  ;;  %v1939_v29 = vshll.u32 %v1899_v28, 8 }
 0x249   :  { %vm1347_vm7 = vweird.f32 %v3531_v0  ;;  %v1850_v6 = vshll.u32 %v4186_v53, 30  ;;  %v1907_v54 = vshrl.u32 %v4937_v21, %v4137_v31  ;;  %v1934_v26 = vsel %vm1924_vm6, %v1931_v1, %v1933_v7 }
 0x24a   :  { %v1938_v47 = vsel %vm1924_vm6, %v1935_v45, %v1937_v33  ;;  %v4212_v11 = vsel %vm2110_vm0, %v2109_v12, 0  ;;  %v1558_v19 = vmul.f32 %v1557_v36, %v1555_v8  ;;  %v2009_v28 = vand.u32 31, %v2007_v10  ;;  %v4230_v8 = vld [vmem:[#allocation8] sm:$0xff] }
 0x24b   :  { %v4214_v42 = vmul.u32.u64.low %v1939_v29, %v1938_v47  ;;  %v4215_v35 = vmul.u32.u64.high %v1939_v29, %v1938_v47, %v4214_v42  ;;  %v1561_v3 = vsub.s32 4, %v3899_v62  ;;  %v1927_v23 = vsel %vm1923_vm4, %v1907_v54, %v1910_v32 }
 0x24c   :  { %v1929_v31 = vsel %vm1925_vm5, %v1913_v50, %v1928_v61  ;;  %v1353_v1 = vsel %vm1351_vm1, %v2784_v49, %v1352_v46  ;;  %v1356_v12 = vsel %vm1354_vm2, %v1355_v60, %v2786_v40  ;;  %vm2643_vm8 = vcmp.lt.s32.totalorder %v2642_v16, 0 }
 0x24d   :  { %v4226_v7 = vmul.u32.u64.low %v1939_v29, %v1934_v26  ;;  %v4227_v36 = vmul.u32.u64.high %v1939_v29, %v1934_v26, %v4226_v7  ;;  %v2646_v32 = vadd.s32 4294967294, %v1751_v17  ;;  %v4235_v33 = vsub.s32 %v4153_v38, %v1850_v6 }
 0x24e   :  { %vm1350_vm9 = vcmp.lt.s32.totalorder %v4144_v51, 2  ;;  %vm1477_vm10 = vcmp.lt.s32.totalorder %v3459_v5, 0  ;;  %v1559_v49 = vxor.u32 2147483648, %v1558_v19  ;;  %v1930_v50 = vsel %vm1924_vm6, %v1927_v23, %v1929_v31 }
 0x24f   :  { %v4242_v40 = vand.u32 31, %v4212_v11  ;;  %v1357_v46 = vsel %vm1350_vm9, %v1353_v1, %v1356_v12  ;;  %vm1948_vm11 = vc.u32 %v4215_v35, %v4226_v7  ;;  %v2010_v60 = vsub.s32 32, %v2009_v28 }
 0x250   :  { %v4249_v38 = vsel %vm1477_vm10, %v1561_v3, %v3899_v62  ;;  %v1635_v51 = vadd.s32 %v3950_v39, %v3961_v15  ;;  %v4253_v17 = vsel %vm2643_vm8, 0, %v2642_v16  ;;  %v1949_v13 = vadd.s32 1, %v4227_v36 }
 0x251   :  { %v4256_v23 = vshrl.u32 %v2007_v10, 5  ;;  %vm2647_vm12 = vcmp.lt.s32.totalorder %v2646_v32, 0  ;;  %v1853_v61 = vsub.s32 0, %v4235_v33  ;;  %v1946_v6 = vmul.u32 %v1939_v29, %v1930_v50 }
 0x252   :  { %v1358_v54 = vsel %vm1347_vm7, nan, %v1357_v46  ;;  %v4263_v62 = vsel %vm1477_vm10, %v1559_v49, %v1558_v19  ;;  %v1950_v26 = vsel %vm1948_vm11, %v1949_v13, %v4227_v36  ;;  %v4904_v39 = vand.u32 2147483647, %v4082_v14 }
 0x253   :  { %v1655_v15 = vsub.s32 4294967266, %v4253_v17  ;;  %v1951_v16 = vadd.s32 %v1950_v26, %v1946_v6  ;;  %v2013_v10 = vshrl.u32 %v4931_v22, %v2010_v60  ;;  %v2016_v47 = vshrl.u32 %v4932_v56, %v2010_v60 }
 0x254   :  { %v4270_v42 = vsel %vm2647_vm12, 0, %v2646_v32  ;;  %v2019_v0 = vshrl.u32 %v4933_v43, %v2010_v60  ;;  %v2021_v29 = vshll.u32 %v4933_v43, %v2009_v28  ;;  %v2022_v19 = vshrl.u32 %v4942_v27, %v2010_v60 }
 0x255   :  { %v2649_v3 = vmin.u32 %v1853_v61, %v4235_v33  ;;  %v1952_v31 = vadd.s32 536870912, %v1951_v16  ;;  %v2012_v1 = vshll.u32 %v4937_v21, %v2009_v28  ;;  %v2015_v12 = vshll.u32 %v4931_v22, %v2009_v28 }
 0x256   :  { %v2002_v36 = vand.u32 8388607, %v4904_v39  ;;  %v2018_v49 = vshll.u32 %v4932_v56, %v2009_v28  ;;  %v2023_v32 = vor.u32 %v2022_v19, %v2021_v29  ;;  %v2025_v50 = vshrl.u32 %v4943_v55, %v2010_v60 }
 0x257   :  { %v1656_v46 = vadd.s32 127, %v1655_v15  ;;  %v4282_v13 = vshrl.u32 %v1952_v31, 30  ;;  %v2014_v6 = vor.u32 %v2013_v10, %v2012_v1  ;;  %v2017_v26 = vor.u32 %v2016_v47, %v2015_v12 }
 0x258   :  { %v1651_v61 = vsub.s32 32, %v4253_v17  ;;  %v1759_v41 = vsub.s32 4294967266, %v4270_v42  ;;  %v2020_v45 = vor.u32 %v2019_v0, %v2018_v49  ;;  %v2024_v48 = vshll.u32 %v4942_v27, %v2009_v28 }
 0x259   :  { %v1739_v39 = vadd.s32 %v4000_v58, %v4014_v37  ;;  %v1855_v18 = vclz %v2649_v3  ;;  %v1954_v29 = vshll.u32 %v4282_v13, 30  ;;  %vm2030_vm13 = vcmp.lt.s32.totalorder %v4256_v23, 4 }
 0x25a   :  { %v2003_v15 = vor.u32 8388608, %v2002_v36  ;;  %v2026_v19 = vor.u32 %v2025_v50, %v2024_v48  ;;  %vm2027_vm14 = vcmp.lt.s32.totalorder %v4256_v23, 1  ;;  %v2036_v10 = vsel %vm2030_vm13, %v2023_v32, 920167782 }
 0x25b   :  { %v4953_v47 = vand.u32 2147483647, %v3459_v5  ;;  %v1657_v28 = vshll.u32 %v1656_v46, 23  ;;  %v4300_v58 = vsub.s32 %v1951_v16, %v1954_v29  ;;  %vm2029_vm0 = vcmp.lt.s32.totalorder %v4256_v23, 3 }
 0x25c   :  { %v2035_v37 = vsel %vm2027_vm14, %v2014_v6, %v2017_v26  ;;  %v1755_v48 = vsub.s32 32, %v4270_v42  ;;  %v1760_v3 = vadd.s32 127, %v1759_v41  ;;  %v2011_v31 = vshrl.u32 %v4937_v21, %v2010_v60 }
 0x25d   :  { %vm4296_vm15 = vcmp.le.f32.partialorder %v4953_v47, 0.7853982  ;;  %v2037_v1 = vsel %vm2029_vm0, %v2020_v45, %v2036_v10  ;;  %v1957_v12 = vsub.s32 0, %v4300_v58  ;;  %vm2028_vm1 = vcmp.lt.s32.totalorder %v4256_v23, 2 }
 0x25e   :  { %v2032_v16 = vsel %vm2030_vm13, %v2020_v45, 2102212464  ;;  %v2039_v36 = vsel %vm2027_vm14, %v2017_v26, %v2020_v45  ;;  %v2650_v49 = vadd.s32 4294967294, %v1855_v18  ;;  %v2038_v50 = vsel %vm2028_vm1, %v2035_v37, %v2037_v1 }
 0x25f   :  { %v2040_v41 = vsel %vm2030_vm13, %v2026_v19, 1326507024  ;;  %v2043_v60 = vshll.u32 %v2003_v15, 8  ;;  %v1653_v46 = vshrl.u32 %v1635_v51, %v1651_v61  ;;  %v2653_v29 = vmin.u32 %v1957_v12, %v4300_v58 }
 0x260   :  { %v2031_v10 = vsel %vm2027_vm14, %v2011_v31, %v2014_v6  ;;  %v2041_v47 = vsel %vm2029_vm0, %v2023_v32, %v2040_v41  ;;  %v2033_v45 = vsel %vm2029_vm0, %v2017_v26, %v2032_v16  ;;  %v4956_v51 = vrot.slane %v4230_v8, %v3485_v2 }
 0x261   :  { %v2042_v18 = vsel %vm2028_vm1, %v2039_v36, %v2041_v47  ;;  %v4328_v37 = vmul.u32.u64.low %v2043_v60, %v2038_v50  ;;  %v4329_v1 = vmul.u32.u64.high %v2043_v60, %v2038_v50, %v4328_v37  ;;  %v1652_v6 = vshll.u32 %v4131_v34, %v4253_v17 }
 0x262   :  { %v1408_v61 = vsub.f32 %v1358_v54, %v4956_v51  ;;  %v1658_v15 = vor.u32 4788187, %v1657_v28  ;;  %v1757_v19 = vshrl.u32 %v1739_v39, %v1755_v48  ;;  %v1761_v32 = vshll.u32 %v1760_v3, 23 }
 0x263   :  { %vm2651_vm2 = vcmp.lt.s32.totalorder %v2650_v49, 0  ;;  %v4337_v31 = vmul.u32.u64.low %v2043_v60, %v2042_v18  ;;  %v4338_v26 = vmul.u32.u64.high %v2043_v60, %v2042_v18, %v4337_v31  ;;  %v1654_v12 = vor.u32 %v1653_v46, %v1652_v6 }
 0x264   :  { %v1756_v16 = vshll.u32 %v4149_v9, %v4270_v42  ;;  %v1959_v36 = vclz %v2653_v29  ;;  %v2034_v50 = vsel %vm2028_vm1, %v2031_v10, %v2033_v45  ;;  %v1458_v8 = vrot.slane %v4037_v63, %v3485_v2 }
 0x265   :  { %v4350_v34 = vsel %vm4296_vm15, %v3459_v5, %v4263_v62  ;;  %v2053_v17 = vadd.s32 1, %v4329_v1  ;;  %v1416_v54 = vmul.f32 0.5, %v1408_v61  ;;  %v1659_v39 = vand.u32 2147483647, %v1658_v15 }
 0x266   :  { %v1758_v28 = vor.u32 %v1757_v19, %v1756_v16  ;;  %v4353_v48 = vsel %vm2651_vm2, 0, %v2650_v49  ;;  %v1762_v23 = vor.u32 4788187, %v1761_v32  ;;  %v2050_v42 = vmul.u32 %v2043_v60, %v2034_v50 }
 0x267   :  { %vm2052_vm3 = vc.u32 %v4338_v26, %v4328_v37  ;;  %v1661_v63 = vcvt.s32.f32 %v1654_v12  ;;  %v2654_v3 = vadd.s32 4294967294, %v1959_v36  ;;  %v2114_v41 = vsub.s32 32, %v4242_v40 }
 0x268   :  { %v2054_v62 = vsel %vm2052_vm3, %v2053_v17, %v4329_v1  ;;  %2787 = vcosq.f32 %v4350_v34  ;;  %v1863_v46 = vsub.s32 4294967266, %v4353_v48  ;;  %v1424_v10 = vmul.f32 2.0, %v1416_v54 }
 0x269   :  { %v2055_v29 = vadd.s32 %v2054_v62, %v2050_v42  ;;  %v4365_v47 = vmul.f32 %v1661_v63, %v1659_v39  ;;  %v1765_v60 = vcvt.s32.f32 %v1758_v28  ;;  %v1843_v45 = vadd.s32 %v4124_v30, %v4122_v59 }
 0x26a   :  { %v1763_v18 = vand.u32 2147483647, %v1762_v23  ;;  %v1859_v51 = vsub.s32 32, %v4353_v48  ;;  %v4907_v61 = vand.u32 2147483647, %v4028_v4  ;;  %vm2655_vm4 = vcmp.lt.s32.totalorder %v2654_v3, 0 }
 0x26b   :  { %v2056_v1 = vadd.s32 536870912, %v2055_v29  ;;  %v2117_v6 = vshrl.u32 %v4931_v22, %v2114_v41  ;;  %v2120_v15 = vshrl.u32 %v4932_v56, %v2114_v41  ;;  %v2126_v19 = vshrl.u32 %v4942_v27, %v2114_v41 }
 0x26c   :  { %v1864_v32 = vadd.s32 127, %v1863_v46  ;;  %v2112_v12 = vshrl.u32 %v4212_v11, 5  ;;  %v2123_v59 = vshrl.u32 %v4933_v43, %v2114_v41  ;;  %v2116_v30 = vshll.u32 %v4937_v21, %v4242_v40 }
 0x26d   :  { %v4374_v31 = vshrl.u32 %v2056_v1, 30  ;;  %v2119_v16 = vshll.u32 %v4931_v22, %v4242_v40  ;;  %v2125_v36 = vshll.u32 %v4933_v43, %v4242_v40  ;;  %v2129_v50 = vshrl.u32 %v4943_v55, %v2114_v41 }
 0x26e   :  { %v4385_v17 = vsel %vm2655_vm4, 0, %v2654_v3  ;;  %v2106_v11 = vand.u32 8388607, %v4907_v61  ;;  %v2122_v39 = vshll.u32 %v4932_v56, %v4242_v40  ;;  %v2118_v28 = vor.u32 %v2117_v6, %v2116_v30 }
 0x26f   :  { %v2058_v54 = vshll.u32 %v4374_v31, 30  ;;  %v2121_v23 = vor.u32 %v2120_v15, %v2119_v16  ;;  %v2127_v42 = vor.u32 %v2126_v19, %v2125_v36  ;;  %v2128_v63 = vshll.u32 %v4942_v27, %v4242_v40 }
 0x270   :  { %v4394_v62 = vadd.f32 %v1458_v8, %v1424_v10  ;;  %v1865_v46 = vshll.u32 %v1864_v32, 23  ;;  %v2124_v3 = vor.u32 %v2123_v59, %v2122_v39  ;;  %v1663_v49 = vxor.u32 2147483648, %v4365_v47 }
 0x271   :  { %v4396_v1 = vsub.s32 %v2055_v29, %v2058_v54  ;;  %v4399_v9 = vmul.f32 %v1765_v60, %v1763_v18  ;;  %v1861_v61 = vshrl.u32 %v1843_v45, %v1859_v51  ;;  %v2130_v2 = vor.u32 %v2129_v50, %v2128_v63 }
 0x272   :  { %v1967_v4 = vsub.s32 4294967266, %v4385_v17  ;;  %vm2131_vm5 = vcmp.lt.s32.totalorder %v2112_v12, 1  ;;  %vm2134_vm6 = vcmp.lt.s32.totalorder %v2112_v12, 4  ;;  %v2107_v15 = vor.u32 8388608, %v2106_v11 }
 0x273   :  { %v2061_v6 = vsub.s32 0, %v4396_v1  ;;  %vm2133_vm7 = vcmp.lt.s32.totalorder %v2112_v12, 3  ;;  %v2139_v40 = vsel %vm2131_vm5, %v2118_v28, %v2121_v23  ;;  %v2140_v8 = vsel %vm2134_vm6, %v2127_v42, 920167782 }
 0x274   :  { %v1860_v29 = vshll.u32 %v4235_v33, %v4353_v48  ;;  %v1866_v10 = vor.u32 4788187, %v1865_v46  ;;  %v2141_v45 = vsel %vm2133_vm7, %v2124_v3, %v2140_v8  ;;  %vm2132_vm8 = vcmp.lt.s32.totalorder %v2112_v12, 2 }
 0x275   :  { %v2657_v60 = vmin.u32 %v2061_v6, %v4396_v1  ;;  %v4408_v18 = vpop.eup %2787  ;;  %v2136_v51 = vsel %vm2134_vm6, %v2124_v3, 2102212464  ;;  %v2143_v19 = vsel %vm2131_vm5, %v2121_v23, %v2124_v3  ;;  %v2144_v32 = vsel %vm2134_vm6, %v2130_v2, 1326507024 }
 0x276   :  { %v1968_v59 = vadd.s32 127, %v1967_v4  ;;  %v2115_v16 = vshrl.u32 %v4937_v21, %v2114_v41  ;;  %v2142_v36 = vsel %vm2132_vm8, %v2139_v40, %v2141_v45  ;;  %v1862_v50 = vor.u32 %v1861_v61, %v1860_v29 }
 0x277   :  { %v2063_v30 = vclz %v2657_v60  ;;  %v1963_v33 = vsub.s32 32, %v4385_v17  ;;  %v2145_v48 = vsel %vm2133_vm7, %v2127_v42, %v2144_v32  ;;  %v2147_v54 = vshll.u32 %v2107_v15, 8 }
 0x278   :  { %v2135_v39 = vsel %vm2131_vm5, %v2115_v16, %v2118_v28  ;;  %v2137_v63 = vsel %vm2133_vm7, %v2121_v23, %v2136_v51  ;;  %v2146_v46 = vsel %vm2132_vm8, %v2143_v19, %v2145_v48  ;;  %vm1581_vm9 = vcmp.lt.s32.totalorder %v3613_v20, 0 }
 0x279   :  { %v2658_v11 = vadd.s32 4294967294, %v2063_v30  ;;  %v4418_v2 = vmul.u32.u64.low %v2147_v54, %v2146_v46  ;;  %v4419_v4 = vmul.u32.u64.high %v2147_v54, %v2146_v46, %v4418_v2  ;;  %v1867_v61 = vand.u32 2147483647, %v1866_v10 }
 0x27a   :  { %v4421_v3 = vmul.u32.u64.low %v2147_v54, %v2142_v36  ;;  %v4422_v41 = vmul.u32.u64.high %v2147_v54, %v2142_v36, %v4421_v3  ;;  %v1947_v42 = vadd.s32 %v4226_v7, %v4215_v35  ;;  %v1969_v6 = vshll.u32 %v1968_v59, 23 }
 0x27b   :  { %v4957_v28 = vsel %vm4296_vm15, 0, %v4249_v38  ;;  %v4958_v15 = vsub.s32 4, %v4091_v25  ;;  %v2138_v8 = vsel %vm2132_vm8, %v2135_v39, %v2137_v63  ;;  %v2206_v29 = vand.u32 2139095040, %v4394_v62 }
 0x27c   :  { %v1568_v23 = vadd.s32 3, %v4957_v28  ;;  %v1664_v60 = vsel %vm1581_vm9, %v1663_v49, %v4365_v47  ;;  %v1767_v10 = vxor.u32 2147483648, %v4399_v9  ;;  %v1869_v45 = vcvt.s32.f32 %v1862_v50 }
 0x27d   :  { %v1666_v40 = vsel %vm1581_vm9, %v4958_v15, %v4091_v25  ;;  %v1965_v35 = vshrl.u32 %v1947_v42, %v1963_v33  ;;  %vm2659_vm10 = vcmp.lt.s32.totalorder %v2658_v11, 0  ;;  %vm2156_vm11 = vc.u32 %v4419_v4, %v4421_v3 }
 0x27e   :  { %v2157_v7 = vadd.s32 1, %v4422_v41  ;;  %v2207_v38 = vshrl.u32 %v2206_v29, 23  ;;  %v1870_v0 = vmul.f32 %v1869_v45, %v1867_v61  ;;  %v1964_v25 = vshll.u32 %v4300_v58, %v4385_v17 }
 0x27f   :  { %v1970_v12 = vor.u32 4788187, %v1969_v6  ;;  %v2154_v51 = vmul.u32 %v2147_v54, %v2138_v8  ;;  %v4444_v19 = vand.u32 3, %v1568_v23  ;;  %v4959_v49 = vand.u32 2147483647, %v3613_v20 }
 0x280   :  { %v2158_v32 = vsel %vm2156_vm11, %v2157_v7, %v4422_v41  ;;  %v2664_v59 = vadd.s32 4294967169, %v2207_v38  ;;  %v1966_v16 = vor.u32 %v1965_v35, %v1964_v25  ;;  %v4455_v36 = vsel %vm2659_vm10, 0, %v2658_v11 }
 0x281   :  { %vm4448_vm12 = vcmp.le.f32.partialorder %v4959_v49, 0.7853982  ;;  %v2159_v58 = vadd.s32 %v2158_v32, %v2154_v51  ;;  %v4962_v50 = vand.u32 2147483647, %v3610_v44  ;;  %vm1685_vm14 = vcmp.lt.s32.totalorder %v3610_v44, 0 }
 0x282   :  { %v1668_v30 = vsel %vm4448_vm12, 0, %v1666_v40  ;;  %v1667_v17 = vsel %vm4448_vm12, %v3613_v20, %v1664_v60  ;;  %v2213_v48 = vadd.s32 1, %v2664_v59  ;;  %v1768_v54 = vsel %vm1685_vm14, %v1767_v10, %v4399_v9 }
 0x283   :  { %vm4462_vm13 = vcmp.le.f32.partialorder %v4962_v50, 0.7853982  ;;  %v1871_v11 = vxor.u32 2147483648, %v1870_v0  ;;  %v1971_v39 = vand.u32 2147483647, %v1970_v12  ;;  %v2160_v63 = vadd.s32 536870912, %v2159_v58 }
 0x284   :  { %2789 = vsinq.f32 %v4350_v34  ;;  %v4471_v46 = vadd.s32 3, %v1668_v30  ;;  %v2071_v2 = vsub.s32 4294967266, %v4455_v36  ;;  %vm2214_vm15 = vcmp.gt.s32.totalorder %v2213_v48, 0 }
 0x285   :  { %vm1789_vm0 = vcmp.lt.s32.totalorder %v3718_v57, 0  ;;  %v1973_v41 = vcvt.s32.f32 %v1966_v16  ;;  %v4475_v61 = vshrl.u32 %v2160_v63, 30  ;;  %v2215_v42 = vsel %vm2214_vm15, %v2213_v48, 0 }
 0x286   :  { %2791 = vcosq.f32 %v1667_v17  ;;  %v1769_v6 = vsub.s32 4, %v4111_v24  ;;  %v1771_v9 = vsel %vm4462_vm13, %v3610_v44, %v1768_v54  ;;  %v2217_v28 = vand.u32 31, %v2215_v42 }
 0x287   :  { %2793 = vsinq.f32 %v1667_v17  ;;  %v1872_v34 = vsel %vm1789_vm0, %v1871_v11, %v1870_v0  ;;  %v4483_v23 = vmul.f32 %v1973_v41, %v1971_v39  ;;  %v2162_v15 = vshll.u32 %v4475_v61, 30 }
 0x288   :  { %v2067_v40 = vsub.s32 32, %v4455_v36  ;;  %v2072_v8 = vadd.s32 127, %v2071_v2  ;;  %v2203_v29 = vand.u32 2147483647, %v4394_v62  ;;  %v2218_v60 = vsub.s32 32, %v2217_v28 }
 0x289   :  { %v1575_v10 = vxor.u32 2147483648, %v4408_v18  ;;  %2795 = vcosq.f32 %v1771_v9  ;;  %v4965_v45 = vand.u32 2147483647, %v3718_v57  ;;  %v4495_v7 = vsub.s32 %v2159_v58, %v2162_v15 }
 0x28a   :  { %v4500_v38 = vsel %vm1685_vm14, %v1769_v6, %v4111_v24  ;;  %2797 = vsinq.f32 %v1771_v9  ;;  %v2051_v25 = vadd.s32 %v4328_v37, %v4338_v26  ;;  %v1975_v12 = vxor.u32 2147483648, %v4483_v23 }
 0x28b   :  { %vm4491_vm1 = vcmp.le.f32.partialorder %v4965_v45, 0.7853982  ;;  %v2068_v51 = vshll.u32 %v4396_v1, %v4455_v36  ;;  %v2165_v49 = vsub.s32 0, %v4495_v7  ;;  %v2221_v47 = vshrl.u32 %v4931_v22, %v2218_v60 }
 0x28c   :  { %v4505_v0 = vsel %vm4491_vm1, %v3718_v57, %v1872_v34  ;;  %v2069_v24 = vshrl.u32 %v2051_v25, %v2067_v40  ;;  %v2073_v32 = vshll.u32 %v2072_v8, 23  ;;  %v2210_v59 = vand.u32 8388607, %v2203_v29 }
 0x28d   :  { %v2224_v30 = vshrl.u32 %v4932_v56, %v2218_v60  ;;  %v2661_v16 = vmin.u32 %v2165_v49, %v4495_v7  ;;  %v2220_v37 = vshll.u32 %v4937_v21, %v2217_v28  ;;  %v2223_v26 = vshll.u32 %v4931_v22, %v2217_v28 }
 0x28e   :  { %v2227_v58 = vshrl.u32 %v4933_v43, %v2218_v60  ;;  %v2216_v1 = vshrl.u32 %v2215_v42, 5  ;;  %v2226_v36 = vshll.u32 %v4932_v56, %v2217_v28  ;;  %v2229_v17 = vshll.u32 %v4933_v43, %v2217_v28 }
 0x28f   :  { %v2230_v50 = vshrl.u32 %v4942_v27, %v2218_v60  ;;  %v2155_v48 = vadd.s32 %v4421_v3, %v4419_v4  ;;  %v2167_v54 = vclz %v2661_v16  ;;  %v2222_v11 = vor.u32 %v2221_v47, %v2220_v37 }
 0x290   :  { %v2225_v39 = vor.u32 %v2224_v30, %v2223_v26  ;;  %v2228_v63 = vor.u32 %v2227_v58, %v2226_v36  ;;  %v2232_v41 = vshll.u32 %v4942_v27, %v2217_v28  ;;  %v2233_v22 = vshrl.u32 %v4943_v55, %v2218_v60 }
 0x291   :  { %v2231_v2 = vor.u32 %v2230_v50, %v2229_v17  ;;  %v4528_v6 = vpop.eup %2789  ;;  %v2070_v42 = vor.u32 %v2069_v24, %v2068_v51  ;;  %v2074_v56 = vor.u32 4788187, %v2073_v32  ;;  %v2662_v9 = vadd.s32 4294967294, %v2167_v54 }
 0x292   :  { %v2211_v43 = vor.u32 8388608, %v2210_v59  ;;  %v2234_v34 = vor.u32 %v2233_v22, %v2232_v41  ;;  %vm2235_vm2 = vcmp.lt.s32.totalorder %v2216_v1, 1  ;;  %vm2237_vm3 = vcmp.lt.s32.totalorder %v2216_v1, 3 }
 0x293   :  { %vm2238_vm4 = vcmp.lt.s32.totalorder %v2216_v1, 4  ;;  %v4530_v4 = vpop.eup %2791  ;;  %vm2663_vm5 = vcmp.lt.s32.totalorder %v2662_v9, 0  ;;  %v2243_v15 = vsel %vm2235_vm2, %v2222_v11, %v2225_v39  ;;  %v2247_v8 = vsel %vm2235_vm2, %v2225_v39, %v2228_v63 }
 0x294   :  { %v2240_v3 = vsel %vm2238_vm4, %v2228_v63, 2102212464  ;;  %v2244_v40 = vsel %vm2238_vm4, %v2231_v2, 920167782  ;;  %v4533_v27 = vpop.eup %2793  ;;  %v2170_v55 = vsel %vm2663_vm5, 0, %v2662_v9  ;;  %v2219_v49 = vshrl.u32 %v4937_v21, %v2218_v60 }
 0x295   :  { %v2245_v28 = vsel %vm2237_vm3, %v2228_v63, %v2244_v40  ;;  %v2248_v45 = vsel %vm2238_vm4, %v2234_v34, 1326507024  ;;  %v2171_v25 = vsub.s32 32, %v2170_v55  ;;  %v2175_v51 = vsub.s32 4294967266, %v2170_v55 }
 0x296   :  { %vm2236_vm6 = vcmp.lt.s32.totalorder %v2216_v1, 2  ;;  %v4538_v47 = vpop.eup %2795  ;;  %v2075_v24 = vand.u32 2147483647, %v2074_v56  ;;  %v2249_v59 = vsel %vm2237_vm3, %v2231_v2, %v2248_v45  ;;  %v2251_v30 = vshll.u32 %v2211_v43, 8 }
 0x297   :  { %v2246_v32 = vsel %vm2236_vm6, %v2243_v15, %v2245_v28  ;;  %v4542_v16 = vpop.eup %2797  ;;  %v2176_v37 = vadd.s32 127, %v2175_v51  ;;  %v2239_v26 = vsel %vm2235_vm2, %v2219_v49, %v2222_v11  ;;  %v2241_v58 = vsel %vm2237_vm3, %v2225_v39, %v2240_v3 }
 0x298   :  { %v2250_v36 = vsel %vm2236_vm6, %v2247_v8, %v2249_v59  ;;  %v4550_v60 = vmul.u32.u64.low %v2251_v30, %v2246_v32  ;;  %v4551_v50 = vmul.u32.u64.high %v2251_v30, %v2246_v32, %v4550_v60  ;;  %v1772_v54 = vsel %vm4462_vm13, 0, %v4500_v38 }
 0x299   :  { %v4547_v17 = vmul.u32.u64.low %v2251_v30, %v2250_v36  ;;  %v4548_v21 = vmul.u32.u64.high %v2251_v30, %v2250_v36, %v4547_v17  ;;  %2799 = vcosq.f32 %v4505_v0  ;;  %v2173_v63 = vshrl.u32 %v2155_v48, %v2171_v25 }
 0x29a   :  { %v2177_v2 = vshll.u32 %v2176_v37, 23  ;;  %v1873_v11 = vsub.s32 4, %v4186_v53  ;;  %2801 = vsinq.f32 %v4505_v0  ;;  %v2077_v39 = vcvt.s32.f32 %v2070_v42 }
 0x29b   :  { %v2242_v41 = vsel %vm2236_vm6, %v2239_v26, %v2241_v58  ;;  %v1572_v22 = vxor.u32 2147483648, %v4528_v6  ;;  %vm1893_vm7 = vcmp.lt.s32.totalorder %v3810_v52, 0  ;;  %v2172_v56 = vshll.u32 %v4495_v7, %v2170_v55 }
 0x29c   :  { %v2178_v9 = vor.u32 4788187, %v2177_v2  ;;  %v1976_v33 = vsel %vm1893_vm7, %v1975_v12, %v4483_v23  ;;  %v2078_v38 = vmul.f32 %v2077_v39, %v2075_v24  ;;  %vm2260_vm8 = vc.u32 %v4548_v21, %v4550_v60 }
 0x29d   :  { %v2261_v0 = vadd.s32 1, %v4551_v50  ;;  %vm1571_vm9 = vcmp.eq.s32.totalorder %v4444_v19, 0  ;;  %v1776_v1 = vadd.s32 3, %v1772_v54  ;;  %v2174_v48 = vor.u32 %v2173_v63, %v2172_v56 }
 0x29e   :  { %v2258_v42 = vmul.u32 %v2251_v30, %v2242_v41  ;;  %vm1574_vm10 = vcmp.eq.s32.totalorder %v4444_v19, 2  ;;  %v1874_v7 = vsel %vm1789_vm0, %v1873_v11, %v4186_v53  ;;  %v4968_v43 = vand.u32 2147483647, %v3810_v52 }
 0x29f   :  { %v2262_v12 = vsel %vm2260_vm8, %v2261_v0, %v4551_v50  ;;  %v1673_v34 = vand.u32 3, %v4471_v46  ;;  %v2179_v15 = vand.u32 2147483647, %v2178_v9  ;;  %vm1570_vm12 = vcmp.lt.s32.totalorder %v4444_v19, 2 }
 0x2a0   :  { %vm4579_vm11 = vcmp.le.f32.partialorder %v4968_v43, 0.7853982  ;;  %v2263_v40 = vadd.s32 %v2262_v12, %v2258_v42  ;;  %v1573_v53 = vsel %vm1571_vm9, %v4408_v18, %v1572_v22  ;;  %v1576_v55 = vsel %vm1574_vm10, %v1575_v10, %v4528_v6  ;;  %v4974_v22 = vld [vmem:[#allocation28_spill] sm:$0xff] }
 0x2a1   :  { %v1979_v3 = vsel %vm4579_vm11, %v3810_v52, %v1976_v33  ;;  %v2079_v28 = vxor.u32 2147483648, %v2078_v38  ;;  %v4593_v8 = vand.u32 3, %v1776_v1  ;;  %v1876_v46 = vsel %vm4491_vm1, 0, %v1874_v7 }
 0x2a2   :  { %v2181_v45 = vcvt.s32.f32 %v2174_v48  ;;  %v2264_v25 = vadd.s32 536870912, %v2263_v40  ;;  %v1676_v51 = vxor.u32 2147483648, %v4533_v27  ;;  %v1679_v49 = vxor.u32 2147483648, %v4530_v4 }
 0x2a3   :  { %v1977_v24 = vsub.s32 4, %v4282_v13  ;;  %2803 = vcosq.f32 %v1979_v3  ;;  %vm1674_vm13 = vcmp.lt.s32.totalorder %v1673_v34, 2  ;;  %vm1997_vm14 = vcmp.lt.s32.totalorder %v4082_v14, 0 }
 0x2a4   :  { %2805 = vsinq.f32 %v1979_v3  ;;  %v2182_v18 = vmul.f32 %v2181_v45, %v2179_v15  ;;  %v4601_v10 = vshrl.u32 %v2264_v25, 30  ;;  %vm1675_vm15 = vcmp.eq.s32.totalorder %v1673_v34, 0 }
 0x2a5   :  { %v1880_v6 = vadd.s32 3, %v1876_v46  ;;  %v2080_v35 = vsel %vm1997_vm14, %v2079_v28, %v2078_v38  ;;  %v2081_v32 = vsub.s32 4, %v4374_v31  ;;  %v1577_v59 = vsel %vm1570_vm12, %v1573_v53, %v1576_v55 }
 0x2a6   :  { %vm1678_vm0 = vcmp.eq.s32.totalorder %v1673_v34, 2  ;;  %vm1779_vm1 = vcmp.eq.s32.totalorder %v4593_v8, 0  ;;  %v2266_v30 = vshll.u32 %v4601_v10, 30  ;;  %v2800_v37 = vpop.eup %2799  ;;  %vm1567_vm2 = vweird.f32 %v3459_v5 }
 0x2a7   :  { %v1680_v26 = vsel %vm1678_vm0, %v1679_v49, %v4533_v27  ;;  %vm1782_vm3 = vcmp.eq.s32.totalorder %v4593_v8, 2  ;;  %v1978_v58 = vsel %vm1893_vm7, %v1977_v24, %v4282_v13  ;;  %v4971_v36 = vand.u32 2147483647, %v4082_v14  ;;  %v2802_v17 = vpop.eup %2801 }
 0x2a8   :  { %vm1671_vm5 = vweird.f32 %v3613_v20  ;;  %v1677_v50 = vsel %vm1675_vm15, %v4530_v4, %v1676_v51  ;;  %v2183_v54 = vxor.u32 2147483648, %v2182_v18  ;;  %v4628_v63 = vsub.s32 %v2263_v40, %v2266_v30 }
 0x2a9   :  { %vm4618_vm4 = vcmp.le.f32.partialorder %v4971_v36, 0.7853982  ;;  %v1780_v13 = vxor.u32 2147483648, %v4542_v16  ;;  %v1783_v2 = vxor.u32 2147483648, %v4538_v47  ;;  %v1881_v11 = vand.u32 3, %v1880_v6 }
 0x2aa   :  { %v2083_v27 = vsel %vm4618_vm4, %v4082_v14, %v2080_v35  ;;  %v2082_v39 = vsel %vm1997_vm14, %v2081_v32, %v4374_v31  ;;  %v1887_v41 = vxor.u32 2147483648, %v2800_v37  ;;  %v1980_v4 = vsel %vm4579_vm11, 0, %v1978_v58 }
 0x2ab   :  { %vm2101_vm6 = vcmp.lt.s32.totalorder %v4974_v22, 0  ;;  %v2269_v56 = vsub.s32 0, %v4628_v63  ;;  %v1884_v9 = vxor.u32 2147483648, %v2802_v17  ;;  %2807 = vcosq.f32 %v2083_v27 }
 0x2ac   :  { %vm106_vm7 = vcmask 1024   ;;  %vm1775_vm8 = vweird.f32 %v3610_v44  ;;  %v2084_v33 = vsel %vm4618_vm4, 0, %v2082_v39  ;;  %2809 = vsinq.f32 %v2083_v27  ;;  %v4982_v39 = vld [vmem:[#allocation21_spill] sm:$0xff] }
 0x2ad   :  { %v2184_v31 = vsel %vm2101_vm6, %v2183_v54, %v2182_v18  ;;  %v2665_v38 = vmin.u32 %v2269_v56, %v4628_v63  ;;  %v2987_v0 = vmov 0.0   ;;  %v1681_v1 = vsel %vm1674_vm13, %v1677_v50, %v1680_v26  ;;  %v4692_v26 = vld [vmem:[#allocation11] sm:$0xff] }
 0x2ae   :  { %107 = vst.msk [vmem:[%s4868_s7] sm:$0x3] %vm106_vm7, %v2987_v0  ;;  %vm1883_vm9 = vcmp.eq.s32.totalorder %v1881_v11, 0  ;;  %vm1886_vm10 = vcmp.eq.s32.totalorder %v1881_v11, 2  ;;  %v1984_v48 = vadd.s32 3, %v1980_v4  ;;  %v1781_v42 = vsel %vm1779_vm1, %v4538_v47, %v1780_v13 }
 0x2af   :  { %v1784_v7 = vsel %vm1782_vm3, %v1783_v2, %v4542_v16  ;;  %v4975_v43 = vand.u32 2147483647, %v4974_v22  ;;  %v2271_v12 = vclz %v2665_v38  ;;  %v1885_v34 = vsel %vm1883_vm9, %v2800_v37, %v1884_v9  ;;  %v4978_v37 = vld [vmem:[#allocation22_spill] sm:$0xff] }
 0x2b0   :  { %v1888_v3 = vsel %vm1886_vm10, %v1887_v41, %v2802_v17  ;;  %v2088_v15 = vadd.s32 3, %v2084_v33  ;;  %v2804_v53 = vpop.eup %2803  ;;  %v4667_v47 = vsel %vm1567_vm2, nan, %v1577_v59  ;;  %vm1778_vm12 = vcmp.lt.s32.totalorder %v4593_v8, 2  ;;  %v4686_v59 = vld [vmem:[%s4866_s5] sm:$0xff]  ;;  %s2990_s5 = smov [#allocation13]  }
 0x2b1   :  { %vm4658_vm11 = vcmp.le.f32.partialorder %v4975_v43, 0.7853982  ;;  %vm1879_vm13 = vweird.f32 %v3718_v57  ;;  %v2666_v16 = vadd.s32 4294967294, %v2271_v12  ;;  %v2806_v55 = vpop.eup %2805  ;;  %v1682_v28 = vsel %vm1671_vm5, nan, %v1681_v1  ;;  %s2554_s14 = sshll.u32 %s2990_s5, 4  ;;  %s2555_s14 = int_to_ptr.vmem [resolvable:$true] %s2554_s14 }
 0x2b2   :  { %v2187_v40 = vsel %vm4658_vm11, %v4974_v22, %v2184_v31  ;;  %vm1882_vm14 = vcmp.lt.s32.totalorder %v1881_v11, 2  ;;  %v1985_v46 = vand.u32 3, %v1984_v48  ;;  %v2185_v45 = vsub.s32 4, %v4475_v61  ;;  %v4985_v48 = vld [vmem:[#allocation23_spill] sm:$0xff]  ;;  %s2942_s15 = scalar_lea.vmem %s2555_s14, 128  ;;  %p2947_p3 = scmp.lt.s32.totalorder %s2555_s14, %s2555_s14 }
 0x2b3   :  { %v1785_v25 = vsel %vm1778_vm12, %v1781_v42, %v1784_v7  ;;  %v1889_v51 = vsel %vm1882_vm14, %v1885_v34, %v1888_v3  ;;  %2811 = vcosq.f32 %v2187_v40  ;;  %vm2667_vm15 = vcmp.lt.s32.totalorder %v2666_v16, 0  ;;  %v4986_v7 = vld [vmem:[#allocation24_spill] sm:$0xff]  ;;  %v4987_v3 = vld [vmem:[#allocation26_spill] sm:$0xff]  ;;  %p2943_p2 = scmp.ne.s32.totalorder %s2555_s14, %s2942_s15  ;;  %p2948_p4 = scmp.lt.s32.totalorder %s2942_s15, %s2942_s15 }
 0x2b4   :  { %v1991_v5 = vxor.u32 2147483648, %v2804_v53  ;;  %v4674_v49 = vand.u32 3, %v2088_v15  ;;  %2813 = vsinq.f32 %v2187_v40  ;;  %v2274_v8 = vsel %vm2667_vm15, 0, %v2666_v16 }
 0x2b5   :  { %v1988_v24 = vxor.u32 2147483648, %v2806_v55  ;;  %v2259_v18 = vadd.s32 %v4550_v60, %v4548_v21  ;;  %v2275_v6 = vsub.s32 32, %v2274_v8  ;;  %v2279_v20 = vsub.s32 4294967266, %v2274_v8  ;;  %p2949_p5 = por %p2948_p4, %p2947_p3 }
 0x2b6   :  { %v1786_v35 = vsel %vm1775_vm8, nan, %v1785_v25  ;;  %vm1986_vm0 = vcmp.lt.s32.totalorder %v1985_v46, 2  ;;  %vm1990_vm1 = vcmp.eq.s32.totalorder %v1985_v46, 2  ;;  %v2186_v32 = vsel %vm2101_vm6, %v2185_v45, %v4475_v61 }
 0x2b7   :  { %vm1983_vm2 = vweird.f32 %v3810_v52  ;;  %v2276_v21 = vshll.u32 %v4628_v63, %v2274_v8  ;;  %v2277_v60 = vshrl.u32 %v2259_v18, %v2275_v6  ;;  %v2280_v30 = vadd.s32 127, %v2279_v20  ;;  %v4979_v63 = vld [vmem:[#allocation20_spill] sm:$0xff]  ;;  %p2950_p6 = pnand %p2949_p5, %p2943_p2 }
 0x2b8   :  { %v2316_v44 = vrot.slane %v4686_v59, %v4978_v37  ;;  %v4696_v58 = vsel %vm1879_vm13, nan, %v1889_v51  ;;  %vm1987_vm3 = vcmp.eq.s32.totalorder %v1985_v46, 0  ;;  %v1992_v61 = vsel %vm1990_vm1, %v1991_v5, %v2806_v55  ;;  %v2808_v36 = vpop.eup %2807 }
 0x2b9   :  { %vm2091_vm4 = vcmp.eq.s32.totalorder %v4674_v49, 0  ;;  %v1989_v19 = vsel %vm1987_vm3, %v2804_v53, %v1988_v24  ;;  %v2188_v17 = vsel %vm4658_vm11, 0, %v2186_v32  ;;  %v2278_v50 = vor.u32 %v2277_v60, %v2276_v21  ;;  %v2810_v54 = vpop.eup %2809 }
 0x2ba   :  { %v2281_v27 = vshll.u32 %v2280_v30, 23  ;;  %vm2094_vm5 = vcmp.eq.s32.totalorder %v4674_v49, 2  ;;  %vm2205_vm6 = vcmp.lt.s32.totalorder %v4394_v62, 0  ;;  %v2312_v57 = vrot.slane %v4686_v59, %v4979_v63 }
 0x2bb   :  { %v4706_v13 = vsub.f32 0.0, %v4692_v26  ;;  %vm2090_vm8 = vcmp.lt.s32.totalorder %v4674_v49, 2  ;;  %vm4711_vm9 = vcmp.le.f32.partialorder %v2203_v29, 0.7853982  ;;  %v2320_v41 = vrot.slane %v4686_v59, %v4982_v39 }
 0x2bc   :  { %v2282_v11 = vor.u32 4788187, %v2281_v27  ;;  %vm4717_vm10 = vcmp.gt.f32.partialorder %v1682_v28, %v2316_v44  ;;  %v1993_v56 = vsel %vm1986_vm0, %v1989_v19, %v1992_v61  ;;  %v2192_v9 = vadd.s32 3, %v2188_v17 }
 0x2bd   :  { %v2443_v33 = vrot.slane %v4692_v26, %v4978_v37  ;;  %v2484_v29 = vrot.slane %v4706_v13, %v4978_v37  ;;  %v2092_v31 = vxor.u32 2147483648, %v2810_v54  ;;  %v2095_v38 = vxor.u32 2147483648, %v2808_v36 }
 0x2be   :  { %v2283_v0 = vand.u32 2147483647, %v2282_v11  ;;  %v2285_v1 = vcvt.s32.f32 %v2278_v50  ;;  %v2324_v42 = vrot.slane %v4686_v59, %v4985_v48  ;;  %v2328_v43 = vrot.slane %v4686_v59, %v4986_v7 }
 0x2bf   :  { %v2439_v23 = vrot.slane %v4692_v26, %v4979_v63  ;;  %v2480_v12 = vrot.slane %v4706_v13, %v4979_v63  ;;  %vm2087_vm11 = vweird.f32 %v4082_v14  ;;  %v2332_v15 = vrot.slane %v4686_v59, %v4987_v3 }
 0x2c0   :  { %v2286_v34 = vmul.f32 %v2285_v1, %v2283_v0  ;;  %vm4738_vm12 = vcmp.gt.f32.partialorder %v4667_v47, %v2312_v57  ;;  %vm4742_vm13 = vcmp.gt.f32.partialorder %v1786_v35, %v2320_v41  ;;  %v2812_v16 = vpop.eup %2811  ;;  %v1994_v55 = vsel %vm1983_vm2, nan, %v1993_v56 }
 0x2c1   :  { %v2193_v28 = vand.u32 3, %v2192_v9  ;;  %v2518_v46 = vsel %vm4717_vm10, %v2443_v33, %v2484_v29  ;;  %v2814_v45 = vpop.eup %2813  ;;  %v2093_v25 = vsel %vm2091_vm4, %v2808_v36, %v2092_v31  ;;  %v2096_v47 = vsel %vm2094_vm5, %v2095_v38, %v2810_v54  ;;  %v4998_v31 = vld [vmem:[#allocation25_spill] sm:$0xff] }
 0x2c2   :  { %v2287_v51 = vxor.u32 2147483648, %v2286_v34  ;;  %v2447_v5 = vrot.slane %v4692_v26, %v4982_v39  ;;  %v2289_v8 = vsub.s32 4, %v4601_v10  ;;  %v2488_v52 = vrot.slane %v4706_v13, %v4982_v39 }
 0x2c3   :  { %v2517_v24 = vsel %vm4738_vm12, %v2439_v23, %v2480_v12  ;;  %vm2525_vm14 = vcmask 1041408   ;;  %v2451_v6 = vrot.slane %v4692_v26, %v4985_v48  ;;  %v2455_v20 = vrot.slane %v4692_v26, %v4986_v7 }
 0x2c4   :  { %v2288_v18 = vsel %vm2205_vm6, %v2287_v51, %v2286_v34  ;;  %v2527_v35 = vsel %vm2525_vm14, %v2518_v46, 0.0  ;;  %v2097_v32 = vsel %vm2090_vm8, %v2093_v25, %v2096_v47  ;;  %v2196_v21 = vxor.u32 2147483648, %v2814_v45  ;;  %v5002_v25 = vld [vmem:[#allocation19_spill] sm:$0xff] }
 0x2c5   :  { %v2199_v60 = vxor.u32 2147483648, %v2812_v16  ;;  %v2291_v30 = vsel %vm4711_vm9, %v4394_v62, %v2288_v18  ;;  %v2492_v37 = vrot.slane %v4706_v13, %v4985_v48  ;;  %v2496_v44 = vrot.slane %v4706_v13, %v4986_v7 }
 0x2c6   :  { %2815 = vcosq.f32 %v2291_v30  ;;  %v2526_v61 = vsel %vm2525_vm14, %v2517_v24, 0.0  ;;  %v2290_v49 = vsel %vm2205_vm6, %v2289_v8, %v4601_v10  ;;  %v2519_v36 = vsel %vm4742_vm13, %v2447_v5, %v2488_v52 }
 0x2c7   :  { %2817 = vsinq.f32 %v2291_v30  ;;  %v2528_v19 = vadd.f32 %v2527_v35, %v2526_v61  ;;  %vm2195_vm15 = vcmp.eq.s32.totalorder %v2193_v28, 0  ;;  %vm2198_vm0 = vcmp.eq.s32.totalorder %v2193_v28, 2 }
 0x2c8   :  { %vm4784_vm1 = vcmp.gt.f32.partialorder %v4696_v58, %v2324_v42  ;;  %vm4788_vm2 = vcmp.gt.f32.partialorder %v1994_v55, %v2328_v43  ;;  %v2098_v27 = vsel %vm2087_vm11, nan, %v2097_v32  ;;  %vm2194_vm3 = vcmp.lt.s32.totalorder %v2193_v28, 2 }
 0x2c9   :  { %v2197_v10 = vsel %vm2195_vm15, %v2812_v16, %v2196_v21  ;;  %v2200_v54 = vsel %vm2198_vm0, %v2199_v60, %v2814_v45  ;;  %v2292_v63 = vsel %vm4711_vm9, 0, %v2290_v49  ;;  %v2988_v57 = vmov 1966171168  }
 0x2ca   :  { %v2386_v11 = vunpack.c.l.s4 %v2988_v57  ;;  %v2459_v58 = vrot.slane %v4692_v26, %v4987_v3  ;;  %v2529_v39 = vsel %vm2525_vm14, %v2519_v36, 0.0  ;;  %v2500_v41 = vrot.slane %v4706_v13, %v4987_v3  ;;  %v4999_v3 = vld [vmem:[#allocation27_spill] sm:$0xff] }
 0x2cb   :  { %v2520_v14 = vsel %vm4784_vm1, %v2451_v6, %v2492_v37  ;;  %v2521_v56 = vsel %vm4788_vm2, %v2455_v20, %v2496_v44  ;;  %v2530_v9 = vadd.f32 %v2529_v39, %v2528_v19  ;;  %v2201_v33 = vsel %vm2194_vm3, %v2197_v10, %v2200_v54 }
 0x2cc   :  { %vm4805_vm4 = vcmp.gt.f32.partialorder %v2098_v27, %v2332_v15  ;;  %v2296_v29 = vadd.s32 3, %v2292_v63  ;;  %vm2191_vm5 = vweird.f32 %v4974_v22  ;;  %v2336_v38 = vrot.slane %v4686_v59, %v4998_v31 }
 0x2cd   :  { %v2531_v0 = vsel %vm2525_vm14, %v2520_v14, 0.0  ;;  %v2533_v1 = vsel %vm2525_vm14, %v2521_v56, 0.0  ;;  %v2202_v48 = vsel %vm2191_vm5, nan, %v2201_v33  ;;  %v2387_v42 = vunpack.c.0.s8 %v2386_v11 }
 0x2ce   :  { %v2522_v7 = vsel %vm4805_vm4, %v2459_v58, %v2500_v41  ;;  %v2532_v43 = vadd.f32 %v2531_v0, %v2530_v9  ;;  %v2297_v23 = vand.u32 3, %v2296_v29  ;;  %v2463_v12 = vrot.slane %v4692_v26, %v4998_v31 }
 0x2cf   :  { %v2504_v22 = vrot.slane %v4706_v13, %v4998_v31  ;;  %v2340_v15 = vrot.slane %v4686_v59, %v4999_v3  ;;  %vm4822_vm6 = vcmp.gt.f32.partialorder %v2202_v48, %v2336_v38  ;;  %v2535_v55 = vsel %vm2525_vm14, %v2522_v7, 0.0 }
 0x2d0   :  { %v2534_v34 = vadd.f32 %v2533_v1, %v2532_v43  ;;  %v2989_v46 = vmov -1.0   ;;  %v2390_v47 = vsub.s32 %v2387_v42, %v5002_v25  ;;  %vm2302_vm8 = vcmp.eq.s32.totalorder %v2297_v23, 2 }
 0x2d1   :  { %v2361_v45 = vsel %vm4788_vm2, 1.0, %v2989_v46  ;;  %v2358_v51 = vsel %vm4717_vm10, 1.0, %v2989_v46  ;;  %v2360_v5 = vsel %vm4784_vm1, 1.0, %v2989_v46  ;;  %v2362_v52 = vsel %vm4805_vm4, 1.0, %v2989_v46 }
 0x2d2   :  { %v2357_v24 = vsel %vm4738_vm12, 1.0, %v2989_v46  ;;  %v2359_v18 = vsel %vm4742_vm13, 1.0, %v2989_v46  ;;  %v2523_v4 = vsel %vm4822_vm6, %v2463_v12, %v2504_v22  ;;  %v2536_v20 = vadd.f32 %v2535_v55, %v2534_v34 }
 0x2d3   :  { %v2816_v28 = vpop.eup %2815  ;;  %vm2299_vm9 = vcmp.eq.s32.totalorder %v2297_v23, 0  ;;  %v2668_v32 = vpack.c.bf16 %v2358_v51, %v2357_v24  ;;  %v2669_v21 = vpack.c.bf16 %v2360_v5, %v2359_v18  ;;  %vm2298_vm10 = vcmp.lt.s32.totalorder %v2297_v23, 2 }
 0x2d4   :  { %v2818_v59 = vpop.eup %2817  ;;  %v2303_v8 = vxor.u32 2147483648, %v2816_v28  ;;  %v2467_v30 = vrot.slane %v4692_v26, %v4999_v3  ;;  %v2508_v40 = vrot.slane %v4706_v13, %v4999_v3  ;;  %vm2295_vm11 = vweird.f32 %v4394_v62 }
 0x2d5   :  { %v2300_v6 = vxor.u32 2147483648, %v2818_v59  ;;  %v2670_v37 = vpack.c.bf16 %v2362_v52, %v2361_v45  ;;  %v2537_v44 = vsel %vm2525_vm14, %v2523_v4, 0.0  ;;  %v2391_v36 = vrot.slane %v2668_v32, %v2390_v47 }
 0x2d6   :  { %v2304_v35 = vsel %vm2302_vm8, %v2303_v8, %v2818_v59  ;;  %v2538_v49 = vadd.f32 %v2537_v44, %v2536_v20  ;;  %v2398_v19 = vrot.slane %v2669_v21, %v2390_v47  ;;  %v2363_v17 = vsel %vm4822_vm6, 1.0, %v2989_v46 }
 0x2d7   :  { %v2301_v60 = vsel %vm2299_vm9, %v2816_v28, %v2300_v6  ;;  %v2405_v13 = vrot.slane %v2670_v37, %v2390_v47 }
 0x2d8   :  { %v2305_v53 = vsel %vm2298_vm10, %v2301_v60, %v2304_v35  ;;  %v2413_v63 = vcombine.low %v2391_v36, %v2398_v19 }
 0x2d9   :  { %v2306_v61 = vsel %vm2295_vm11, nan, %v2305_v53 }
 0x2da   :  { %vm2356_vm12 = vcmp.gt.f32.partialorder %v2306_v61, %v2340_v15  ;;  %v2421_v11 = vrot.slane %v2413_v63, %v2390_v47 }
 0x2db   :  { %v2364_v50 = vsel %vm2356_vm12, 1.0, %v2989_v46  ;;  %v2524_v27 = vsel %vm2356_vm12, %v2467_v30, %v2508_v40 }
 0x2dc   :  { %v2671_v26 = vpack.c.bf16 %v2364_v50, %v2363_v17  ;;  %v2539_v10 = vsel %vm2525_vm14, %v2524_v27, 0.0 }
 0x2dd   :  { %v2540_v54 = vadd.f32 %v2539_v10, %v2538_v49 }
 0x2de   :  { %v2412_v62 = vrot.slane %v2671_v26, %v2390_v47 }
 0x2df   :  { %2541 = vadd.xlane.f32.xlu0 %v2540_v54 }
 0x2e0   :  { %v2414_v57 = vcombine.low %v2405_v13, %v2412_v62 }
 0x2e2   :  { %v2428_v58 = vrot.slane %v2414_v57, %v2390_v47 }
 0x2e4   :  { %v2429_v39 = vcombine.low %v2421_v11, %v2428_v58 }
 0x2e6   :  { %2431 = vst [vmem:[#allocation13] sm:$0xff] %v2429_v39 }
 0x2e7   :  { %2953 = shalt.err (!%p2950_p6)
}
 0x2e8   :  { %2557 = dma.vmem_to_hbm [thread:$0]  %s2555_s14, 128, %s4869_s8, [#allocation4]   ;;  %v2433_v41 = vld [vmem:[%s4868_s7] sm:$0x3] }
 0x368   :  { %v2542_v14 = vpop.xlane.xlu0 %2541 }
 0x369   :  { %v2543_v56 = vadd.f32 %v2542_v14, %v2433_v41 }
 0x36b   :  { %2545 = vst.msk [vmem:[%s4868_s7] sm:$0x3] %vm106_vm7, %v2543_v56 }
 0x36c   :  { %2970 = dma.done.wait [#allocation4], 128  }
 0x36d   :  { %2971 = vsyncadd [#allocation4], 4294967168 }
 0x36e   :  { %2563 = vsyncpa [#allocation3], 1 }
 0x36f   :  { %2564 = vsyncpa [#allocation6], 1 }
 0x370   :  { %2565 = vsyncpa [#allocation9], 1 }
 0x371   :  { %2566 = vsyncpa [#allocation12], 1 }
 0x372   :  { %2567 = vsyncpa [#allocation4], 1 }

</bundles_post_ra>
